<compile_context>
chip_gen: v6e
topology: v6e:2x2x1
jax: 0.10.0
libtpu: 0.0.40
codegen_flags: <defaults>
</compile_context>

<pallas_src>
import jax
import jax.numpy as jnp
from jax.experimental import pallas as pl
from jax.experimental.pallas import tpu as pltpu


# ------------------------------ fused kernel ------------------------------- #

def _tcnnet_fused_kernel(
    colsqt_ref,   # (4, 9*S, B*PP)   per-pool-tap im2col, bf16
    wblkt_ref,    # (S*Cc, 9*S)      block-diagonal per-timestep conv2d weights, bf16
    cbias_ref,    # (S*Cc, 1)        conv2d bias, f32
    wfct_ref,     # (S, Cc*PP, L)    per-timestep FC weights, bf16
    cfb_ref,      # (S, 1, L)        per-timestep FC bias, f32
    w1r_ref,      # (C1, K*S)        TCN conv1 weights (tap-major cols), bf16
    b1_ref,       # (C1, 1)          f32
    w2r_ref,      # (C1, K*C1)       TCN conv2 weights (tap-major cols), bf16
    b2_ref,       # (C1, 1)          f32
    dsw_ref,      # (C1, S)          residual 1x1 conv weight, bf16
    dsb_ref,      # (C1, 1)          f32
    fcw3_ref,     # (2, C1, L)       final FC weight, f32
    fcb2_ref,     # (1, 2)           final FC bias, f32
    out_ref,      # (B, 2)           output, f32
    ptp_ref,      # scratch (S*B, Cc*PP)    regrouped pooled features, f32
    featpad_ref,  # scratch (B, S, L+K-1)   causally padded TCN input, f32
    xcol_ref,     # scratch (B, K*S, L)     tap-stacked TCN conv1 input, f32
    h1pad_ref,    # scratch (B, C1, L+K-1)  causally padded TCN hidden, f32
    h1col_ref,    # scratch (B, K*C1, L)    tap-stacked TCN conv2 input, f32
    y_ref,        # scratch (B, C1, L)      TCN block output, f32
):
    f32 = jnp.float32
    bf16 = jnp.bfloat16

    SC = wblkt_ref.shape[0]          # S*Cc
    S = cfb_ref.shape[0]
    Cc = SC // S
    L = cfb_ref.shape[2]
    B = out_ref.shape[0]
    PP = colsqt_ref.shape[2] // B
    C1, KS = w1r_ref.shape
    K = KS // S
    NQ = colsqt_ref.shape[0]         # 4 pool taps

    # --- Stage A+B: all S per-timestep Conv2d(1,Cc,3,pad=1) + ReLU + 2x2 max-pool
    # as 4 GEMMs (one per pool tap); max over taps replaces the pool, ReLU commutes
    # with max.  Output rows=(s,c), lanes=(b,p) -- lane-dense, no transposes.
    m = None
    for q in range(NQ):
        t = jnp.dot(wblkt_ref[...], colsqt_ref[q], preferred_element_type=f32)
        m = t if m is None else jnp.maximum(m, t)
    pooled_t = jnp.maximum(m + cbias_ref[...], 0.0)      # (S*Cc, B*PP) f32

    # --- Regroup pooled activations into (S*B, Cc*PP) so each per-timestep FC is a
    # single 512-deep-contraction matmul (sublane<->lane regroup done with small
    # static lane-slice stores; no XLU transposes, no unsupported reshapes).
    for s in range(S):
        for c in range(Cc):
            src = pooled_t[s * Cc + c:s * Cc + c + 1, :]             # (1, B*PP)
            for b in range(B):
                ptp_ref[s * B + b:s * B + b + 1, c * PP:(c + 1) * PP] = \
                    src[:, b * PP:(b + 1) * PP]

    # --- Stage C: per-timestep Linear(Cc*PP -> L) + ReLU, one matmul per timestep,
    # written directly as the causally left-padded TCN input (channel=s, length=L).
    featpad_ref[:, :, :K - 1] = jnp.zeros((B, S, K - 1), f32)
    for s in range(S):
        lhs = ptp_ref[s * B:(s + 1) * B, :].astype(bf16)             # (B, Cc*PP)
        f = jnp.dot(lhs, wfct_ref[s], preferred_element_type=f32)    # (B, L)
        featpad_ref[:, s, K - 1:] = jnp.maximum(f + cfb_ref[s], 0.0)

    # --- Stage D: TCN causal conv1 (K taps folded into a 64-deep contraction) + ReLU.
    for k in range(K):
        xcol_ref[:, k * S:(k + 1) * S, :] = featpad_ref[:, :, k:k + L]
    h1pad_ref[:, :, :K - 1] = jnp.zeros((B, C1, K - 1), f32)
    for b in range(B):
        a1 = jnp.dot(w1r_ref[...], xcol_ref[b], preferred_element_type=f32)  # (C1, L)
        h1pad_ref[b, :, K - 1:] = jnp.maximum(a1 + b1_ref[...], 0.0)

    # --- Stage E: TCN causal conv2 (128-deep contraction) + ReLU, 1x1 residual,
    # add + ReLU.
    for k in range(K):
        h1col_ref[:, k * C1:(k + 1) * C1, :] = h1pad_ref[:, :, k:k + L]
    for b in range(B):
        a2 = jnp.dot(w2r_ref[...], h1col_ref[b], preferred_element_type=f32)  # (C1, L)
        h2 = jnp.maximum(a2 + b2_ref[...], 0.0)
        res = jnp.dot(dsw_ref[...], featpad_ref[b, :, K - 1:],
                      preferred_element_type=f32) + dsb_ref[...]
        y_ref[b] = jnp.maximum(h2 + res, 0.0)

    # --- Stage F: final Linear(C1*L -> 2) over the PyTorch (c, l) flatten order.
    y = y_ref[...]                                                   # (B, C1, L)
    prod = y[:, None, :, :] * fcw3_ref[...][None, :, :, :]           # (B, 2, C1, L)
    out = jnp.sum(jnp.sum(prod, axis=-1), axis=-1) + fcb2_ref[...]
    out_ref[...] = out


# ------------------------------- wrapper ----------------------------------- #

def tcnnet_forward(X, params):
    f32 = jnp.float32
    bf16 = jnp.bfloat16
    B, S, H, W = X.shape
    Cc = params["conv_w"].shape[1]
    HH, WW = H // 2, W // 2
    PP = HH * WW
    L = params["cfc_w"].shape[1]
    C1 = params["tcn_w1"].shape[0]
    K = params["tcn_w1"].shape[2]

    # -- image layout plumbing: one im2col matrix per 2x2 pool tap (di, dj) --
    # colsqt[di*2+dj, t*S+s, b*PP + i*WW + j] = xpad[b, s, 2i+di+dy, 2j+dj+dx], t=dy*3+dx
    xpad = jnp.pad(X.astype(f32), ((0, 0), (0, 0), (1, 1), (1, 1)))
    taps = jnp.stack([xpad[:, :, dy:dy + H, dx:dx + W]
                      for dy in range(3) for dx in range(3)], axis=0)   # (9,B,S,H,W)
    taps = taps.reshape(9, B, S, HH, 2, WW, 2)
    colsqt = jnp.transpose(taps, (4, 6, 0, 2, 1, 3, 5)).reshape(
        4, 9 * S, B * PP).astype(bf16)

    # -- one-time weight layout plumbing (tiny, wrapper-side) --
    cw9 = params["conv_w"].astype(f32).reshape(S, Cc, 9)
    w4 = cw9[:, :, :, None] * jnp.eye(S, dtype=f32)[:, None, None, :]   # (S,Cc,9,S')
    wblkt = w4.reshape(S * Cc, 9 * S).astype(bf16)
    cbias = params["conv_b"].astype(f32).reshape(S * Cc, 1)

    wfct = jnp.transpose(params["cfc_w"].astype(f32), (0, 2, 1)).astype(bf16)  # (S,512,L)
    cfb = params["cfc_b"].astype(f32).reshape(S, 1, L)

    w1r = jnp.transpose(params["tcn_w1"].astype(f32), (0, 2, 1)).reshape(
        C1, K * S).astype(bf16)
    b1 = params["tcn_b1"].astype(f32).reshape(C1, 1)
    w2r = jnp.transpose(params["tcn_w2"].astype(f32), (0, 2, 1)).reshape(
        C1, K * C1).astype(bf16)
    b2 = params["tcn_b2"].astype(f32).reshape(C1, 1)
    dsw = params["ds_w"].astype(bf16)
    dsb = params["ds_b"].astype(f32).reshape(C1, 1)
    fcw3 = params["fc_w"].astype(f32).reshape(2, C1, L)
    fcb2 = params["fc_b"].astype(f32).reshape(1, 2)

    inputs = (colsqt, wblkt, cbias, wfct, cfb, w1r, b1, w2r, b2, dsw, dsb, fcw3, fcb2)
    vmem = lambda: pl.BlockSpec(memory_space=pltpu.MemorySpace.VMEM)

    return pl.pallas_call(
        _tcnnet_fused_kernel,
        out_shape=jax.ShapeDtypeStruct((B, 2), f32),
        in_specs=[vmem() for _ in inputs],
        out_specs=vmem(),
        scratch_shapes=[
            pltpu.VMEM((S * B, Cc * PP), f32),       # regrouped pooled features
            pltpu.VMEM((B, S, L + K - 1), f32),      # causally padded TCN input
            pltpu.VMEM((B, K * S, L), f32),          # tap-stacked TCN conv1 input
            pltpu.VMEM((B, C1, L + K - 1), f32),     # causally padded TCN hidden
            pltpu.VMEM((B, K * C1, L), f32),         # tap-stacked TCN conv2 input
            pltpu.VMEM((B, C1, L), f32),             # TCN block output
        ],
    )(*inputs)


# --------------------------- pure-JAX reference ----------------------------- #

def tcnnet_reference(X, params):
    B, S, H, W = X.shape
    Cc = params["conv_w"].shape[1]
    L = params["cfc_w"].shape[1]
    K = params["tcn_w1"].shape[2]
    X = X.astype(jnp.float32)

    feats = []
    for s in range(S):
        xp = jnp.pad(X[:, s], ((0, 0), (1, 1), (1, 1)))
        cols = jnp.stack([xp[:, dy:dy + H, dx:dx + W]
                          for dy in range(3) for dx in range(3)], axis=-1)   # (B,H,W,9)
        conv = jnp.einsum('bhwt,ct->bchw', cols, params["conv_w"][s].reshape(Cc, 9))
        conv = jax.nn.relu(conv + params["conv_b"][s][None, :, None, None])
        pooled = conv.reshape(B, Cc, H // 2, 2, W // 2, 2).max(axis=(3, 5))
        f = jax.nn.relu(pooled.reshape(B, -1) @ params["cfc_w"][s].T + params["cfc_b"][s])
        feats.append(f)
    feats = jnp.stack(feats, axis=1)                                         # (B, S, L)

    def causal_conv(x, w, b):
        xp = jnp.pad(x, ((0, 0), (0, 0), (K - 1, 0)))
        wins = jnp.stack([xp[:, :, k:k + L] for k in range(K)], axis=2)      # (B,C,K,L)
        return jnp.einsum('bckl,ock->bol', wins, w) + b[None, :, None]

    h1 = jax.nn.relu(causal_conv(feats, params["tcn_w1"], params["tcn_b1"]))
    h2 = jax.nn.relu(causal_conv(h1, params["tcn_w2"], params["tcn_b2"]))
    res = jnp.einsum('oc,bcl->bol', params["ds_w"], feats) + params["ds_b"][None, :, None]
    y = jax.nn.relu(h2 + res)
    return y.reshape(B, -1) @ params["fc_w"].T + params["fc_b"]


# ---------------------------------- main ------------------------------------ #

if __name__ == "__main__":
    B, S, H, W = 2, 8, 16, 16     # small: batch=2, seq_len=8, 16x16 images
    CONV_CH = 8                   # assumed ConvNet conv channels
    CNN_OUT = 50                  # cnn_output_size (from module)
    TCN_CH = 16                   # tcn_channels = [16]
    KSIZE = 8                     # TCN kernel_size

    key = jax.random.PRNGKey(0)
    ks = jax.random.split(key, 13)
    flat_conv = CONV_CH * (H // 2) * (W // 2)                     # 512

    params = {
        "conv_w": 0.1 * jax.random.normal(ks[0], (S, CONV_CH, 3, 3), jnp.float32),
        "conv_b": 0.1 * jax.random.normal(ks[1], (S, CONV_CH), jnp.float32),
        "cfc_w": 0.05 * jax.random.normal(ks[2], (S, CNN_OUT, flat_conv), jnp.float32),
        "cfc_b": 0.05 * jax.random.normal(ks[3], (S, CNN_OUT), jnp.float32),
        "tcn_w1": 0.1 * jax.random.normal(ks[4], (TCN_CH, S, KSIZE), jnp.float32),
        "tcn_b1": 0.1 * jax.random.normal(ks[5], (TCN_CH,), jnp.float32),
        "tcn_w2": 0.1 * jax.random.normal(ks[6], (TCN_CH, TCN_CH, KSIZE), jnp.float32),
        "tcn_b2": 0.1 * jax.random.normal(ks[7], (TCN_CH,), jnp.float32),
        "ds_w": 0.1 * jax.random.normal(ks[8], (TCN_CH, S), jnp.float32),
        "ds_b": 0.1 * jax.random.normal(ks[9], (TCN_CH,), jnp.float32),
        "fc_w": 0.05 * jax.random.normal(ks[10], (2, CNN_OUT * TCN_CH), jnp.float32),
        "fc_b": 0.05 * jax.random.normal(ks[11], (2,), jnp.float32),
    }

    X = jax.random.normal(ks[12], (B, S, H, W), jnp.float32)

    fwd = jax.jit(tcnnet_forward)
    out = jax.block_until_ready(fwd(X, params))

    ref = jax.block_until_ready(jax.jit(tcnnet_reference)(X, params))
    err = float(jnp.max(jnp.abs(out - ref)))

    assert out.shape == (B, 2), out.shape
    assert bool(jnp.all(jnp.isfinite(out)))
    assert err < 5e-2, f"kernel/reference mismatch: max abs err {err}"
    print("KERNEL_OK")
</pallas_src>

<mosaic_0001>
module attributes {stable_mosaic.version = 11 : i64} {
  func.func @_tcnnet_fused_kernel(%arg0: memref<4x72x128xbf16, #tpu.memory_space<vmem>>, %arg1: memref<64x72xbf16, #tpu.memory_space<vmem>>, %arg2: memref<64x1xf32, #tpu.memory_space<vmem>>, %arg3: memref<8x512x50xbf16, #tpu.memory_space<vmem>>, %arg4: memref<8x1x50xf32, #tpu.memory_space<vmem>>, %arg5: memref<16x64xbf16, #tpu.memory_space<vmem>>, %arg6: memref<16x1xf32, #tpu.memory_space<vmem>>, %arg7: memref<16x128xbf16, #tpu.memory_space<vmem>>, %arg8: memref<16x1xf32, #tpu.memory_space<vmem>>, %arg9: memref<16x8xbf16, #tpu.memory_space<vmem>>, %arg10: memref<16x1xf32, #tpu.memory_space<vmem>>, %arg11: memref<2x16x50xf32, #tpu.memory_space<vmem>>, %arg12: memref<1x2xf32, #tpu.memory_space<vmem>>, %arg13: memref<2x2xf32, #tpu.memory_space<vmem>>, %arg14: memref<16x512xf32, #tpu.memory_space<vmem>>, %arg15: memref<2x8x57xf32, #tpu.memory_space<vmem>>, %arg16: memref<2x64x50xf32, #tpu.memory_space<vmem>>, %arg17: memref<2x16x57xf32, #tpu.memory_space<vmem>>, %arg18: memref<2x128x50xf32, #tpu.memory_space<vmem>>, %arg19: memref<2x16x50xf32, #tpu.memory_space<vmem>>) attributes {dimension_semantics = [], scalar_prefetch = 0 : i64, scratch_operands = 6 : i64, tpu.core_type = #tpu.core_type<tc>} {
    %c0 = arith.constant 0 : index
    %c0_0 = arith.constant 0 : index
    %0 = vector.load %arg1[%c0, %c0_0] : memref<64x72xbf16, #tpu.memory_space<vmem>>, vector<64x72xbf16>
    %c0_1 = arith.constant 0 : index
    %c0_2 = arith.constant 0 : index
    %c0_3 = arith.constant 0 : index
    %1 = vector.load %arg0[%c0_1, %c0_2, %c0_3] : memref<4x72x128xbf16, #tpu.memory_space<vmem>>, vector<1x72x128xbf16>
    %2 = vector.shape_cast %1 : vector<1x72x128xbf16> to vector<72x128xbf16>
    %cst = arith.constant dense<0.000000e+00> : vector<64x128xf32>
    %3 = tpu.matmul %0, %2, %cst {dimension_numbers = #tpu.dot_dimension_numbers<[1], [0], [0], [1], [0, 0, 1, 1], [], []>} : vector<64x72xbf16>, vector<72x128xbf16>, vector<64x128xf32> -> vector<64x128xf32>
    %c0_4 = arith.constant 0 : index
    %c0_5 = arith.constant 0 : index
    %4 = vector.load %arg1[%c0_4, %c0_5] : memref<64x72xbf16, #tpu.memory_space<vmem>>, vector<64x72xbf16>
    %c1 = arith.constant 1 : index
    %c0_6 = arith.constant 0 : index
    %c0_7 = arith.constant 0 : index
    %5 = vector.load %arg0[%c1, %c0_6, %c0_7] : memref<4x72x128xbf16, #tpu.memory_space<vmem>>, vector<1x72x128xbf16>
    %6 = vector.shape_cast %5 : vector<1x72x128xbf16> to vector<72x128xbf16>
    %cst_8 = arith.constant dense<0.000000e+00> : vector<64x128xf32>
    %7 = tpu.matmul %4, %6, %cst_8 {dimension_numbers = #tpu.dot_dimension_numbers<[1], [0], [0], [1], [0, 0, 1, 1], [], []>} : vector<64x72xbf16>, vector<72x128xbf16>, vector<64x128xf32> -> vector<64x128xf32>
    %8 = arith.maximumf %3, %7 : vector<64x128xf32>
    %c0_9 = arith.constant 0 : index
    %c0_10 = arith.constant 0 : index
    %9 = vector.load %arg1[%c0_9, %c0_10] : memref<64x72xbf16, #tpu.memory_space<vmem>>, vector<64x72xbf16>
    %c2 = arith.constant 2 : index
    %c0_11 = arith.constant 0 : index
    %c0_12 = arith.constant 0 : index
    %10 = vector.load %arg0[%c2, %c0_11, %c0_12] : memref<4x72x128xbf16, #tpu.memory_space<vmem>>, vector<1x72x128xbf16>
    %11 = vector.shape_cast %10 : vector<1x72x128xbf16> to vector<72x128xbf16>
    %cst_13 = arith.constant dense<0.000000e+00> : vector<64x128xf32>
    %12 = tpu.matmul %9, %11, %cst_13 {dimension_numbers = #tpu.dot_dimension_numbers<[1], [0], [0], [1], [0, 0, 1, 1], [], []>} : vector<64x72xbf16>, vector<72x128xbf16>, vector<64x128xf32> -> vector<64x128xf32>
    %13 = arith.maximumf %8, %12 : vector<64x128xf32>
    %c0_14 = arith.constant 0 : index
    %c0_15 = arith.constant 0 : index
    %14 = vector.load %arg1[%c0_14, %c0_15] : memref<64x72xbf16, #tpu.memory_space<vmem>>, vector<64x72xbf16>
    %c3 = arith.constant 3 : index
    %c0_16 = arith.constant 0 : index
    %c0_17 = arith.constant 0 : index
    %15 = vector.load %arg0[%c3, %c0_16, %c0_17] : memref<4x72x128xbf16, #tpu.memory_space<vmem>>, vector<1x72x128xbf16>
    %16 = vector.shape_cast %15 : vector<1x72x128xbf16> to vector<72x128xbf16>
    %cst_18 = arith.constant dense<0.000000e+00> : vector<64x128xf32>
    %17 = tpu.matmul %14, %16, %cst_18 {dimension_numbers = #tpu.dot_dimension_numbers<[1], [0], [0], [1], [0, 0, 1, 1], [], []>} : vector<64x72xbf16>, vector<72x128xbf16>, vector<64x128xf32> -> vector<64x128xf32>
    %18 = arith.maximumf %13, %17 : vector<64x128xf32>
    %c0_19 = arith.constant 0 : index
    %c0_20 = arith.constant 0 : index
    %19 = vector.load %arg2[%c0_19, %c0_20] : memref<64x1xf32, #tpu.memory_space<vmem>>, vector<64x1xf32>
    %20 = vector.broadcast %19 : vector<64x1xf32> to vector<64x128xf32>
    %21 = arith.addf %18, %20 : vector<64x128xf32>
    %cst_21 = arith.constant 0.000000e+00 : f32
    %22 = vector.broadcast %cst_21 : f32 to vector<64x128xf32>
    %23 = arith.maximumf %21, %22 : vector<64x128xf32>
    %24 = vector.extract_strided_slice %23 {offsets = [0, 0], sizes = [1, 128], strides = [1, 1]} : vector<64x128xf32> to vector<1x128xf32>
    %25 = vector.extract_strided_slice %24 {offsets = [0, 0], sizes = [1, 64], strides = [1, 1]} : vector<1x128xf32> to vector<1x64xf32>
    %c0_22 = arith.constant 0 : index
    %c0_23 = arith.constant 0 : index
    %26 = vector.load %arg14[%c0_22, %c0_23] : memref<16x512xf32, #tpu.memory_space<vmem>>, vector<1x64xf32>
    tpu.vector_store %arg14[%c0_22, %c0_23], %25 {strides = array<i32>} : memref<16x512xf32, #tpu.memory_space<vmem>>, vector<1x64xf32>,
    %27 = vector.extract_strided_slice %24 {offsets = [0, 64], sizes = [1, 64], strides = [1, 1]} : vector<1x128xf32> to vector<1x64xf32>
    %c1_24 = arith.constant 1 : index
    %c0_25 = arith.constant 0 : index
    %28 = vector.load %arg14[%c1_24, %c0_25] : memref<16x512xf32, #tpu.memory_space<vmem>>, vector<1x64xf32>
    tpu.vector_store %arg14[%c1_24, %c0_25], %27 {strides = array<i32>} : memref<16x512xf32, #tpu.memory_space<vmem>>, vector<1x64xf32>,
    %29 = vector.extract_strided_slice %23 {offsets = [1, 0], sizes = [1, 128], strides = [1, 1]} : vector<64x128xf32> to vector<1x128xf32>
    %30 = vector.extract_strided_slice %29 {offsets = [0, 0], sizes = [1, 64], strides = [1, 1]} : vector<1x128xf32> to vector<1x64xf32>
    %c0_26 = arith.constant 0 : index
    %c64 = arith.constant 64 : index
    %31 = vector.load %arg14[%c0_26, %c64] : memref<16x512xf32, #tpu.memory_space<vmem>>, vector<1x64xf32>
    tpu.vector_store %arg14[%c0_26, %c64], %30 {strides = array<i32>} : memref<16x512xf32, #tpu.memory_space<vmem>>, vector<1x64xf32>,
    %32 = vector.extract_strided_slice %29 {offsets = [0, 64], sizes = [1, 64], strides = [1, 1]} : vector<1x128xf32> to vector<1x64xf32>
    %c1_27 = arith.constant 1 : index
    %c64_28 = arith.constant 64 : index
    %33 = vector.load %arg14[%c1_27, %c64_28] : memref<16x512xf32, #tpu.memory_space<vmem>>, vector<1x64xf32>
    tpu.vector_store %arg14[%c1_27, %c64_28], %32 {strides = array<i32>} : memref<16x512xf32, #tpu.memory_space<vmem>>, vector<1x64xf32>,
    %34 = vector.extract_strided_slice %23 {offsets = [2, 0], sizes = [1, 128], strides = [1, 1]} : vector<64x128xf32> to vector<1x128xf32>
    %35 = vector.extract_strided_slice %34 {offsets = [0, 0], sizes = [1, 64], strides = [1, 1]} : vector<1x128xf32> to vector<1x64xf32>
    %c0_29 = arith.constant 0 : index
    %c128 = arith.constant 128 : index
    %36 = vector.load %arg14[%c0_29, %c128] : memref<16x512xf32, #tpu.memory_space<vmem>>, vector<1x64xf32>
    tpu.vector_store %arg14[%c0_29, %c128], %35 {strides = array<i32>} : memref<16x512xf32, #tpu.memory_space<vmem>>, vector<1x64xf32>,
    %37 = vector.extract_strided_slice %34 {offsets = [0, 64], sizes = [1, 64], strides = [1, 1]} : vector<1x128xf32> to vector<1x64xf32>
    %c1_30 = arith.constant 1 : index
    %c128_31 = arith.constant 128 : index
    %38 = vector.load %arg14[%c1_30, %c128_31] : memref<16x512xf32, #tpu.memory_space<vmem>>, vector<1x64xf32>
    tpu.vector_store %arg14[%c1_30, %c128_31], %37 {strides = array<i32>} : memref<16x512xf32, #tpu.memory_space<vmem>>, vector<1x64xf32>,
    %39 = vector.extract_strided_slice %23 {offsets = [3, 0], sizes = [1, 128], strides = [1, 1]} : vector<64x128xf32> to vector<1x128xf32>
    %40 = vector.extract_strided_slice %39 {offsets = [0, 0], sizes = [1, 64], strides = [1, 1]} : vector<1x128xf32> to vector<1x64xf32>
    %c0_32 = arith.constant 0 : index
    %c192 = arith.constant 192 : index
    %41 = vector.load %arg14[%c0_32, %c192] : memref<16x512xf32, #tpu.memory_space<vmem>>, vector<1x64xf32>
    tpu.vector_store %arg14[%c0_32, %c192], %40 {strides = array<i32>} : memref<16x512xf32, #tpu.memory_space<vmem>>, vector<1x64xf32>,
    %42 = vector.extract_strided_slice %39 {offsets = [0, 64], sizes = [1, 64], strides = [1, 1]} : vector<1x128xf32> to vector<1x64xf32>
    %c1_33 = arith.constant 1 : index
    %c192_34 = arith.constant 192 : index
    %43 = vector.load %arg14[%c1_33, %c192_34] : memref<16x512xf32, #tpu.memory_space<vmem>>, vector<1x64xf32>
    tpu.vector_store %arg14[%c1_33, %c192_34], %42 {strides = array<i32>} : memref<16x512xf32, #tpu.memory_space<vmem>>, vector<1x64xf32>,
    %44 = vector.extract_strided_slice %23 {offsets = [4, 0], sizes = [1, 128], strides = [1, 1]} : vector<64x128xf32> to vector<1x128xf32>
    %45 = vector.extract_strided_slice %44 {offsets = [0, 0], sizes = [1, 64], strides = [1, 1]} : vector<1x128xf32> to vector<1x64xf32>
    %c0_35 = arith.constant 0 : index
    %c256 = arith.constant 256 : index
    %46 = vector.load %arg14[%c0_35, %c256] : memref<16x512xf32, #tpu.memory_space<vmem>>, vector<1x64xf32>
    tpu.vector_store %arg14[%c0_35, %c256], %45 {strides = array<i32>} : memref<16x512xf32, #tpu.memory_space<vmem>>, vector<1x64xf32>,
    %47 = vector.extract_strided_slice %44 {offsets = [0, 64], sizes = [1, 64], strides = [1, 1]} : vector<1x128xf32> to vector<1x64xf32>
    %c1_36 = arith.constant 1 : index
    %c256_37 = arith.constant 256 : index
    %48 = vector.load %arg14[%c1_36, %c256_37] : memref<16x512xf32, #tpu.memory_space<vmem>>, vector<1x64xf32>
    tpu.vector_store %arg14[%c1_36, %c256_37], %47 {strides = array<i32>} : memref<16x512xf32, #tpu.memory_space<vmem>>, vector<1x64xf32>,
    %49 = vector.extract_strided_slice %23 {offsets = [5, 0], sizes = [1, 128], strides = [1, 1]} : vector<64x128xf32> to vector<1x128xf32>
    %50 = vector.extract_strided_slice %49 {offsets = [0, 0], sizes = [1, 64], strides = [1, 1]} : vector<1x128xf32> to vector<1x64xf32>
    %c0_38 = arith.constant 0 : index
    %c320 = arith.constant 320 : index
    %51 = vector.load %arg14[%c0_38, %c320] : memref<16x512xf32, #tpu.memory_space<vmem>>, vector<1x64xf32>
    tpu.vector_store %arg14[%c0_38, %c320], %50 {strides = array<i32>} : memref<16x512xf32, #tpu.memory_space<vmem>>, vector<1x64xf32>,
    %52 = vector.extract_strided_slice %49 {offsets = [0, 64], sizes = [1, 64], strides = [1, 1]} : vector<1x128xf32> to vector<1x64xf32>
    %c1_39 = arith.constant 1 : index
    %c320_40 = arith.constant 320 : index
    %53 = vector.load %arg14[%c1_39, %c320_40] : memref<16x512xf32, #tpu.memory_space<vmem>>, vector<1x64xf32>
    tpu.vector_store %arg14[%c1_39, %c320_40], %52 {strides = array<i32>} : memref<16x512xf32, #tpu.memory_space<vmem>>, vector<1x64xf32>,
    %54 = vector.extract_strided_slice %23 {offsets = [6, 0], sizes = [1, 128], strides = [1, 1]} : vector<64x128xf32> to vector<1x128xf32>
    %55 = vector.extract_strided_slice %54 {offsets = [0, 0], sizes = [1, 64], strides = [1, 1]} : vector<1x128xf32> to vector<1x64xf32>
    %c0_41 = arith.constant 0 : index
    %c384 = arith.constant 384 : index
    %56 = vector.load %arg14[%c0_41, %c384] : memref<16x512xf32, #tpu.memory_space<vmem>>, vector<1x64xf32>
    tpu.vector_store %arg14[%c0_41, %c384], %55 {strides = array<i32>} : memref<16x512xf32, #tpu.memory_space<vmem>>, vector<1x64xf32>,
    %57 = vector.extract_strided_slice %54 {offsets = [0, 64], sizes = [1, 64], strides = [1, 1]} : vector<1x128xf32> to vector<1x64xf32>
    %c1_42 = arith.constant 1 : index
    %c384_43 = arith.constant 384 : index
    %58 = vector.load %arg14[%c1_42, %c384_43] : memref<16x512xf32, #tpu.memory_space<vmem>>, vector<1x64xf32>
    tpu.vector_store %arg14[%c1_42, %c384_43], %57 {strides = array<i32>} : memref<16x512xf32, #tpu.memory_space<vmem>>, vector<1x64xf32>,
    %59 = vector.extract_strided_slice %23 {offsets = [7, 0], sizes = [1, 128], strides = [1, 1]} : vector<64x128xf32> to vector<1x128xf32>
    %60 = vector.extract_strided_slice %59 {offsets = [0, 0], sizes = [1, 64], strides = [1, 1]} : vector<1x128xf32> to vector<1x64xf32>
    %c0_44 = arith.constant 0 : index
    %c448 = arith.constant 448 : index
    %61 = vector.load %arg14[%c0_44, %c448] : memref<16x512xf32, #tpu.memory_space<vmem>>, vector<1x64xf32>
    tpu.vector_store %arg14[%c0_44, %c448], %60 {strides = array<i32>} : memref<16x512xf32, #tpu.memory_space<vmem>>, vector<1x64xf32>,
    %62 = vector.extract_strided_slice %59 {offsets = [0, 64], sizes = [1, 64], strides = [1, 1]} : vector<1x128xf32> to vector<1x64xf32>
    %c1_45 = arith.constant 1 : index
    %c448_46 = arith.constant 448 : index
    %63 = vector.load %arg14[%c1_45, %c448_46] : memref<16x512xf32, #tpu.memory_space<vmem>>, vector<1x64xf32>
    tpu.vector_store %arg14[%c1_45, %c448_46], %62 {strides = array<i32>} : memref<16x512xf32, #tpu.memory_space<vmem>>, vector<1x64xf32>,
    %64 = vector.extract_strided_slice %23 {offsets = [8, 0], sizes = [1, 128], strides = [1, 1]} : vector<64x128xf32> to vector<1x128xf32>
    %65 = vector.extract_strided_slice %64 {offsets = [0, 0], sizes = [1, 64], strides = [1, 1]} : vector<1x128xf32> to vector<1x64xf32>
    %c2_47 = arith.constant 2 : index
    %c0_48 = arith.constant 0 : index
    %66 = vector.load %arg14[%c2_47, %c0_48] : memref<16x512xf32, #tpu.memory_space<vmem>>, vector<1x64xf32>
    tpu.vector_store %arg14[%c2_47, %c0_48], %65 {strides = array<i32>} : memref<16x512xf32, #tpu.memory_space<vmem>>, vector<1x64xf32>,
    %67 = vector.extract_strided_slice %64 {offsets = [0, 64], sizes = [1, 64], strides = [1, 1]} : vector<1x128xf32> to vector<1x64xf32>
    %c3_49 = arith.constant 3 : index
    %c0_50 = arith.constant 0 : index
    %68 = vector.load %arg14[%c3_49, %c0_50] : memref<16x512xf32, #tpu.memory_space<vmem>>, vector<1x64xf32>
    tpu.vector_store %arg14[%c3_49, %c0_50], %67 {strides = array<i32>} : memref<16x512xf32, #tpu.memory_space<vmem>>, vector<1x64xf32>,
    %69 = vector.extract_strided_slice %23 {offsets = [9, 0], sizes = [1, 128], strides = [1, 1]} : vector<64x128xf32> to vector<1x128xf32>
    %70 = vector.extract_strided_slice %69 {offsets = [0, 0], sizes = [1, 64], strides = [1, 1]} : vector<1x128xf32> to vector<1x64xf32>
    %c2_51 = arith.constant 2 : index
    %c64_52 = arith.constant 64 : index
    %71 = vector.load %arg14[%c2_51, %c64_52] : memref<16x512xf32, #tpu.memory_space<vmem>>, vector<1x64xf32>
    tpu.vector_store %arg14[%c2_51, %c64_52], %70 {strides = array<i32>} : memref<16x512xf32, #tpu.memory_space<vmem>>, vector<1x64xf32>,
    %72 = vector.extract_strided_slice %69 {offsets = [0, 64], sizes = [1, 64], strides = [1, 1]} : vector<1x128xf32> to vector<1x64xf32>
    %c3_53 = arith.constant 3 : index
    %c64_54 = arith.constant 64 : index
    %73 = vector.load %arg14[%c3_53, %c64_54] : memref<16x512xf32, #tpu.memory_space<vmem>>, vector<1x64xf32>
    tpu.vector_store %arg14[%c3_53, %c64_54], %72 {strides = array<i32>} : memref<16x512xf32, #tpu.memory_space<vmem>>, vector<1x64xf32>,
    %74 = vector.extract_strided_slice %23 {offsets = [10, 0], sizes = [1, 128], strides = [1, 1]} : vector<64x128xf32> to vector<1x128xf32>
    %75 = vector.extract_strided_slice %74 {offsets = [0, 0], sizes = [1, 64], strides = [1, 1]} : vector<1x128xf32> to vector<1x64xf32>
    %c2_55 = arith.constant 2 : index
    %c128_56 = arith.constant 128 : index
    %76 = vector.load %arg14[%c2_55, %c128_56] : memref<16x512xf32, #tpu.memory_space<vmem>>, vector<1x64xf32>
    tpu.vector_store %arg14[%c2_55, %c128_56], %75 {strides = array<i32>} : memref<16x512xf32, #tpu.memory_space<vmem>>, vector<1x64xf32>,
    %77 = vector.extract_strided_slice %74 {offsets = [0, 64], sizes = [1, 64], strides = [1, 1]} : vector<1x128xf32> to vector<1x64xf32>
    %c3_57 = arith.constant 3 : index
    %c128_58 = arith.constant 128 : index
    %78 = vector.load %arg14[%c3_57, %c128_58] : memref<16x512xf32, #tpu.memory_space<vmem>>, vector<1x64xf32>
    tpu.vector_store %arg14[%c3_57, %c128_58], %77 {strides = array<i32>} : memref<16x512xf32, #tpu.memory_space<vmem>>, vector<1x64xf32>,
    %79 = vector.extract_strided_slice %23 {offsets = [11, 0], sizes = [1, 128], strides = [1, 1]} : vector<64x128xf32> to vector<1x128xf32>
    %80 = vector.extract_strided_slice %79 {offsets = [0, 0], sizes = [1, 64], strides = [1, 1]} : vector<1x128xf32> to vector<1x64xf32>
    %c2_59 = arith.constant 2 : index
    %c192_60 = arith.constant 192 : index
    %81 = vector.load %arg14[%c2_59, %c192_60] : memref<16x512xf32, #tpu.memory_space<vmem>>, vector<1x64xf32>
    tpu.vector_store %arg14[%c2_59, %c192_60], %80 {strides = array<i32>} : memref<16x512xf32, #tpu.memory_space<vmem>>, vector<1x64xf32>,
    %82 = vector.extract_strided_slice %79 {offsets = [0, 64], sizes = [1, 64], strides = [1, 1]} : vector<1x128xf32> to vector<1x64xf32>
    %c3_61 = arith.constant 3 : index
    %c192_62 = arith.constant 192 : index
    %83 = vector.load %arg14[%c3_61, %c192_62] : memref<16x512xf32, #tpu.memory_space<vmem>>, vector<1x64xf32>
    tpu.vector_store %arg14[%c3_61, %c192_62], %82 {strides = array<i32>} : memref<16x512xf32, #tpu.memory_space<vmem>>, vector<1x64xf32>,
    %84 = vector.extract_strided_slice %23 {offsets = [12, 0], sizes = [1, 128], strides = [1, 1]} : vector<64x128xf32> to vector<1x128xf32>
    %85 = vector.extract_strided_slice %84 {offsets = [0, 0], sizes = [1, 64], strides = [1, 1]} : vector<1x128xf32> to vector<1x64xf32>
    %c2_63 = arith.constant 2 : index
    %c256_64 = arith.constant 256 : index
    %86 = vector.load %arg14[%c2_63, %c256_64] : memref<16x512xf32, #tpu.memory_space<vmem>>, vector<1x64xf32>
    tpu.vector_store %arg14[%c2_63, %c256_64], %85 {strides = array<i32>} : memref<16x512xf32, #tpu.memory_space<vmem>>, vector<1x64xf32>,
    %87 = vector.extract_strided_slice %84 {offsets = [0, 64], sizes = [1, 64], strides = [1, 1]} : vector<1x128xf32> to vector<1x64xf32>
    %c3_65 = arith.constant 3 : index
    %c256_66 = arith.constant 256 : index
    %88 = vector.load %arg14[%c3_65, %c256_66] : memref<16x512xf32, #tpu.memory_space<vmem>>, vector<1x64xf32>
    tpu.vector_store %arg14[%c3_65, %c256_66], %87 {strides = array<i32>} : memref<16x512xf32, #tpu.memory_space<vmem>>, vector<1x64xf32>,
    %89 = vector.extract_strided_slice %23 {offsets = [13, 0], sizes = [1, 128], strides = [1, 1]} : vector<64x128xf32> to vector<1x128xf32>
    %90 = vector.extract_strided_slice %89 {offsets = [0, 0], sizes = [1, 64], strides = [1, 1]} : vector<1x128xf32> to vector<1x64xf32>
    %c2_67 = arith.constant 2 : index
    %c320_68 = arith.constant 320 : index
    %91 = vector.load %arg14[%c2_67, %c320_68] : memref<16x512xf32, #tpu.memory_space<vmem>>, vector<1x64xf32>
    tpu.vector_store %arg14[%c2_67, %c320_68], %90 {strides = array<i32>} : memref<16x512xf32, #tpu.memory_space<vmem>>, vector<1x64xf32>,
    %92 = vector.extract_strided_slice %89 {offsets = [0, 64], sizes = [1, 64], strides = [1, 1]} : vector<1x128xf32> to vector<1x64xf32>
    %c3_69 = arith.constant 3 : index
    %c320_70 = arith.constant 320 : index
    %93 = vector.load %arg14[%c3_69, %c320_70] : memref<16x512xf32, #tpu.memory_space<vmem>>, vector<1x64xf32>
    tpu.vector_store %arg14[%c3_69, %c320_70], %92 {strides = array<i32>} : memref<16x512xf32, #tpu.memory_space<vmem>>, vector<1x64xf32>,
    %94 = vector.extract_strided_slice %23 {offsets = [14, 0], sizes = [1, 128], strides = [1, 1]} : vector<64x128xf32> to vector<1x128xf32>
    %95 = vector.extract_strided_slice %94 {offsets = [0, 0], sizes = [1, 64], strides = [1, 1]} : vector<1x128xf32> to vector<1x64xf32>
    %c2_71 = arith.constant 2 : index
    %c384_72 = arith.constant 384 : index
    %96 = vector.load %arg14[%c2_71, %c384_72] : memref<16x512xf32, #tpu.memory_space<vmem>>, vector<1x64xf32>
    tpu.vector_store %arg14[%c2_71, %c384_72], %95 {strides = array<i32>} : memref<16x512xf32, #tpu.memory_space<vmem>>, vector<1x64xf32>,
    %97 = vector.extract_strided_slice %94 {offsets = [0, 64], sizes = [1, 64], strides = [1, 1]} : vector<1x128xf32> to vector<1x64xf32>
    %c3_73 = arith.constant 3 : index
    %c384_74 = arith.constant 384 : index
    %98 = vector.load %arg14[%c3_73, %c384_74] : memref<16x512xf32, #tpu.memory_space<vmem>>, vector<1x64xf32>
    tpu.vector_store %arg14[%c3_73, %c384_74], %97 {strides = array<i32>} : memref<16x512xf32, #tpu.memory_space<vmem>>, vector<1x64xf32>,
    %99 = vector.extract_strided_slice %23 {offsets = [15, 0], sizes = [1, 128], strides = [1, 1]} : vector<64x128xf32> to vector<1x128xf32>
    %100 = vector.extract_strided_slice %99 {offsets = [0, 0], sizes = [1, 64], strides = [1, 1]} : vector<1x128xf32> to vector<1x64xf32>
    %c2_75 = arith.constant 2 : index
    %c448_76 = arith.constant 448 : index
    %101 = vector.load %arg14[%c2_75, %c448_76] : memref<16x512xf32, #tpu.memory_space<vmem>>, vector<1x64xf32>
    tpu.vector_store %arg14[%c2_75, %c448_76], %100 {strides = array<i32>} : memref<16x512xf32, #tpu.memory_space<vmem>>, vector<1x64xf32>,
    %102 = vector.extract_strided_slice %99 {offsets = [0, 64], sizes = [1, 64], strides = [1, 1]} : vector<1x128xf32> to vector<1x64xf32>
    %c3_77 = arith.constant 3 : index
    %c448_78 = arith.constant 448 : index
    %103 = vector.load %arg14[%c3_77, %c448_78] : memref<16x512xf32, #tpu.memory_space<vmem>>, vector<1x64xf32>
    tpu.vector_store %arg14[%c3_77, %c448_78], %102 {strides = array<i32>} : memref<16x512xf32, #tpu.memory_space<vmem>>, vector<1x64xf32>,
    %104 = vector.extract_strided_slice %23 {offsets = [16, 0], sizes = [1, 128], strides = [1, 1]} : vector<64x128xf32> to vector<1x128xf32>
    %105 = vector.extract_strided_slice %104 {offsets = [0, 0], sizes = [1, 64], strides = [1, 1]} : vector<1x128xf32> to vector<1x64xf32>
    %c4 = arith.constant 4 : index
    %c0_79 = arith.constant 0 : index
    %106 = vector.load %arg14[%c4, %c0_79] : memref<16x512xf32, #tpu.memory_space<vmem>>, vector<1x64xf32>
    tpu.vector_store %arg14[%c4, %c0_79], %105 {strides = array<i32>} : memref<16x512xf32, #tpu.memory_space<vmem>>, vector<1x64xf32>,
    %107 = vector.extract_strided_slice %104 {offsets = [0, 64], sizes = [1, 64], strides = [1, 1]} : vector<1x128xf32> to vector<1x64xf32>
    %c5 = arith.constant 5 : index
    %c0_80 = arith.constant 0 : index
    %108 = vector.load %arg14[%c5, %c0_80] : memref<16x512xf32, #tpu.memory_space<vmem>>, vector<1x64xf32>
    tpu.vector_store %arg14[%c5, %c0_80], %107 {strides = array<i32>} : memref<16x512xf32, #tpu.memory_space<vmem>>, vector<1x64xf32>,
    %109 = vector.extract_strided_slice %23 {offsets = [17, 0], sizes = [1, 128], strides = [1, 1]} : vector<64x128xf32> to vector<1x128xf32>
    %110 = vector.extract_strided_slice %109 {offsets = [0, 0], sizes = [1, 64], strides = [1, 1]} : vector<1x128xf32> to vector<1x64xf32>
    %c4_81 = arith.constant 4 : index
    %c64_82 = arith.constant 64 : index
    %111 = vector.load %arg14[%c4_81, %c64_82] : memref<16x512xf32, #tpu.memory_space<vmem>>, vector<1x64xf32>
    tpu.vector_store %arg14[%c4_81, %c64_82], %110 {strides = array<i32>} : memref<16x512xf32, #tpu.memory_space<vmem>>, vector<1x64xf32>,
    %112 = vector.extract_strided_slice %109 {offsets = [0, 64], sizes = [1, 64], strides = [1, 1]} : vector<1x128xf32> to vector<1x64xf32>
    %c5_83 = arith.constant 5 : index
    %c64_84 = arith.constant 64 : index
    %113 = vector.load %arg14[%c5_83, %c64_84] : memref<16x512xf32, #tpu.memory_space<vmem>>, vector<1x64xf32>
    tpu.vector_store %arg14[%c5_83, %c64_84], %112 {strides = array<i32>} : memref<16x512xf32, #tpu.memory_space<vmem>>, vector<1x64xf32>,
    %114 = vector.extract_strided_slice %23 {offsets = [18, 0], sizes = [1, 128], strides = [1, 1]} : vector<64x128xf32> to vector<1x128xf32>
    %115 = vector.extract_strided_slice %114 {offsets = [0, 0], sizes = [1, 64], strides = [1, 1]} : vector<1x128xf32> to vector<1x64xf32>
    %c4_85 = arith.constant 4 : index
    %c128_86 = arith.constant 128 : index
    %116 = vector.load %arg14[%c4_85, %c128_86] : memref<16x512xf32, #tpu.memory_space<vmem>>, vector<1x64xf32>
    tpu.vector_store %arg14[%c4_85, %c128_86], %115 {strides = array<i32>} : memref<16x512xf32, #tpu.memory_space<vmem>>, vector<1x64xf32>,
    %117 = vector.extract_strided_slice %114 {offsets = [0, 64], sizes = [1, 64], strides = [1, 1]} : vector<1x128xf32> to vector<1x64xf32>
    %c5_87 = arith.constant 5 : index
    %c128_88 = arith.constant 128 : index
    %118 = vector.load %arg14[%c5_87, %c128_88] : memref<16x512xf32, #tpu.memory_space<vmem>>, vector<1x64xf32>
    tpu.vector_store %arg14[%c5_87, %c128_88], %117 {strides = array<i32>} : memref<16x512xf32, #tpu.memory_space<vmem>>, vector<1x64xf32>,
    %119 = vector.extract_strided_slice %23 {offsets = [19, 0], sizes = [1, 128], strides = [1, 1]} : vector<64x128xf32> to vector<1x128xf32>
    %120 = vector.extract_strided_slice %119 {offsets = [0, 0], sizes = [1, 64], strides = [1, 1]} : vector<1x128xf32> to vector<1x64xf32>
    %c4_89 = arith.constant 4 : index
    %c192_90 = arith.constant 192 : index
    %121 = vector.load %arg14[%c4_89, %c192_90] : memref<16x512xf32, #tpu.memory_space<vmem>>, vector<1x64xf32>
    tpu.vector_store %arg14[%c4_89, %c192_90], %120 {strides = array<i32>} : memref<16x512xf32, #tpu.memory_space<vmem>>, vector<1x64xf32>,
    %122 = vector.extract_strided_slice %119 {offsets = [0, 64], sizes = [1, 64], strides = [1, 1]} : vector<1x128xf32> to vector<1x64xf32>
    %c5_91 = arith.constant 5 : index
    %c192_92 = arith.constant 192 : index
    %123 = vector.load %arg14[%c5_91, %c192_92] : memref<16x512xf32, #tpu.memory_space<vmem>>, vector<1x64xf32>
    tpu.vector_store %arg14[%c5_91, %c192_92], %122 {strides = array<i32>} : memref<16x512xf32, #tpu.memory_space<vmem>>, vector<1x64xf32>,
    %124 = vector.extract_strided_slice %23 {offsets = [20, 0], sizes = [1, 128], strides = [1, 1]} : vector<64x128xf32> to vector<1x128xf32>
    %125 = vector.extract_strided_slice %124 {offsets = [0, 0], sizes = [1, 64], strides = [1, 1]} : vector<1x128xf32> to vector<1x64xf32>
    %c4_93 = arith.constant 4 : index
    %c256_94 = arith.constant 256 : index
    %126 = vector.load %arg14[%c4_93, %c256_94] : memref<16x512xf32, #tpu.memory_space<vmem>>, vector<1x64xf32>
    tpu.vector_store %arg14[%c4_93, %c256_94], %125 {strides = array<i32>} : memref<16x512xf32, #tpu.memory_space<vmem>>, vector<1x64xf32>,
    %127 = vector.extract_strided_slice %124 {offsets = [0, 64], sizes = [1, 64], strides = [1, 1]} : vector<1x128xf32> to vector<1x64xf32>
    %c5_95 = arith.constant 5 : index
    %c256_96 = arith.constant 256 : index
    %128 = vector.load %arg14[%c5_95, %c256_96] : memref<16x512xf32, #tpu.memory_space<vmem>>, vector<1x64xf32>
    tpu.vector_store %arg14[%c5_95, %c256_96], %127 {strides = array<i32>} : memref<16x512xf32, #tpu.memory_space<vmem>>, vector<1x64xf32>,
    %129 = vector.extract_strided_slice %23 {offsets = [21, 0], sizes = [1, 128], strides = [1, 1]} : vector<64x128xf32> to vector<1x128xf32>
    %130 = vector.extract_strided_slice %129 {offsets = [0, 0], sizes = [1, 64], strides = [1, 1]} : vector<1x128xf32> to vector<1x64xf32>
    %c4_97 = arith.constant 4 : index
    %c320_98 = arith.constant 320 : index
    %131 = vector.load %arg14[%c4_97, %c320_98] : memref<16x512xf32, #tpu.memory_space<vmem>>, vector<1x64xf32>
    tpu.vector_store %arg14[%c4_97, %c320_98], %130 {strides = array<i32>} : memref<16x512xf32, #tpu.memory_space<vmem>>, vector<1x64xf32>,
    %132 = vector.extract_strided_slice %129 {offsets = [0, 64], sizes = [1, 64], strides = [1, 1]} : vector<1x128xf32> to vector<1x64xf32>
    %c5_99 = arith.constant 5 : index
    %c320_100 = arith.constant 320 : index
    %133 = vector.load %arg14[%c5_99, %c320_100] : memref<16x512xf32, #tpu.memory_space<vmem>>, vector<1x64xf32>
    tpu.vector_store %arg14[%c5_99, %c320_100], %132 {strides = array<i32>} : memref<16x512xf32, #tpu.memory_space<vmem>>, vector<1x64xf32>,
    %134 = vector.extract_strided_slice %23 {offsets = [22, 0], sizes = [1, 128], strides = [1, 1]} : vector<64x128xf32> to vector<1x128xf32>
    %135 = vector.extract_strided_slice %134 {offsets = [0, 0], sizes = [1, 64], strides = [1, 1]} : vector<1x128xf32> to vector<1x64xf32>
    %c4_101 = arith.constant 4 : index
    %c384_102 = arith.constant 384 : index
    %136 = vector.load %arg14[%c4_101, %c384_102] : memref<16x512xf32, #tpu.memory_space<vmem>>, vector<1x64xf32>
    tpu.vector_store %arg14[%c4_101, %c384_102], %135 {strides = array<i32>} : memref<16x512xf32, #tpu.memory_space<vmem>>, vector<1x64xf32>,
    %137 = vector.extract_strided_slice %134 {offsets = [0, 64], sizes = [1, 64], strides = [1, 1]} : vector<1x128xf32> to vector<1x64xf32>
    %c5_103 = arith.constant 5 : index
    %c384_104 = arith.constant 384 : index
    %138 = vector.load %arg14[%c5_103, %c384_104] : memref<16x512xf32, #tpu.memory_space<vmem>>, vector<1x64xf32>
    tpu.vector_store %arg14[%c5_103, %c384_104], %137 {strides = array<i32>} : memref<16x512xf32, #tpu.memory_space<vmem>>, vector<1x64xf32>,
    %139 = vector.extract_strided_slice %23 {offsets = [23, 0], sizes = [1, 128], strides = [1, 1]} : vector<64x128xf32> to vector<1x128xf32>
    %140 = vector.extract_strided_slice %139 {offsets = [0, 0], sizes = [1, 64], strides = [1, 1]} : vector<1x128xf32> to vector<1x64xf32>
    %c4_105 = arith.constant 4 : index
    %c448_106 = arith.constant 448 : index
    %141 = vector.load %arg14[%c4_105, %c448_106] : memref<16x512xf32, #tpu.memory_space<vmem>>, vector<1x64xf32>
    tpu.vector_store %arg14[%c4_105, %c448_106], %140 {strides = array<i32>} : memref<16x512xf32, #tpu.memory_space<vmem>>, vector<1x64xf32>,
    %142 = vector.extract_strided_slice %139 {offsets = [0, 64], sizes = [1, 64], strides = [1, 1]} : vector<1x128xf32> to vector<1x64xf32>
    %c5_107 = arith.constant 5 : index
    %c448_108 = arith.constant 448 : index
    %143 = vector.load %arg14[%c5_107, %c448_108] : memref<16x512xf32, #tpu.memory_space<vmem>>, vector<1x64xf32>
    tpu.vector_store %arg14[%c5_107, %c448_108], %142 {strides = array<i32>} : memref<16x512xf32, #tpu.memory_space<vmem>>, vector<1x64xf32>,
    %144 = vector.extract_strided_slice %23 {offsets = [24, 0], sizes = [1, 128], strides = [1, 1]} : vector<64x128xf32> to vector<1x128xf32>
    %145 = vector.extract_strided_slice %144 {offsets = [0, 0], sizes = [1, 64], strides = [1, 1]} : vector<1x128xf32> to vector<1x64xf32>
    %c6 = arith.constant 6 : index
    %c0_109 = arith.constant 0 : index
    %146 = vector.load %arg14[%c6, %c0_109] : memref<16x512xf32, #tpu.memory_space<vmem>>, vector<1x64xf32>
    tpu.vector_store %arg14[%c6, %c0_109], %145 {strides = array<i32>} : memref<16x512xf32, #tpu.memory_space<vmem>>, vector<1x64xf32>,
    %147 = vector.extract_strided_slice %144 {offsets = [0, 64], sizes = [1, 64], strides = [1, 1]} : vector<1x128xf32> to vector<1x64xf32>
    %c7 = arith.constant 7 : index
    %c0_110 = arith.constant 0 : index
    %148 = vector.load %arg14[%c7, %c0_110] : memref<16x512xf32, #tpu.memory_space<vmem>>, vector<1x64xf32>
    tpu.vector_store %arg14[%c7, %c0_110], %147 {strides = array<i32>} : memref<16x512xf32, #tpu.memory_space<vmem>>, vector<1x64xf32>,
    %149 = vector.extract_strided_slice %23 {offsets = [25, 0], sizes = [1, 128], strides = [1, 1]} : vector<64x128xf32> to vector<1x128xf32>
    %150 = vector.extract_strided_slice %149 {offsets = [0, 0], sizes = [1, 64], strides = [1, 1]} : vector<1x128xf32> to vector<1x64xf32>
    %c6_111 = arith.constant 6 : index
    %c64_112 = arith.constant 64 : index
    %151 = vector.load %arg14[%c6_111, %c64_112] : memref<16x512xf32, #tpu.memory_space<vmem>>, vector<1x64xf32>
    tpu.vector_store %arg14[%c6_111, %c64_112], %150 {strides = array<i32>} : memref<16x512xf32, #tpu.memory_space<vmem>>, vector<1x64xf32>,
    %152 = vector.extract_strided_slice %149 {offsets = [0, 64], sizes = [1, 64], strides = [1, 1]} : vector<1x128xf32> to vector<1x64xf32>
    %c7_113 = arith.constant 7 : index
    %c64_114 = arith.constant 64 : index
    %153 = vector.load %arg14[%c7_113, %c64_114] : memref<16x512xf32, #tpu.memory_space<vmem>>, vector<1x64xf32>
    tpu.vector_store %arg14[%c7_113, %c64_114], %152 {strides = array<i32>} : memref<16x512xf32, #tpu.memory_space<vmem>>, vector<1x64xf32>,
    %154 = vector.extract_strided_slice %23 {offsets = [26, 0], sizes = [1, 128], strides = [1, 1]} : vector<64x128xf32> to vector<1x128xf32>
    %155 = vector.extract_strided_slice %154 {offsets = [0, 0], sizes = [1, 64], strides = [1, 1]} : vector<1x128xf32> to vector<1x64xf32>
    %c6_115 = arith.constant 6 : index
    %c128_116 = arith.constant 128 : index
    %156 = vector.load %arg14[%c6_115, %c128_116] : memref<16x512xf32, #tpu.memory_space<vmem>>, vector<1x64xf32>
    tpu.vector_store %arg14[%c6_115, %c128_116], %155 {strides = array<i32>} : memref<16x512xf32, #tpu.memory_space<vmem>>, vector<1x64xf32>,
    %157 = vector.extract_strided_slice %154 {offsets = [0, 64], sizes = [1, 64], strides = [1, 1]} : vector<1x128xf32> to vector<1x64xf32>
    %c7_117 = arith.constant 7 : index
    %c128_118 = arith.constant 128 : index
    %158 = vector.load %arg14[%c7_117, %c128_118] : memref<16x512xf32, #tpu.memory_space<vmem>>, vector<1x64xf32>
    tpu.vector_store %arg14[%c7_117, %c128_118], %157 {strides = array<i32>} : memref<16x512xf32, #tpu.memory_space<vmem>>, vector<1x64xf32>,
    %159 = vector.extract_strided_slice %23 {offsets = [27, 0], sizes = [1, 128], strides = [1, 1]} : vector<64x128xf32> to vector<1x128xf32>
    %160 = vector.extract_strided_slice %159 {offsets = [0, 0], sizes = [1, 64], strides = [1, 1]} : vector<1x128xf32> to vector<1x64xf32>
    %c6_119 = arith.constant 6 : index
    %c192_120 = arith.constant 192 : index
    %161 = vector.load %arg14[%c6_119, %c192_120] : memref<16x512xf32, #tpu.memory_space<vmem>>, vector<1x64xf32>
    tpu.vector_store %arg14[%c6_119, %c192_120], %160 {strides = array<i32>} : memref<16x512xf32, #tpu.memory_space<vmem>>, vector<1x64xf32>,
    %162 = vector.extract_strided_slice %159 {offsets = [0, 64], sizes = [1, 64], strides = [1, 1]} : vector<1x128xf32> to vector<1x64xf32>
    %c7_121 = arith.constant 7 : index
    %c192_122 = arith.constant 192 : index
    %163 = vector.load %arg14[%c7_121, %c192_122] : memref<16x512xf32, #tpu.memory_space<vmem>>, vector<1x64xf32>
    tpu.vector_store %arg14[%c7_121, %c192_122], %162 {strides = array<i32>} : memref<16x512xf32, #tpu.memory_space<vmem>>, vector<1x64xf32>,
    %164 = vector.extract_strided_slice %23 {offsets = [28, 0], sizes = [1, 128], strides = [1, 1]} : vector<64x128xf32> to vector<1x128xf32>
    %165 = vector.extract_strided_slice %164 {offsets = [0, 0], sizes = [1, 64], strides = [1, 1]} : vector<1x128xf32> to vector<1x64xf32>
    %c6_123 = arith.constant 6 : index
    %c256_124 = arith.constant 256 : index
    %166 = vector.load %arg14[%c6_123, %c256_124] : memref<16x512xf32, #tpu.memory_space<vmem>>, vector<1x64xf32>
    tpu.vector_store %arg14[%c6_123, %c256_124], %165 {strides = array<i32>} : memref<16x512xf32, #tpu.memory_space<vmem>>, vector<1x64xf32>,
    %167 = vector.extract_strided_slice %164 {offsets = [0, 64], sizes = [1, 64], strides = [1, 1]} : vector<1x128xf32> to vector<1x64xf32>
    %c7_125 = arith.constant 7 : index
    %c256_126 = arith.constant 256 : index
    %168 = vector.load %arg14[%c7_125, %c256_126] : memref<16x512xf32, #tpu.memory_space<vmem>>, vector<1x64xf32>
    tpu.vector_store %arg14[%c7_125, %c256_126], %167 {strides = array<i32>} : memref<16x512xf32, #tpu.memory_space<vmem>>, vector<1x64xf32>,
    %169 = vector.extract_strided_slice %23 {offsets = [29, 0], sizes = [1, 128], strides = [1, 1]} : vector<64x128xf32> to vector<1x128xf32>
    %170 = vector.extract_strided_slice %169 {offsets = [0, 0], sizes = [1, 64], strides = [1, 1]} : vector<1x128xf32> to vector<1x64xf32>
    %c6_127 = arith.constant 6 : index
    %c320_128 = arith.constant 320 : index
    %171 = vector.load %arg14[%c6_127, %c320_128] : memref<16x512xf32, #tpu.memory_space<vmem>>, vector<1x64xf32>
    tpu.vector_store %arg14[%c6_127, %c320_128], %170 {strides = array<i32>} : memref<16x512xf32, #tpu.memory_space<vmem>>, vector<1x64xf32>,
    %172 = vector.extract_strided_slice %169 {offsets = [0, 64], sizes = [1, 64], strides = [1, 1]} : vector<1x128xf32> to vector<1x64xf32>
    %c7_129 = arith.constant 7 : index
    %c320_130 = arith.constant 320 : index
    %173 = vector.load %arg14[%c7_129, %c320_130] : memref<16x512xf32, #tpu.memory_space<vmem>>, vector<1x64xf32>
    tpu.vector_store %arg14[%c7_129, %c320_130], %172 {strides = array<i32>} : memref<16x512xf32, #tpu.memory_space<vmem>>, vector<1x64xf32>,
    %174 = vector.extract_strided_slice %23 {offsets = [30, 0], sizes = [1, 128], strides = [1, 1]} : vector<64x128xf32> to vector<1x128xf32>
    %175 = vector.extract_strided_slice %174 {offsets = [0, 0], sizes = [1, 64], strides = [1, 1]} : vector<1x128xf32> to vector<1x64xf32>
    %c6_131 = arith.constant 6 : index
    %c384_132 = arith.constant 384 : index
    %176 = vector.load %arg14[%c6_131, %c384_132] : memref<16x512xf32, #tpu.memory_space<vmem>>, vector<1x64xf32>
    tpu.vector_store %arg14[%c6_131, %c384_132], %175 {strides = array<i32>} : memref<16x512xf32, #tpu.memory_space<vmem>>, vector<1x64xf32>,
    %177 = vector.extract_strided_slice %174 {offsets = [0, 64], sizes = [1, 64], strides = [1, 1]} : vector<1x128xf32> to vector<1x64xf32>
    %c7_133 = arith.constant 7 : index
    %c384_134 = arith.constant 384 : index
    %178 = vector.load %arg14[%c7_133, %c384_134] : memref<16x512xf32, #tpu.memory_space<vmem>>, vector<1x64xf32>
    tpu.vector_store %arg14[%c7_133, %c384_134], %177 {strides = array<i32>} : memref<16x512xf32, #tpu.memory_space<vmem>>, vector<1x64xf32>,
    %179 = vector.extract_strided_slice %23 {offsets = [31, 0], sizes = [1, 128], strides = [1, 1]} : vector<64x128xf32> to vector<1x128xf32>
    %180 = vector.extract_strided_slice %179 {offsets = [0, 0], sizes = [1, 64], strides = [1, 1]} : vector<1x128xf32> to vector<1x64xf32>
    %c6_135 = arith.constant 6 : index
    %c448_136 = arith.constant 448 : index
    %181 = vector.load %arg14[%c6_135, %c448_136] : memref<16x512xf32, #tpu.memory_space<vmem>>, vector<1x64xf32>
    tpu.vector_store %arg14[%c6_135, %c448_136], %180 {strides = array<i32>} : memref<16x512xf32, #tpu.memory_space<vmem>>, vector<1x64xf32>,
    %182 = vector.extract_strided_slice %179 {offsets = [0, 64], sizes = [1, 64], strides = [1, 1]} : vector<1x128xf32> to vector<1x64xf32>
    %c7_137 = arith.constant 7 : index
    %c448_138 = arith.constant 448 : index
    %183 = vector.load %arg14[%c7_137, %c448_138] : memref<16x512xf32, #tpu.memory_space<vmem>>, vector<1x64xf32>
    tpu.vector_store %arg14[%c7_137, %c448_138], %182 {strides = array<i32>} : memref<16x512xf32, #tpu.memory_space<vmem>>, vector<1x64xf32>,
    %184 = vector.extract_strided_slice %23 {offsets = [32, 0], sizes = [1, 128], strides = [1, 1]} : vector<64x128xf32> to vector<1x128xf32>
    %185 = vector.extract_strided_slice %184 {offsets = [0, 0], sizes = [1, 64], strides = [1, 1]} : vector<1x128xf32> to vector<1x64xf32>
    %c8 = arith.constant 8 : index
    %c0_139 = arith.constant 0 : index
    %186 = vector.load %arg14[%c8, %c0_139] : memref<16x512xf32, #tpu.memory_space<vmem>>, vector<1x64xf32>
    tpu.vector_store %arg14[%c8, %c0_139], %185 {strides = array<i32>} : memref<16x512xf32, #tpu.memory_space<vmem>>, vector<1x64xf32>,
    %187 = vector.extract_strided_slice %184 {offsets = [0, 64], sizes = [1, 64], strides = [1, 1]} : vector<1x128xf32> to vector<1x64xf32>
    %c9 = arith.constant 9 : index
    %c0_140 = arith.constant 0 : index
    %188 = vector.load %arg14[%c9, %c0_140] : memref<16x512xf32, #tpu.memory_space<vmem>>, vector<1x64xf32>
    tpu.vector_store %arg14[%c9, %c0_140], %187 {strides = array<i32>} : memref<16x512xf32, #tpu.memory_space<vmem>>, vector<1x64xf32>,
    %189 = vector.extract_strided_slice %23 {offsets = [33, 0], sizes = [1, 128], strides = [1, 1]} : vector<64x128xf32> to vector<1x128xf32>
    %190 = vector.extract_strided_slice %189 {offsets = [0, 0], sizes = [1, 64], strides = [1, 1]} : vector<1x128xf32> to vector<1x64xf32>
    %c8_141 = arith.constant 8 : index
    %c64_142 = arith.constant 64 : index
    %191 = vector.load %arg14[%c8_141, %c64_142] : memref<16x512xf32, #tpu.memory_space<vmem>>, vector<1x64xf32>
    tpu.vector_store %arg14[%c8_141, %c64_142], %190 {strides = array<i32>} : memref<16x512xf32, #tpu.memory_space<vmem>>, vector<1x64xf32>,
    %192 = vector.extract_strided_slice %189 {offsets = [0, 64], sizes = [1, 64], strides = [1, 1]} : vector<1x128xf32> to vector<1x64xf32>
    %c9_143 = arith.constant 9 : index
    %c64_144 = arith.constant 64 : index
    %193 = vector.load %arg14[%c9_143, %c64_144] : memref<16x512xf32, #tpu.memory_space<vmem>>, vector<1x64xf32>
    tpu.vector_store %arg14[%c9_143, %c64_144], %192 {strides = array<i32>} : memref<16x512xf32, #tpu.memory_space<vmem>>, vector<1x64xf32>,
    %194 = vector.extract_strided_slice %23 {offsets = [34, 0], sizes = [1, 128], strides = [1, 1]} : vector<64x128xf32> to vector<1x128xf32>
    %195 = vector.extract_strided_slice %194 {offsets = [0, 0], sizes = [1, 64], strides = [1, 1]} : vector<1x128xf32> to vector<1x64xf32>
    %c8_145 = arith.constant 8 : index
    %c128_146 = arith.constant 128 : index
    %196 = vector.load %arg14[%c8_145, %c128_146] : memref<16x512xf32, #tpu.memory_space<vmem>>, vector<1x64xf32>
    tpu.vector_store %arg14[%c8_145, %c128_146], %195 {strides = array<i32>} : memref<16x512xf32, #tpu.memory_space<vmem>>, vector<1x64xf32>,
    %197 = vector.extract_strided_slice %194 {offsets = [0, 64], sizes = [1, 64], strides = [1, 1]} : vector<1x128xf32> to vector<1x64xf32>
    %c9_147 = arith.constant 9 : index
    %c128_148 = arith.constant 128 : index
    %198 = vector.load %arg14[%c9_147, %c128_148] : memref<16x512xf32, #tpu.memory_space<vmem>>, vector<1x64xf32>
    tpu.vector_store %arg14[%c9_147, %c128_148], %197 {strides = array<i32>} : memref<16x512xf32, #tpu.memory_space<vmem>>, vector<1x64xf32>,
    %199 = vector.extract_strided_slice %23 {offsets = [35, 0], sizes = [1, 128], strides = [1, 1]} : vector<64x128xf32> to vector<1x128xf32>
    %200 = vector.extract_strided_slice %199 {offsets = [0, 0], sizes = [1, 64], strides = [1, 1]} : vector<1x128xf32> to vector<1x64xf32>
    %c8_149 = arith.constant 8 : index
    %c192_150 = arith.constant 192 : index
    %201 = vector.load %arg14[%c8_149, %c192_150] : memref<16x512xf32, #tpu.memory_space<vmem>>, vector<1x64xf32>
    tpu.vector_store %arg14[%c8_149, %c192_150], %200 {strides = array<i32>} : memref<16x512xf32, #tpu.memory_space<vmem>>, vector<1x64xf32>,
    %202 = vector.extract_strided_slice %199 {offsets = [0, 64], sizes = [1, 64], strides = [1, 1]} : vector<1x128xf32> to vector<1x64xf32>
    %c9_151 = arith.constant 9 : index
    %c192_152 = arith.constant 192 : index
    %203 = vector.load %arg14[%c9_151, %c192_152] : memref<16x512xf32, #tpu.memory_space<vmem>>, vector<1x64xf32>
    tpu.vector_store %arg14[%c9_151, %c192_152], %202 {strides = array<i32>} : memref<16x512xf32, #tpu.memory_space<vmem>>, vector<1x64xf32>,
    %204 = vector.extract_strided_slice %23 {offsets = [36, 0], sizes = [1, 128], strides = [1, 1]} : vector<64x128xf32> to vector<1x128xf32>
    %205 = vector.extract_strided_slice %204 {offsets = [0, 0], sizes = [1, 64], strides = [1, 1]} : vector<1x128xf32> to vector<1x64xf32>
    %c8_153 = arith.constant 8 : index
    %c256_154 = arith.constant 256 : index
    %206 = vector.load %arg14[%c8_153, %c256_154] : memref<16x512xf32, #tpu.memory_space<vmem>>, vector<1x64xf32>
    tpu.vector_store %arg14[%c8_153, %c256_154], %205 {strides = array<i32>} : memref<16x512xf32, #tpu.memory_space<vmem>>, vector<1x64xf32>,
    %207 = vector.extract_strided_slice %204 {offsets = [0, 64], sizes = [1, 64], strides = [1, 1]} : vector<1x128xf32> to vector<1x64xf32>
    %c9_155 = arith.constant 9 : index
    %c256_156 = arith.constant 256 : index
    %208 = vector.load %arg14[%c9_155, %c256_156] : memref<16x512xf32, #tpu.memory_space<vmem>>, vector<1x64xf32>
    tpu.vector_store %arg14[%c9_155, %c256_156], %207 {strides = array<i32>} : memref<16x512xf32, #tpu.memory_space<vmem>>, vector<1x64xf32>,
    %209 = vector.extract_strided_slice %23 {offsets = [37, 0], sizes = [1, 128], strides = [1, 1]} : vector<64x128xf32> to vector<1x128xf32>
    %210 = vector.extract_strided_slice %209 {offsets = [0, 0], sizes = [1, 64], strides = [1, 1]} : vector<1x128xf32> to vector<1x64xf32>
    %c8_157 = arith.constant 8 : index
    %c320_158 = arith.constant 320 : index
    %211 = vector.load %arg14[%c8_157, %c320_158] : memref<16x512xf32, #tpu.memory_space<vmem>>, vector<1x64xf32>
    tpu.vector_store %arg14[%c8_157, %c320_158], %210 {strides = array<i32>} : memref<16x512xf32, #tpu.memory_space<vmem>>, vector<1x64xf32>,
    %212 = vector.extract_strided_slice %209 {offsets = [0, 64], sizes = [1, 64], strides = [1, 1]} : vector<1x128xf32> to vector<1x64xf32>
    %c9_159 = arith.constant 9 : index
    %c320_160 = arith.constant 320 : index
    %213 = vector.load %arg14[%c9_159, %c320_160] : memref<16x512xf32, #tpu.memory_space<vmem>>, vector<1x64xf32>
    tpu.vector_store %arg14[%c9_159, %c320_160], %212 {strides = array<i32>} : memref<16x512xf32, #tpu.memory_space<vmem>>, vector<1x64xf32>,
    %214 = vector.extract_strided_slice %23 {offsets = [38, 0], sizes = [1, 128], strides = [1, 1]} : vector<64x128xf32> to vector<1x128xf32>
    %215 = vector.extract_strided_slice %214 {offsets = [0, 0], sizes = [1, 64], strides = [1, 1]} : vector<1x128xf32> to vector<1x64xf32>
    %c8_161 = arith.constant 8 : index
    %c384_162 = arith.constant 384 : index
    %216 = vector.load %arg14[%c8_161, %c384_162] : memref<16x512xf32, #tpu.memory_space<vmem>>, vector<1x64xf32>
    tpu.vector_store %arg14[%c8_161, %c384_162], %215 {strides = array<i32>} : memref<16x512xf32, #tpu.memory_space<vmem>>, vector<1x64xf32>,
    %217 = vector.extract_strided_slice %214 {offsets = [0, 64], sizes = [1, 64], strides = [1, 1]} : vector<1x128xf32> to vector<1x64xf32>
    %c9_163 = arith.constant 9 : index
    %c384_164 = arith.constant 384 : index
    %218 = vector.load %arg14[%c9_163, %c384_164] : memref<16x512xf32, #tpu.memory_space<vmem>>, vector<1x64xf32>
    tpu.vector_store %arg14[%c9_163, %c384_164], %217 {strides = array<i32>} : memref<16x512xf32, #tpu.memory_space<vmem>>, vector<1x64xf32>,
    %219 = vector.extract_strided_slice %23 {offsets = [39, 0], sizes = [1, 128], strides = [1, 1]} : vector<64x128xf32> to vector<1x128xf32>
    %220 = vector.extract_strided_slice %219 {offsets = [0, 0], sizes = [1, 64], strides = [1, 1]} : vector<1x128xf32> to vector<1x64xf32>
    %c8_165 = arith.constant 8 : index
    %c448_166 = arith.constant 448 : index
    %221 = vector.load %arg14[%c8_165, %c448_166] : memref<16x512xf32, #tpu.memory_space<vmem>>, vector<1x64xf32>
    tpu.vector_store %arg14[%c8_165, %c448_166], %220 {strides = array<i32>} : memref<16x512xf32, #tpu.memory_space<vmem>>, vector<1x64xf32>,
    %222 = vector.extract_strided_slice %219 {offsets = [0, 64], sizes = [1, 64], strides = [1, 1]} : vector<1x128xf32> to vector<1x64xf32>
    %c9_167 = arith.constant 9 : index
    %c448_168 = arith.constant 448 : index
    %223 = vector.load %arg14[%c9_167, %c448_168] : memref<16x512xf32, #tpu.memory_space<vmem>>, vector<1x64xf32>
    tpu.vector_store %arg14[%c9_167, %c448_168], %222 {strides = array<i32>} : memref<16x512xf32, #tpu.memory_space<vmem>>, vector<1x64xf32>,
    %224 = vector.extract_strided_slice %23 {offsets = [40, 0], sizes = [1, 128], strides = [1, 1]} : vector<64x128xf32> to vector<1x128xf32>
    %225 = vector.extract_strided_slice %224 {offsets = [0, 0], sizes = [1, 64], strides = [1, 1]} : vector<1x128xf32> to vector<1x64xf32>
    %c10 = arith.constant 10 : index
    %c0_169 = arith.constant 0 : index
    %226 = vector.load %arg14[%c10, %c0_169] : memref<16x512xf32, #tpu.memory_space<vmem>>, vector<1x64xf32>
    tpu.vector_store %arg14[%c10, %c0_169], %225 {strides = array<i32>} : memref<16x512xf32, #tpu.memory_space<vmem>>, vector<1x64xf32>,
    %227 = vector.extract_strided_slice %224 {offsets = [0, 64], sizes = [1, 64], strides = [1, 1]} : vector<1x128xf32> to vector<1x64xf32>
    %c11 = arith.constant 11 : index
    %c0_170 = arith.constant 0 : index
    %228 = vector.load %arg14[%c11, %c0_170] : memref<16x512xf32, #tpu.memory_space<vmem>>, vector<1x64xf32>
    tpu.vector_store %arg14[%c11, %c0_170], %227 {strides = array<i32>} : memref<16x512xf32, #tpu.memory_space<vmem>>, vector<1x64xf32>,
    %229 = vector.extract_strided_slice %23 {offsets = [41, 0], sizes = [1, 128], strides = [1, 1]} : vector<64x128xf32> to vector<1x128xf32>
    %230 = vector.extract_strided_slice %229 {offsets = [0, 0], sizes = [1, 64], strides = [1, 1]} : vector<1x128xf32> to vector<1x64xf32>
    %c10_171 = arith.constant 10 : index
    %c64_172 = arith.constant 64 : index
    %231 = vector.load %arg14[%c10_171, %c64_172] : memref<16x512xf32, #tpu.memory_space<vmem>>, vector<1x64xf32>
    tpu.vector_store %arg14[%c10_171, %c64_172], %230 {strides = array<i32>} : memref<16x512xf32, #tpu.memory_space<vmem>>, vector<1x64xf32>,
    %232 = vector.extract_strided_slice %229 {offsets = [0, 64], sizes = [1, 64], strides = [1, 1]} : vector<1x128xf32> to vector<1x64xf32>
    %c11_173 = arith.constant 11 : index
    %c64_174 = arith.constant 64 : index
    %233 = vector.load %arg14[%c11_173, %c64_174] : memref<16x512xf32, #tpu.memory_space<vmem>>, vector<1x64xf32>
    tpu.vector_store %arg14[%c11_173, %c64_174], %232 {strides = array<i32>} : memref<16x512xf32, #tpu.memory_space<vmem>>, vector<1x64xf32>,
    %234 = vector.extract_strided_slice %23 {offsets = [42, 0], sizes = [1, 128], strides = [1, 1]} : vector<64x128xf32> to vector<1x128xf32>
    %235 = vector.extract_strided_slice %234 {offsets = [0, 0], sizes = [1, 64], strides = [1, 1]} : vector<1x128xf32> to vector<1x64xf32>
    %c10_175 = arith.constant 10 : index
    %c128_176 = arith.constant 128 : index
    %236 = vector.load %arg14[%c10_175, %c128_176] : memref<16x512xf32, #tpu.memory_space<vmem>>, vector<1x64xf32>
    tpu.vector_store %arg14[%c10_175, %c128_176], %235 {strides = array<i32>} : memref<16x512xf32, #tpu.memory_space<vmem>>, vector<1x64xf32>,
    %237 = vector.extract_strided_slice %234 {offsets = [0, 64], sizes = [1, 64], strides = [1, 1]} : vector<1x128xf32> to vector<1x64xf32>
    %c11_177 = arith.constant 11 : index
    %c128_178 = arith.constant 128 : index
    %238 = vector.load %arg14[%c11_177, %c128_178] : memref<16x512xf32, #tpu.memory_space<vmem>>, vector<1x64xf32>
    tpu.vector_store %arg14[%c11_177, %c128_178], %237 {strides = array<i32>} : memref<16x512xf32, #tpu.memory_space<vmem>>, vector<1x64xf32>,
    %239 = vector.extract_strided_slice %23 {offsets = [43, 0], sizes = [1, 128], strides = [1, 1]} : vector<64x128xf32> to vector<1x128xf32>
    %240 = vector.extract_strided_slice %239 {offsets = [0, 0], sizes = [1, 64], strides = [1, 1]} : vector<1x128xf32> to vector<1x64xf32>
    %c10_179 = arith.constant 10 : index
    %c192_180 = arith.constant 192 : index
    %241 = vector.load %arg14[%c10_179, %c192_180] : memref<16x512xf32, #tpu.memory_space<vmem>>, vector<1x64xf32>
    tpu.vector_store %arg14[%c10_179, %c192_180], %240 {strides = array<i32>} : memref<16x512xf32, #tpu.memory_space<vmem>>, vector<1x64xf32>,
    %242 = vector.extract_strided_slice %239 {offsets = [0, 64], sizes = [1, 64], strides = [1, 1]} : vector<1x128xf32> to vector<1x64xf32>
    %c11_181 = arith.constant 11 : index
    %c192_182 = arith.constant 192 : index
    %243 = vector.load %arg14[%c11_181, %c192_182] : memref<16x512xf32, #tpu.memory_space<vmem>>, vector<1x64xf32>
    tpu.vector_store %arg14[%c11_181, %c192_182], %242 {strides = array<i32>} : memref<16x512xf32, #tpu.memory_space<vmem>>, vector<1x64xf32>,
    %244 = vector.extract_strided_slice %23 {offsets = [44, 0], sizes = [1, 128], strides = [1, 1]} : vector<64x128xf32> to vector<1x128xf32>
    %245 = vector.extract_strided_slice %244 {offsets = [0, 0], sizes = [1, 64], strides = [1, 1]} : vector<1x128xf32> to vector<1x64xf32>
    %c10_183 = arith.constant 10 : index
    %c256_184 = arith.constant 256 : index
    %246 = vector.load %arg14[%c10_183, %c256_184] : memref<16x512xf32, #tpu.memory_space<vmem>>, vector<1x64xf32>
    tpu.vector_store %arg14[%c10_183, %c256_184], %245 {strides = array<i32>} : memref<16x512xf32, #tpu.memory_space<vmem>>, vector<1x64xf32>,
    %247 = vector.extract_strided_slice %244 {offsets = [0, 64], sizes = [1, 64], strides = [1, 1]} : vector<1x128xf32> to vector<1x64xf32>
    %c11_185 = arith.constant 11 : index
    %c256_186 = arith.constant 256 : index
    %248 = vector.load %arg14[%c11_185, %c256_186] : memref<16x512xf32, #tpu.memory_space<vmem>>, vector<1x64xf32>
    tpu.vector_store %arg14[%c11_185, %c256_186], %247 {strides = array<i32>} : memref<16x512xf32, #tpu.memory_space<vmem>>, vector<1x64xf32>,
    %249 = vector.extract_strided_slice %23 {offsets = [45, 0], sizes = [1, 128], strides = [1, 1]} : vector<64x128xf32> to vector<1x128xf32>
    %250 = vector.extract_strided_slice %249 {offsets = [0, 0], sizes = [1, 64], strides = [1, 1]} : vector<1x128xf32> to vector<1x64xf32>
    %c10_187 = arith.constant 10 : index
    %c320_188 = arith.constant 320 : index
    %251 = vector.load %arg14[%c10_187, %c320_188] : memref<16x512xf32, #tpu.memory_space<vmem>>, vector<1x64xf32>
    tpu.vector_store %arg14[%c10_187, %c320_188], %250 {strides = array<i32>} : memref<16x512xf32, #tpu.memory_space<vmem>>, vector<1x64xf32>,
    %252 = vector.extract_strided_slice %249 {offsets = [0, 64], sizes = [1, 64], strides = [1, 1]} : vector<1x128xf32> to vector<1x64xf32>
    %c11_189 = arith.constant 11 : index
    %c320_190 = arith.constant 320 : index
    %253 = vector.load %arg14[%c11_189, %c320_190] : memref<16x512xf32, #tpu.memory_space<vmem>>, vector<1x64xf32>
    tpu.vector_store %arg14[%c11_189, %c320_190], %252 {strides = array<i32>} : memref<16x512xf32, #tpu.memory_space<vmem>>, vector<1x64xf32>,
    %254 = vector.extract_strided_slice %23 {offsets = [46, 0], sizes = [1, 128], strides = [1, 1]} : vector<64x128xf32> to vector<1x128xf32>
    %255 = vector.extract_strided_slice %254 {offsets = [0, 0], sizes = [1, 64], strides = [1, 1]} : vector<1x128xf32> to vector<1x64xf32>
    %c10_191 = arith.constant 10 : index
    %c384_192 = arith.constant 384 : index
    %256 = vector.load %arg14[%c10_191, %c384_192] : memref<16x512xf32, #tpu.memory_space<vmem>>, vector<1x64xf32>
    tpu.vector_store %arg14[%c10_191, %c384_192], %255 {strides = array<i32>} : memref<16x512xf32, #tpu.memory_space<vmem>>, vector<1x64xf32>,
    %257 = vector.extract_strided_slice %254 {offsets = [0, 64], sizes = [1, 64], strides = [1, 1]} : vector<1x128xf32> to vector<1x64xf32>
    %c11_193 = arith.constant 11 : index
    %c384_194 = arith.constant 384 : index
    %258 = vector.load %arg14[%c11_193, %c384_194] : memref<16x512xf32, #tpu.memory_space<vmem>>, vector<1x64xf32>
    tpu.vector_store %arg14[%c11_193, %c384_194], %257 {strides = array<i32>} : memref<16x512xf32, #tpu.memory_space<vmem>>, vector<1x64xf32>,
    %259 = vector.extract_strided_slice %23 {offsets = [47, 0], sizes = [1, 128], strides = [1, 1]} : vector<64x128xf32> to vector<1x128xf32>
    %260 = vector.extract_strided_slice %259 {offsets = [0, 0], sizes = [1, 64], strides = [1, 1]} : vector<1x128xf32> to vector<1x64xf32>
    %c10_195 = arith.constant 10 : index
    %c448_196 = arith.constant 448 : index
    %261 = vector.load %arg14[%c10_195, %c448_196] : memref<16x512xf32, #tpu.memory_space<vmem>>, vector<1x64xf32>
    tpu.vector_store %arg14[%c10_195, %c448_196], %260 {strides = array<i32>} : memref<16x512xf32, #tpu.memory_space<vmem>>, vector<1x64xf32>,
    %262 = vector.extract_strided_slice %259 {offsets = [0, 64], sizes = [1, 64], strides = [1, 1]} : vector<1x128xf32> to vector<1x64xf32>
    %c11_197 = arith.constant 11 : index
    %c448_198 = arith.constant 448 : index
    %263 = vector.load %arg14[%c11_197, %c448_198] : memref<16x512xf32, #tpu.memory_space<vmem>>, vector<1x64xf32>
    tpu.vector_store %arg14[%c11_197, %c448_198], %262 {strides = array<i32>} : memref<16x512xf32, #tpu.memory_space<vmem>>, vector<1x64xf32>,
    %264 = vector.extract_strided_slice %23 {offsets = [48, 0], sizes = [1, 128], strides = [1, 1]} : vector<64x128xf32> to vector<1x128xf32>
    %265 = vector.extract_strided_slice %264 {offsets = [0, 0], sizes = [1, 64], strides = [1, 1]} : vector<1x128xf32> to vector<1x64xf32>
    %c12 = arith.constant 12 : index
    %c0_199 = arith.constant 0 : index
    %266 = vector.load %arg14[%c12, %c0_199] : memref<16x512xf32, #tpu.memory_space<vmem>>, vector<1x64xf32>
    tpu.vector_store %arg14[%c12, %c0_199], %265 {strides = array<i32>} : memref<16x512xf32, #tpu.memory_space<vmem>>, vector<1x64xf32>,
    %267 = vector.extract_strided_slice %264 {offsets = [0, 64], sizes = [1, 64], strides = [1, 1]} : vector<1x128xf32> to vector<1x64xf32>
    %c13 = arith.constant 13 : index
    %c0_200 = arith.constant 0 : index
    %268 = vector.load %arg14[%c13, %c0_200] : memref<16x512xf32, #tpu.memory_space<vmem>>, vector<1x64xf32>
    tpu.vector_store %arg14[%c13, %c0_200], %267 {strides = array<i32>} : memref<16x512xf32, #tpu.memory_space<vmem>>, vector<1x64xf32>,
    %269 = vector.extract_strided_slice %23 {offsets = [49, 0], sizes = [1, 128], strides = [1, 1]} : vector<64x128xf32> to vector<1x128xf32>
    %270 = vector.extract_strided_slice %269 {offsets = [0, 0], sizes = [1, 64], strides = [1, 1]} : vector<1x128xf32> to vector<1x64xf32>
    %c12_201 = arith.constant 12 : index
    %c64_202 = arith.constant 64 : index
    %271 = vector.load %arg14[%c12_201, %c64_202] : memref<16x512xf32, #tpu.memory_space<vmem>>, vector<1x64xf32>
    tpu.vector_store %arg14[%c12_201, %c64_202], %270 {strides = array<i32>} : memref<16x512xf32, #tpu.memory_space<vmem>>, vector<1x64xf32>,
    %272 = vector.extract_strided_slice %269 {offsets = [0, 64], sizes = [1, 64], strides = [1, 1]} : vector<1x128xf32> to vector<1x64xf32>
    %c13_203 = arith.constant 13 : index
    %c64_204 = arith.constant 64 : index
    %273 = vector.load %arg14[%c13_203, %c64_204] : memref<16x512xf32, #tpu.memory_space<vmem>>, vector<1x64xf32>
    tpu.vector_store %arg14[%c13_203, %c64_204], %272 {strides = array<i32>} : memref<16x512xf32, #tpu.memory_space<vmem>>, vector<1x64xf32>,
    %274 = vector.extract_strided_slice %23 {offsets = [50, 0], sizes = [1, 128], strides = [1, 1]} : vector<64x128xf32> to vector<1x128xf32>
    %275 = vector.extract_strided_slice %274 {offsets = [0, 0], sizes = [1, 64], strides = [1, 1]} : vector<1x128xf32> to vector<1x64xf32>
    %c12_205 = arith.constant 12 : index
    %c128_206 = arith.constant 128 : index
    %276 = vector.load %arg14[%c12_205, %c128_206] : memref<16x512xf32, #tpu.memory_space<vmem>>, vector<1x64xf32>
    tpu.vector_store %arg14[%c12_205, %c128_206], %275 {strides = array<i32>} : memref<16x512xf32, #tpu.memory_space<vmem>>, vector<1x64xf32>,
    %277 = vector.extract_strided_slice %274 {offsets = [0, 64], sizes = [1, 64], strides = [1, 1]} : vector<1x128xf32> to vector<1x64xf32>
    %c13_207 = arith.constant 13 : index
    %c128_208 = arith.constant 128 : index
    %278 = vector.load %arg14[%c13_207, %c128_208] : memref<16x512xf32, #tpu.memory_space<vmem>>, vector<1x64xf32>
    tpu.vector_store %arg14[%c13_207, %c128_208], %277 {strides = array<i32>} : memref<16x512xf32, #tpu.memory_space<vmem>>, vector<1x64xf32>,
    %279 = vector.extract_strided_slice %23 {offsets = [51, 0], sizes = [1, 128], strides = [1, 1]} : vector<64x128xf32> to vector<1x128xf32>
    %280 = vector.extract_strided_slice %279 {offsets = [0, 0], sizes = [1, 64], strides = [1, 1]} : vector<1x128xf32> to vector<1x64xf32>
    %c12_209 = arith.constant 12 : index
    %c192_210 = arith.constant 192 : index
    %281 = vector.load %arg14[%c12_209, %c192_210] : memref<16x512xf32, #tpu.memory_space<vmem>>, vector<1x64xf32>
    tpu.vector_store %arg14[%c12_209, %c192_210], %280 {strides = array<i32>} : memref<16x512xf32, #tpu.memory_space<vmem>>, vector<1x64xf32>,
    %282 = vector.extract_strided_slice %279 {offsets = [0, 64], sizes = [1, 64], strides = [1, 1]} : vector<1x128xf32> to vector<1x64xf32>
    %c13_211 = arith.constant 13 : index
    %c192_212 = arith.constant 192 : index
    %283 = vector.load %arg14[%c13_211, %c192_212] : memref<16x512xf32, #tpu.memory_space<vmem>>, vector<1x64xf32>
    tpu.vector_store %arg14[%c13_211, %c192_212], %282 {strides = array<i32>} : memref<16x512xf32, #tpu.memory_space<vmem>>, vector<1x64xf32>,
    %284 = vector.extract_strided_slice %23 {offsets = [52, 0], sizes = [1, 128], strides = [1, 1]} : vector<64x128xf32> to vector<1x128xf32>
    %285 = vector.extract_strided_slice %284 {offsets = [0, 0], sizes = [1, 64], strides = [1, 1]} : vector<1x128xf32> to vector<1x64xf32>
    %c12_213 = arith.constant 12 : index
    %c256_214 = arith.constant 256 : index
    %286 = vector.load %arg14[%c12_213, %c256_214] : memref<16x512xf32, #tpu.memory_space<vmem>>, vector<1x64xf32>
    tpu.vector_store %arg14[%c12_213, %c256_214], %285 {strides = array<i32>} : memref<16x512xf32, #tpu.memory_space<vmem>>, vector<1x64xf32>,
    %287 = vector.extract_strided_slice %284 {offsets = [0, 64], sizes = [1, 64], strides = [1, 1]} : vector<1x128xf32> to vector<1x64xf32>
    %c13_215 = arith.constant 13 : index
    %c256_216 = arith.constant 256 : index
    %288 = vector.load %arg14[%c13_215, %c256_216] : memref<16x512xf32, #tpu.memory_space<vmem>>, vector<1x64xf32>
    tpu.vector_store %arg14[%c13_215, %c256_216], %287 {strides = array<i32>} : memref<16x512xf32, #tpu.memory_space<vmem>>, vector<1x64xf32>,
    %289 = vector.extract_strided_slice %23 {offsets = [53, 0], sizes = [1, 128], strides = [1, 1]} : vector<64x128xf32> to vector<1x128xf32>
    %290 = vector.extract_strided_slice %289 {offsets = [0, 0], sizes = [1, 64], strides = [1, 1]} : vector<1x128xf32> to vector<1x64xf32>
    %c12_217 = arith.constant 12 : index
    %c320_218 = arith.constant 320 : index
    %291 = vector.load %arg14[%c12_217, %c320_218] : memref<16x512xf32, #tpu.memory_space<vmem>>, vector<1x64xf32>
    tpu.vector_store %arg14[%c12_217, %c320_218], %290 {strides = array<i32>} : memref<16x512xf32, #tpu.memory_space<vmem>>, vector<1x64xf32>,
    %292 = vector.extract_strided_slice %289 {offsets = [0, 64], sizes = [1, 64], strides = [1, 1]} : vector<1x128xf32> to vector<1x64xf32>
    %c13_219 = arith.constant 13 : index
    %c320_220 = arith.constant 320 : index
    %293 = vector.load %arg14[%c13_219, %c320_220] : memref<16x512xf32, #tpu.memory_space<vmem>>, vector<1x64xf32>
    tpu.vector_store %arg14[%c13_219, %c320_220], %292 {strides = array<i32>} : memref<16x512xf32, #tpu.memory_space<vmem>>, vector<1x64xf32>,
    %294 = vector.extract_strided_slice %23 {offsets = [54, 0], sizes = [1, 128], strides = [1, 1]} : vector<64x128xf32> to vector<1x128xf32>
    %295 = vector.extract_strided_slice %294 {offsets = [0, 0], sizes = [1, 64], strides = [1, 1]} : vector<1x128xf32> to vector<1x64xf32>
    %c12_221 = arith.constant 12 : index
    %c384_222 = arith.constant 384 : index
    %296 = vector.load %arg14[%c12_221, %c384_222] : memref<16x512xf32, #tpu.memory_space<vmem>>, vector<1x64xf32>
    tpu.vector_store %arg14[%c12_221, %c384_222], %295 {strides = array<i32>} : memref<16x512xf32, #tpu.memory_space<vmem>>, vector<1x64xf32>,
    %297 = vector.extract_strided_slice %294 {offsets = [0, 64], sizes = [1, 64], strides = [1, 1]} : vector<1x128xf32> to vector<1x64xf32>
    %c13_223 = arith.constant 13 : index
    %c384_224 = arith.constant 384 : index
    %298 = vector.load %arg14[%c13_223, %c384_224] : memref<16x512xf32, #tpu.memory_space<vmem>>, vector<1x64xf32>
    tpu.vector_store %arg14[%c13_223, %c384_224], %297 {strides = array<i32>} : memref<16x512xf32, #tpu.memory_space<vmem>>, vector<1x64xf32>,
    %299 = vector.extract_strided_slice %23 {offsets = [55, 0], sizes = [1, 128], strides = [1, 1]} : vector<64x128xf32> to vector<1x128xf32>
    %300 = vector.extract_strided_slice %299 {offsets = [0, 0], sizes = [1, 64], strides = [1, 1]} : vector<1x128xf32> to vector<1x64xf32>
    %c12_225 = arith.constant 12 : index
    %c448_226 = arith.constant 448 : index
    %301 = vector.load %arg14[%c12_225, %c448_226] : memref<16x512xf32, #tpu.memory_space<vmem>>, vector<1x64xf32>
    tpu.vector_store %arg14[%c12_225, %c448_226], %300 {strides = array<i32>} : memref<16x512xf32, #tpu.memory_space<vmem>>, vector<1x64xf32>,
    %302 = vector.extract_strided_slice %299 {offsets = [0, 64], sizes = [1, 64], strides = [1, 1]} : vector<1x128xf32> to vector<1x64xf32>
    %c13_227 = arith.constant 13 : index
    %c448_228 = arith.constant 448 : index
    %303 = vector.load %arg14[%c13_227, %c448_228] : memref<16x512xf32, #tpu.memory_space<vmem>>, vector<1x64xf32>
    tpu.vector_store %arg14[%c13_227, %c448_228], %302 {strides = array<i32>} : memref<16x512xf32, #tpu.memory_space<vmem>>, vector<1x64xf32>,
    %304 = vector.extract_strided_slice %23 {offsets = [56, 0], sizes = [1, 128], strides = [1, 1]} : vector<64x128xf32> to vector<1x128xf32>
    %305 = vector.extract_strided_slice %304 {offsets = [0, 0], sizes = [1, 64], strides = [1, 1]} : vector<1x128xf32> to vector<1x64xf32>
    %c14 = arith.constant 14 : index
    %c0_229 = arith.constant 0 : index
    %306 = vector.load %arg14[%c14, %c0_229] : memref<16x512xf32, #tpu.memory_space<vmem>>, vector<1x64xf32>
    tpu.vector_store %arg14[%c14, %c0_229], %305 {strides = array<i32>} : memref<16x512xf32, #tpu.memory_space<vmem>>, vector<1x64xf32>,
    %307 = vector.extract_strided_slice %304 {offsets = [0, 64], sizes = [1, 64], strides = [1, 1]} : vector<1x128xf32> to vector<1x64xf32>
    %c15 = arith.constant 15 : index
    %c0_230 = arith.constant 0 : index
    %308 = vector.load %arg14[%c15, %c0_230] : memref<16x512xf32, #tpu.memory_space<vmem>>, vector<1x64xf32>
    tpu.vector_store %arg14[%c15, %c0_230], %307 {strides = array<i32>} : memref<16x512xf32, #tpu.memory_space<vmem>>, vector<1x64xf32>,
    %309 = vector.extract_strided_slice %23 {offsets = [57, 0], sizes = [1, 128], strides = [1, 1]} : vector<64x128xf32> to vector<1x128xf32>
    %310 = vector.extract_strided_slice %309 {offsets = [0, 0], sizes = [1, 64], strides = [1, 1]} : vector<1x128xf32> to vector<1x64xf32>
    %c14_231 = arith.constant 14 : index
    %c64_232 = arith.constant 64 : index
    %311 = vector.load %arg14[%c14_231, %c64_232] : memref<16x512xf32, #tpu.memory_space<vmem>>, vector<1x64xf32>
    tpu.vector_store %arg14[%c14_231, %c64_232], %310 {strides = array<i32>} : memref<16x512xf32, #tpu.memory_space<vmem>>, vector<1x64xf32>,
    %312 = vector.extract_strided_slice %309 {offsets = [0, 64], sizes = [1, 64], strides = [1, 1]} : vector<1x128xf32> to vector<1x64xf32>
    %c15_233 = arith.constant 15 : index
    %c64_234 = arith.constant 64 : index
    %313 = vector.load %arg14[%c15_233, %c64_234] : memref<16x512xf32, #tpu.memory_space<vmem>>, vector<1x64xf32>
    tpu.vector_store %arg14[%c15_233, %c64_234], %312 {strides = array<i32>} : memref<16x512xf32, #tpu.memory_space<vmem>>, vector<1x64xf32>,
    %314 = vector.extract_strided_slice %23 {offsets = [58, 0], sizes = [1, 128], strides = [1, 1]} : vector<64x128xf32> to vector<1x128xf32>
    %315 = vector.extract_strided_slice %314 {offsets = [0, 0], sizes = [1, 64], strides = [1, 1]} : vector<1x128xf32> to vector<1x64xf32>
    %c14_235 = arith.constant 14 : index
    %c128_236 = arith.constant 128 : index
    %316 = vector.load %arg14[%c14_235, %c128_236] : memref<16x512xf32, #tpu.memory_space<vmem>>, vector<1x64xf32>
    tpu.vector_store %arg14[%c14_235, %c128_236], %315 {strides = array<i32>} : memref<16x512xf32, #tpu.memory_space<vmem>>, vector<1x64xf32>,
    %317 = vector.extract_strided_slice %314 {offsets = [0, 64], sizes = [1, 64], strides = [1, 1]} : vector<1x128xf32> to vector<1x64xf32>
    %c15_237 = arith.constant 15 : index
    %c128_238 = arith.constant 128 : index
    %318 = vector.load %arg14[%c15_237, %c128_238] : memref<16x512xf32, #tpu.memory_space<vmem>>, vector<1x64xf32>
    tpu.vector_store %arg14[%c15_237, %c128_238], %317 {strides = array<i32>} : memref<16x512xf32, #tpu.memory_space<vmem>>, vector<1x64xf32>,
    %319 = vector.extract_strided_slice %23 {offsets = [59, 0], sizes = [1, 128], strides = [1, 1]} : vector<64x128xf32> to vector<1x128xf32>
    %320 = vector.extract_strided_slice %319 {offsets = [0, 0], sizes = [1, 64], strides = [1, 1]} : vector<1x128xf32> to vector<1x64xf32>
    %c14_239 = arith.constant 14 : index
    %c192_240 = arith.constant 192 : index
    %321 = vector.load %arg14[%c14_239, %c192_240] : memref<16x512xf32, #tpu.memory_space<vmem>>, vector<1x64xf32>
    tpu.vector_store %arg14[%c14_239, %c192_240], %320 {strides = array<i32>} : memref<16x512xf32, #tpu.memory_space<vmem>>, vector<1x64xf32>,
    %322 = vector.extract_strided_slice %319 {offsets = [0, 64], sizes = [1, 64], strides = [1, 1]} : vector<1x128xf32> to vector<1x64xf32>
    %c15_241 = arith.constant 15 : index
    %c192_242 = arith.constant 192 : index
    %323 = vector.load %arg14[%c15_241, %c192_242] : memref<16x512xf32, #tpu.memory_space<vmem>>, vector<1x64xf32>
    tpu.vector_store %arg14[%c15_241, %c192_242], %322 {strides = array<i32>} : memref<16x512xf32, #tpu.memory_space<vmem>>, vector<1x64xf32>,
    %324 = vector.extract_strided_slice %23 {offsets = [60, 0], sizes = [1, 128], strides = [1, 1]} : vector<64x128xf32> to vector<1x128xf32>
    %325 = vector.extract_strided_slice %324 {offsets = [0, 0], sizes = [1, 64], strides = [1, 1]} : vector<1x128xf32> to vector<1x64xf32>
    %c14_243 = arith.constant 14 : index
    %c256_244 = arith.constant 256 : index
    %326 = vector.load %arg14[%c14_243, %c256_244] : memref<16x512xf32, #tpu.memory_space<vmem>>, vector<1x64xf32>
    tpu.vector_store %arg14[%c14_243, %c256_244], %325 {strides = array<i32>} : memref<16x512xf32, #tpu.memory_space<vmem>>, vector<1x64xf32>,
    %327 = vector.extract_strided_slice %324 {offsets = [0, 64], sizes = [1, 64], strides = [1, 1]} : vector<1x128xf32> to vector<1x64xf32>
    %c15_245 = arith.constant 15 : index
    %c256_246 = arith.constant 256 : index
    %328 = vector.load %arg14[%c15_245, %c256_246] : memref<16x512xf32, #tpu.memory_space<vmem>>, vector<1x64xf32>
    tpu.vector_store %arg14[%c15_245, %c256_246], %327 {strides = array<i32>} : memref<16x512xf32, #tpu.memory_space<vmem>>, vector<1x64xf32>,
    %329 = vector.extract_strided_slice %23 {offsets = [61, 0], sizes = [1, 128], strides = [1, 1]} : vector<64x128xf32> to vector<1x128xf32>
    %330 = vector.extract_strided_slice %329 {offsets = [0, 0], sizes = [1, 64], strides = [1, 1]} : vector<1x128xf32> to vector<1x64xf32>
    %c14_247 = arith.constant 14 : index
    %c320_248 = arith.constant 320 : index
    %331 = vector.load %arg14[%c14_247, %c320_248] : memref<16x512xf32, #tpu.memory_space<vmem>>, vector<1x64xf32>
    tpu.vector_store %arg14[%c14_247, %c320_248], %330 {strides = array<i32>} : memref<16x512xf32, #tpu.memory_space<vmem>>, vector<1x64xf32>,
    %332 = vector.extract_strided_slice %329 {offsets = [0, 64], sizes = [1, 64], strides = [1, 1]} : vector<1x128xf32> to vector<1x64xf32>
    %c15_249 = arith.constant 15 : index
    %c320_250 = arith.constant 320 : index
    %333 = vector.load %arg14[%c15_249, %c320_250] : memref<16x512xf32, #tpu.memory_space<vmem>>, vector<1x64xf32>
    tpu.vector_store %arg14[%c15_249, %c320_250], %332 {strides = array<i32>} : memref<16x512xf32, #tpu.memory_space<vmem>>, vector<1x64xf32>,
    %334 = vector.extract_strided_slice %23 {offsets = [62, 0], sizes = [1, 128], strides = [1, 1]} : vector<64x128xf32> to vector<1x128xf32>
    %335 = vector.extract_strided_slice %334 {offsets = [0, 0], sizes = [1, 64], strides = [1, 1]} : vector<1x128xf32> to vector<1x64xf32>
    %c14_251 = arith.constant 14 : index
    %c384_252 = arith.constant 384 : index
    %336 = vector.load %arg14[%c14_251, %c384_252] : memref<16x512xf32, #tpu.memory_space<vmem>>, vector<1x64xf32>
    tpu.vector_store %arg14[%c14_251, %c384_252], %335 {strides = array<i32>} : memref<16x512xf32, #tpu.memory_space<vmem>>, vector<1x64xf32>,
    %337 = vector.extract_strided_slice %334 {offsets = [0, 64], sizes = [1, 64], strides = [1, 1]} : vector<1x128xf32> to vector<1x64xf32>
    %c15_253 = arith.constant 15 : index
    %c384_254 = arith.constant 384 : index
    %338 = vector.load %arg14[%c15_253, %c384_254] : memref<16x512xf32, #tpu.memory_space<vmem>>, vector<1x64xf32>
    tpu.vector_store %arg14[%c15_253, %c384_254], %337 {strides = array<i32>} : memref<16x512xf32, #tpu.memory_space<vmem>>, vector<1x64xf32>,
    %339 = vector.extract_strided_slice %23 {offsets = [63, 0], sizes = [1, 128], strides = [1, 1]} : vector<64x128xf32> to vector<1x128xf32>
    %340 = vector.extract_strided_slice %339 {offsets = [0, 0], sizes = [1, 64], strides = [1, 1]} : vector<1x128xf32> to vector<1x64xf32>
    %c14_255 = arith.constant 14 : index
    %c448_256 = arith.constant 448 : index
    %341 = vector.load %arg14[%c14_255, %c448_256] : memref<16x512xf32, #tpu.memory_space<vmem>>, vector<1x64xf32>
    tpu.vector_store %arg14[%c14_255, %c448_256], %340 {strides = array<i32>} : memref<16x512xf32, #tpu.memory_space<vmem>>, vector<1x64xf32>,
    %342 = vector.extract_strided_slice %339 {offsets = [0, 64], sizes = [1, 64], strides = [1, 1]} : vector<1x128xf32> to vector<1x64xf32>
    %c15_257 = arith.constant 15 : index
    %c448_258 = arith.constant 448 : index
    %343 = vector.load %arg14[%c15_257, %c448_258] : memref<16x512xf32, #tpu.memory_space<vmem>>, vector<1x64xf32>
    tpu.vector_store %arg14[%c15_257, %c448_258], %342 {strides = array<i32>} : memref<16x512xf32, #tpu.memory_space<vmem>>, vector<1x64xf32>,
    %cst_259 = arith.constant 0.000000e+00 : f32
    %344 = vector.broadcast %cst_259 : f32 to vector<2x8x7xf32>
    %c0_260 = arith.constant 0 : index
    %c0_261 = arith.constant 0 : index
    %c0_262 = arith.constant 0 : index
    %345 = vector.load %arg15[%c0_260, %c0_261, %c0_262] : memref<2x8x57xf32, #tpu.memory_space<vmem>>, vector<2x8x7xf32>
    tpu.vector_store %arg15[%c0_260, %c0_261, %c0_262], %344 {strides = array<i32>} : memref<2x8x57xf32, #tpu.memory_space<vmem>>, vector<2x8x7xf32>,
    %c0_263 = arith.constant 0 : index
    %c0_264 = arith.constant 0 : index
    %346 = vector.load %arg14[%c0_263, %c0_264] : memref<16x512xf32, #tpu.memory_space<vmem>>, vector<2x512xf32>
    %347 = arith.truncf %346 : vector<2x512xf32> to vector<2x512xbf16>
    %c0_265 = arith.constant 0 : index
    %c0_266 = arith.constant 0 : index
    %c0_267 = arith.constant 0 : index
    %348 = vector.load %arg3[%c0_265, %c0_266, %c0_267] : memref<8x512x50xbf16, #tpu.memory_space<vmem>>, vector<1x512x50xbf16>
    %349 = vector.shape_cast %348 : vector<1x512x50xbf16> to vector<512x50xbf16>
    %cst_268 = arith.constant dense<0.000000e+00> : vector<2x50xf32>
    %350 = tpu.matmul %347, %349, %cst_268 {dimension_numbers = #tpu.dot_dimension_numbers<[1], [0], [0], [1], [0, 0, 1, 1], [], []>} : vector<2x512xbf16>, vector<512x50xbf16>, vector<2x50xf32> -> vector<2x50xf32>
    %c0_269 = arith.constant 0 : index
    %c0_270 = arith.constant 0 : index
    %c0_271 = arith.constant 0 : index
    %351 = vector.load %arg4[%c0_269, %c0_270, %c0_271] : memref<8x1x50xf32, #tpu.memory_space<vmem>>, vector<1x1x50xf32>
    %352 = vector.shape_cast %351 : vector<1x1x50xf32> to vector<1x50xf32>
    %353 = vector.broadcast %352 : vector<1x50xf32> to vector<2x50xf32>
    %354 = arith.addf %350, %353 : vector<2x50xf32>
    %cst_272 = arith.constant 0.000000e+00 : f32
    %355 = vector.broadcast %cst_272 : f32 to vector<2x50xf32>
    %356 = arith.maximumf %354, %355 : vector<2x50xf32>
    %c0_273 = arith.constant 0 : index
    %c0_274 = arith.constant 0 : index
    %c7_275 = arith.constant 7 : index
    %357 = vector.load %arg15[%c0_273, %c0_274, %c7_275] : memref<2x8x57xf32, #tpu.memory_space<vmem>>, vector<2x1x50xf32>
    %358 = vector.shape_cast %357 : vector<2x1x50xf32> to vector<2x50xf32>
    %359 = vector.shape_cast %356 : vector<2x50xf32> to vector<2x1x50xf32>
    tpu.vector_store %arg15[%c0_273, %c0_274, %c7_275], %359 {strides = array<i32>} : memref<2x8x57xf32, #tpu.memory_space<vmem>>, vector<2x1x50xf32>,
    %c2_276 = arith.constant 2 : index
    %c0_277 = arith.constant 0 : index
    %360 = vector.load %arg14[%c2_276, %c0_277] : memref<16x512xf32, #tpu.memory_space<vmem>>, vector<2x512xf32>
    %361 = arith.truncf %360 : vector<2x512xf32> to vector<2x512xbf16>
    %c1_278 = arith.constant 1 : index
    %c0_279 = arith.constant 0 : index
    %c0_280 = arith.constant 0 : index
    %362 = vector.load %arg3[%c1_278, %c0_279, %c0_280] : memref<8x512x50xbf16, #tpu.memory_space<vmem>>, vector<1x512x50xbf16>
    %363 = vector.shape_cast %362 : vector<1x512x50xbf16> to vector<512x50xbf16>
    %cst_281 = arith.constant dense<0.000000e+00> : vector<2x50xf32>
    %364 = tpu.matmul %361, %363, %cst_281 {dimension_numbers = #tpu.dot_dimension_numbers<[1], [0], [0], [1], [0, 0, 1, 1], [], []>} : vector<2x512xbf16>, vector<512x50xbf16>, vector<2x50xf32> -> vector<2x50xf32>
    %c1_282 = arith.constant 1 : index
    %c0_283 = arith.constant 0 : index
    %c0_284 = arith.constant 0 : index
    %365 = vector.load %arg4[%c1_282, %c0_283, %c0_284] : memref<8x1x50xf32, #tpu.memory_space<vmem>>, vector<1x1x50xf32>
    %366 = vector.shape_cast %365 : vector<1x1x50xf32> to vector<1x50xf32>
    %367 = vector.broadcast %366 : vector<1x50xf32> to vector<2x50xf32>
    %368 = arith.addf %364, %367 : vector<2x50xf32>
    %cst_285 = arith.constant 0.000000e+00 : f32
    %369 = vector.broadcast %cst_285 : f32 to vector<2x50xf32>
    %370 = arith.maximumf %368, %369 : vector<2x50xf32>
    %c0_286 = arith.constant 0 : index
    %c1_287 = arith.constant 1 : index
    %c7_288 = arith.constant 7 : index
    %371 = vector.load %arg15[%c0_286, %c1_287, %c7_288] : memref<2x8x57xf32, #tpu.memory_space<vmem>>, vector<2x1x50xf32>
    %372 = vector.shape_cast %371 : vector<2x1x50xf32> to vector<2x50xf32>
    %373 = vector.shape_cast %370 : vector<2x50xf32> to vector<2x1x50xf32>
    tpu.vector_store %arg15[%c0_286, %c1_287, %c7_288], %373 {strides = array<i32>} : memref<2x8x57xf32, #tpu.memory_space<vmem>>, vector<2x1x50xf32>,
    %c4_289 = arith.constant 4 : index
    %c0_290 = arith.constant 0 : index
    %374 = vector.load %arg14[%c4_289, %c0_290] : memref<16x512xf32, #tpu.memory_space<vmem>>, vector<2x512xf32>
    %375 = arith.truncf %374 : vector<2x512xf32> to vector<2x512xbf16>
    %c2_291 = arith.constant 2 : index
    %c0_292 = arith.constant 0 : index
    %c0_293 = arith.constant 0 : index
    %376 = vector.load %arg3[%c2_291, %c0_292, %c0_293] : memref<8x512x50xbf16, #tpu.memory_space<vmem>>, vector<1x512x50xbf16>
    %377 = vector.shape_cast %376 : vector<1x512x50xbf16> to vector<512x50xbf16>
    %cst_294 = arith.constant dense<0.000000e+00> : vector<2x50xf32>
    %378 = tpu.matmul %375, %377, %cst_294 {dimension_numbers = #tpu.dot_dimension_numbers<[1], [0], [0], [1], [0, 0, 1, 1], [], []>} : vector<2x512xbf16>, vector<512x50xbf16>, vector<2x50xf32> -> vector<2x50xf32>
    %c2_295 = arith.constant 2 : index
    %c0_296 = arith.constant 0 : index
    %c0_297 = arith.constant 0 : index
    %379 = vector.load %arg4[%c2_295, %c0_296, %c0_297] : memref<8x1x50xf32, #tpu.memory_space<vmem>>, vector<1x1x50xf32>
    %380 = vector.shape_cast %379 : vector<1x1x50xf32> to vector<1x50xf32>
    %381 = vector.broadcast %380 : vector<1x50xf32> to vector<2x50xf32>
    %382 = arith.addf %378, %381 : vector<2x50xf32>
    %cst_298 = arith.constant 0.000000e+00 : f32
    %383 = vector.broadcast %cst_298 : f32 to vector<2x50xf32>
    %384 = arith.maximumf %382, %383 : vector<2x50xf32>
    %c0_299 = arith.constant 0 : index
    %c2_300 = arith.constant 2 : index
    %c7_301 = arith.constant 7 : index
    %385 = vector.load %arg15[%c0_299, %c2_300, %c7_301] : memref<2x8x57xf32, #tpu.memory_space<vmem>>, vector<2x1x50xf32>
    %386 = vector.shape_cast %385 : vector<2x1x50xf32> to vector<2x50xf32>
    %387 = vector.shape_cast %384 : vector<2x50xf32> to vector<2x1x50xf32>
    tpu.vector_store %arg15[%c0_299, %c2_300, %c7_301], %387 {strides = array<i32>} : memref<2x8x57xf32, #tpu.memory_space<vmem>>, vector<2x1x50xf32>,
    %c6_302 = arith.constant 6 : index
    %c0_303 = arith.constant 0 : index
    %388 = vector.load %arg14[%c6_302, %c0_303] : memref<16x512xf32, #tpu.memory_space<vmem>>, vector<2x512xf32>
    %389 = arith.truncf %388 : vector<2x512xf32> to vector<2x512xbf16>
    %c3_304 = arith.constant 3 : index
    %c0_305 = arith.constant 0 : index
    %c0_306 = arith.constant 0 : index
    %390 = vector.load %arg3[%c3_304, %c0_305, %c0_306] : memref<8x512x50xbf16, #tpu.memory_space<vmem>>, vector<1x512x50xbf16>
    %391 = vector.shape_cast %390 : vector<1x512x50xbf16> to vector<512x50xbf16>
    %cst_307 = arith.constant dense<0.000000e+00> : vector<2x50xf32>
    %392 = tpu.matmul %389, %391, %cst_307 {dimension_numbers = #tpu.dot_dimension_numbers<[1], [0], [0], [1], [0, 0, 1, 1], [], []>} : vector<2x512xbf16>, vector<512x50xbf16>, vector<2x50xf32> -> vector<2x50xf32>
    %c3_308 = arith.constant 3 : index
    %c0_309 = arith.constant 0 : index
    %c0_310 = arith.constant 0 : index
    %393 = vector.load %arg4[%c3_308, %c0_309, %c0_310] : memref<8x1x50xf32, #tpu.memory_space<vmem>>, vector<1x1x50xf32>
    %394 = vector.shape_cast %393 : vector<1x1x50xf32> to vector<1x50xf32>
    %395 = vector.broadcast %394 : vector<1x50xf32> to vector<2x50xf32>
    %396 = arith.addf %392, %395 : vector<2x50xf32>
    %cst_311 = arith.constant 0.000000e+00 : f32
    %397 = vector.broadcast %cst_311 : f32 to vector<2x50xf32>
    %398 = arith.maximumf %396, %397 : vector<2x50xf32>
    %c0_312 = arith.constant 0 : index
    %c3_313 = arith.constant 3 : index
    %c7_314 = arith.constant 7 : index
    %399 = vector.load %arg15[%c0_312, %c3_313, %c7_314] : memref<2x8x57xf32, #tpu.memory_space<vmem>>, vector<2x1x50xf32>
    %400 = vector.shape_cast %399 : vector<2x1x50xf32> to vector<2x50xf32>
    %401 = vector.shape_cast %398 : vector<2x50xf32> to vector<2x1x50xf32>
    tpu.vector_store %arg15[%c0_312, %c3_313, %c7_314], %401 {strides = array<i32>} : memref<2x8x57xf32, #tpu.memory_space<vmem>>, vector<2x1x50xf32>,
    %c8_315 = arith.constant 8 : index
    %c0_316 = arith.constant 0 : index
    %402 = vector.load %arg14[%c8_315, %c0_316] : memref<16x512xf32, #tpu.memory_space<vmem>>, vector<2x512xf32>
    %403 = arith.truncf %402 : vector<2x512xf32> to vector<2x512xbf16>
    %c4_317 = arith.constant 4 : index
    %c0_318 = arith.constant 0 : index
    %c0_319 = arith.constant 0 : index
    %404 = vector.load %arg3[%c4_317, %c0_318, %c0_319] : memref<8x512x50xbf16, #tpu.memory_space<vmem>>, vector<1x512x50xbf16>
    %405 = vector.shape_cast %404 : vector<1x512x50xbf16> to vector<512x50xbf16>
    %cst_320 = arith.constant dense<0.000000e+00> : vector<2x50xf32>
    %406 = tpu.matmul %403, %405, %cst_320 {dimension_numbers = #tpu.dot_dimension_numbers<[1], [0], [0], [1], [0, 0, 1, 1], [], []>} : vector<2x512xbf16>, vector<512x50xbf16>, vector<2x50xf32> -> vector<2x50xf32>
    %c4_321 = arith.constant 4 : index
    %c0_322 = arith.constant 0 : index
    %c0_323 = arith.constant 0 : index
    %407 = vector.load %arg4[%c4_321, %c0_322, %c0_323] : memref<8x1x50xf32, #tpu.memory_space<vmem>>, vector<1x1x50xf32>
    %408 = vector.shape_cast %407 : vector<1x1x50xf32> to vector<1x50xf32>
    %409 = vector.broadcast %408 : vector<1x50xf32> to vector<2x50xf32>
    %410 = arith.addf %406, %409 : vector<2x50xf32>
    %cst_324 = arith.constant 0.000000e+00 : f32
    %411 = vector.broadcast %cst_324 : f32 to vector<2x50xf32>
    %412 = arith.maximumf %410, %411 : vector<2x50xf32>
    %c0_325 = arith.constant 0 : index
    %c4_326 = arith.constant 4 : index
    %c7_327 = arith.constant 7 : index
    %413 = vector.load %arg15[%c0_325, %c4_326, %c7_327] : memref<2x8x57xf32, #tpu.memory_space<vmem>>, vector<2x1x50xf32>
    %414 = vector.shape_cast %413 : vector<2x1x50xf32> to vector<2x50xf32>
    %415 = vector.shape_cast %412 : vector<2x50xf32> to vector<2x1x50xf32>
    tpu.vector_store %arg15[%c0_325, %c4_326, %c7_327], %415 {strides = array<i32>} : memref<2x8x57xf32, #tpu.memory_space<vmem>>, vector<2x1x50xf32>,
    %c10_328 = arith.constant 10 : index
    %c0_329 = arith.constant 0 : index
    %416 = vector.load %arg14[%c10_328, %c0_329] : memref<16x512xf32, #tpu.memory_space<vmem>>, vector<2x512xf32>
    %417 = arith.truncf %416 : vector<2x512xf32> to vector<2x512xbf16>
    %c5_330 = arith.constant 5 : index
    %c0_331 = arith.constant 0 : index
    %c0_332 = arith.constant 0 : index
    %418 = vector.load %arg3[%c5_330, %c0_331, %c0_332] : memref<8x512x50xbf16, #tpu.memory_space<vmem>>, vector<1x512x50xbf16>
    %419 = vector.shape_cast %418 : vector<1x512x50xbf16> to vector<512x50xbf16>
    %cst_333 = arith.constant dense<0.000000e+00> : vector<2x50xf32>
    %420 = tpu.matmul %417, %419, %cst_333 {dimension_numbers = #tpu.dot_dimension_numbers<[1], [0], [0], [1], [0, 0, 1, 1], [], []>} : vector<2x512xbf16>, vector<512x50xbf16>, vector<2x50xf32> -> vector<2x50xf32>
    %c5_334 = arith.constant 5 : index
    %c0_335 = arith.constant 0 : index
    %c0_336 = arith.constant 0 : index
    %421 = vector.load %arg4[%c5_334, %c0_335, %c0_336] : memref<8x1x50xf32, #tpu.memory_space<vmem>>, vector<1x1x50xf32>
    %422 = vector.shape_cast %421 : vector<1x1x50xf32> to vector<1x50xf32>
    %423 = vector.broadcast %422 : vector<1x50xf32> to vector<2x50xf32>
    %424 = arith.addf %420, %423 : vector<2x50xf32>
    %cst_337 = arith.constant 0.000000e+00 : f32
    %425 = vector.broadcast %cst_337 : f32 to vector<2x50xf32>
    %426 = arith.maximumf %424, %425 : vector<2x50xf32>
    %c0_338 = arith.constant 0 : index
    %c5_339 = arith.constant 5 : index
    %c7_340 = arith.constant 7 : index
    %427 = vector.load %arg15[%c0_338, %c5_339, %c7_340] : memref<2x8x57xf32, #tpu.memory_space<vmem>>, vector<2x1x50xf32>
    %428 = vector.shape_cast %427 : vector<2x1x50xf32> to vector<2x50xf32>
    %429 = vector.shape_cast %426 : vector<2x50xf32> to vector<2x1x50xf32>
    tpu.vector_store %arg15[%c0_338, %c5_339, %c7_340], %429 {strides = array<i32>} : memref<2x8x57xf32, #tpu.memory_space<vmem>>, vector<2x1x50xf32>,
    %c12_341 = arith.constant 12 : index
    %c0_342 = arith.constant 0 : index
    %430 = vector.load %arg14[%c12_341, %c0_342] : memref<16x512xf32, #tpu.memory_space<vmem>>, vector<2x512xf32>
    %431 = arith.truncf %430 : vector<2x512xf32> to vector<2x512xbf16>
    %c6_343 = arith.constant 6 : index
    %c0_344 = arith.constant 0 : index
    %c0_345 = arith.constant 0 : index
    %432 = vector.load %arg3[%c6_343, %c0_344, %c0_345] : memref<8x512x50xbf16, #tpu.memory_space<vmem>>, vector<1x512x50xbf16>
    %433 = vector.shape_cast %432 : vector<1x512x50xbf16> to vector<512x50xbf16>
    %cst_346 = arith.constant dense<0.000000e+00> : vector<2x50xf32>
    %434 = tpu.matmul %431, %433, %cst_346 {dimension_numbers = #tpu.dot_dimension_numbers<[1], [0], [0], [1], [0, 0, 1, 1], [], []>} : vector<2x512xbf16>, vector<512x50xbf16>, vector<2x50xf32> -> vector<2x50xf32>
    %c6_347 = arith.constant 6 : index
    %c0_348 = arith.constant 0 : index
    %c0_349 = arith.constant 0 : index
    %435 = vector.load %arg4[%c6_347, %c0_348, %c0_349] : memref<8x1x50xf32, #tpu.memory_space<vmem>>, vector<1x1x50xf32>
    %436 = vector.shape_cast %435 : vector<1x1x50xf32> to vector<1x50xf32>
    %437 = vector.broadcast %436 : vector<1x50xf32> to vector<2x50xf32>
    %438 = arith.addf %434, %437 : vector<2x50xf32>
    %cst_350 = arith.constant 0.000000e+00 : f32
    %439 = vector.broadcast %cst_350 : f32 to vector<2x50xf32>
    %440 = arith.maximumf %438, %439 : vector<2x50xf32>
    %c0_351 = arith.constant 0 : index
    %c6_352 = arith.constant 6 : index
    %c7_353 = arith.constant 7 : index
    %441 = vector.load %arg15[%c0_351, %c6_352, %c7_353] : memref<2x8x57xf32, #tpu.memory_space<vmem>>, vector<2x1x50xf32>
    %442 = vector.shape_cast %441 : vector<2x1x50xf32> to vector<2x50xf32>
    %443 = vector.shape_cast %440 : vector<2x50xf32> to vector<2x1x50xf32>
    tpu.vector_store %arg15[%c0_351, %c6_352, %c7_353], %443 {strides = array<i32>} : memref<2x8x57xf32, #tpu.memory_space<vmem>>, vector<2x1x50xf32>,
    %c14_354 = arith.constant 14 : index
    %c0_355 = arith.constant 0 : index
    %444 = vector.load %arg14[%c14_354, %c0_355] : memref<16x512xf32, #tpu.memory_space<vmem>>, vector<2x512xf32>
    %445 = arith.truncf %444 : vector<2x512xf32> to vector<2x512xbf16>
    %c7_356 = arith.constant 7 : index
    %c0_357 = arith.constant 0 : index
    %c0_358 = arith.constant 0 : index
    %446 = vector.load %arg3[%c7_356, %c0_357, %c0_358] : memref<8x512x50xbf16, #tpu.memory_space<vmem>>, vector<1x512x50xbf16>
    %447 = vector.shape_cast %446 : vector<1x512x50xbf16> to vector<512x50xbf16>
    %cst_359 = arith.constant dense<0.000000e+00> : vector<2x50xf32>
    %448 = tpu.matmul %445, %447, %cst_359 {dimension_numbers = #tpu.dot_dimension_numbers<[1], [0], [0], [1], [0, 0, 1, 1], [], []>} : vector<2x512xbf16>, vector<512x50xbf16>, vector<2x50xf32> -> vector<2x50xf32>
    %c7_360 = arith.constant 7 : index
    %c0_361 = arith.constant 0 : index
    %c0_362 = arith.constant 0 : index
    %449 = vector.load %arg4[%c7_360, %c0_361, %c0_362] : memref<8x1x50xf32, #tpu.memory_space<vmem>>, vector<1x1x50xf32>
    %450 = vector.shape_cast %449 : vector<1x1x50xf32> to vector<1x50xf32>
    %451 = vector.broadcast %450 : vector<1x50xf32> to vector<2x50xf32>
    %452 = arith.addf %448, %451 : vector<2x50xf32>
    %cst_363 = arith.constant 0.000000e+00 : f32
    %453 = vector.broadcast %cst_363 : f32 to vector<2x50xf32>
    %454 = arith.maximumf %452, %453 : vector<2x50xf32>
    %c0_364 = arith.constant 0 : index
    %c7_365 = arith.constant 7 : index
    %c7_366 = arith.constant 7 : index
    %455 = vector.load %arg15[%c0_364, %c7_365, %c7_366] : memref<2x8x57xf32, #tpu.memory_space<vmem>>, vector<2x1x50xf32>
    %456 = vector.shape_cast %455 : vector<2x1x50xf32> to vector<2x50xf32>
    %457 = vector.shape_cast %454 : vector<2x50xf32> to vector<2x1x50xf32>
    tpu.vector_store %arg15[%c0_364, %c7_365, %c7_366], %457 {strides = array<i32>} : memref<2x8x57xf32, #tpu.memory_space<vmem>>, vector<2x1x50xf32>,
    %c0_367 = arith.constant 0 : index
    %c0_368 = arith.constant 0 : index
    %c0_369 = arith.constant 0 : index
    %458 = vector.load %arg15[%c0_367, %c0_368, %c0_369] : memref<2x8x57xf32, #tpu.memory_space<vmem>>, vector<2x8x50xf32>
    %c0_370 = arith.constant 0 : index
    %c0_371 = arith.constant 0 : index
    %c0_372 = arith.constant 0 : index
    %459 = vector.load %arg16[%c0_370, %c0_371, %c0_372] : memref<2x64x50xf32, #tpu.memory_space<vmem>>, vector<2x8x50xf32>
    tpu.vector_store %arg16[%c0_370, %c0_371, %c0_372], %458 {strides = array<i32>} : memref<2x64x50xf32, #tpu.memory_space<vmem>>, vector<2x8x50xf32>,
    %c0_373 = arith.constant 0 : index
    %c0_374 = arith.constant 0 : index
    %c1_375 = arith.constant 1 : index
    %460 = vector.load %arg15[%c0_373, %c0_374, %c1_375] : memref<2x8x57xf32, #tpu.memory_space<vmem>>, vector<2x8x50xf32>
    %c0_376 = arith.constant 0 : index
    %c8_377 = arith.constant 8 : index
    %c0_378 = arith.constant 0 : index
    %461 = vector.load %arg16[%c0_376, %c8_377, %c0_378] : memref<2x64x50xf32, #tpu.memory_space<vmem>>, vector<2x8x50xf32>
    tpu.vector_store %arg16[%c0_376, %c8_377, %c0_378], %460 {strides = array<i32>} : memref<2x64x50xf32, #tpu.memory_space<vmem>>, vector<2x8x50xf32>,
    %c0_379 = arith.constant 0 : index
    %c0_380 = arith.constant 0 : index
    %c2_381 = arith.constant 2 : index
    %462 = vector.load %arg15[%c0_379, %c0_380, %c2_381] : memref<2x8x57xf32, #tpu.memory_space<vmem>>, vector<2x8x50xf32>
    %c0_382 = arith.constant 0 : index
    %c16 = arith.constant 16 : index
    %c0_383 = arith.constant 0 : index
    %463 = vector.load %arg16[%c0_382, %c16, %c0_383] : memref<2x64x50xf32, #tpu.memory_space<vmem>>, vector<2x8x50xf32>
    tpu.vector_store %arg16[%c0_382, %c16, %c0_383], %462 {strides = array<i32>} : memref<2x64x50xf32, #tpu.memory_space<vmem>>, vector<2x8x50xf32>,
    %c0_384 = arith.constant 0 : index
    %c0_385 = arith.constant 0 : index
    %c3_386 = arith.constant 3 : index
    %464 = vector.load %arg15[%c0_384, %c0_385, %c3_386] : memref<2x8x57xf32, #tpu.memory_space<vmem>>, vector<2x8x50xf32>
    %c0_387 = arith.constant 0 : index
    %c24 = arith.constant 24 : index
    %c0_388 = arith.constant 0 : index
    %465 = vector.load %arg16[%c0_387, %c24, %c0_388] : memref<2x64x50xf32, #tpu.memory_space<vmem>>, vector<2x8x50xf32>
    tpu.vector_store %arg16[%c0_387, %c24, %c0_388], %464 {strides = array<i32>} : memref<2x64x50xf32, #tpu.memory_space<vmem>>, vector<2x8x50xf32>,
    %c0_389 = arith.constant 0 : index
    %c0_390 = arith.constant 0 : index
    %c4_391 = arith.constant 4 : index
    %466 = vector.load %arg15[%c0_389, %c0_390, %c4_391] : memref<2x8x57xf32, #tpu.memory_space<vmem>>, vector<2x8x50xf32>
    %c0_392 = arith.constant 0 : index
    %c32 = arith.constant 32 : index
    %c0_393 = arith.constant 0 : index
    %467 = vector.load %arg16[%c0_392, %c32, %c0_393] : memref<2x64x50xf32, #tpu.memory_space<vmem>>, vector<2x8x50xf32>
    tpu.vector_store %arg16[%c0_392, %c32, %c0_393], %466 {strides = array<i32>} : memref<2x64x50xf32, #tpu.memory_space<vmem>>, vector<2x8x50xf32>,
    %c0_394 = arith.constant 0 : index
    %c0_395 = arith.constant 0 : index
    %c5_396 = arith.constant 5 : index
    %468 = vector.load %arg15[%c0_394, %c0_395, %c5_396] : memref<2x8x57xf32, #tpu.memory_space<vmem>>, vector<2x8x50xf32>
    %c0_397 = arith.constant 0 : index
    %c40 = arith.constant 40 : index
    %c0_398 = arith.constant 0 : index
    %469 = vector.load %arg16[%c0_397, %c40, %c0_398] : memref<2x64x50xf32, #tpu.memory_space<vmem>>, vector<2x8x50xf32>
    tpu.vector_store %arg16[%c0_397, %c40, %c0_398], %468 {strides = array<i32>} : memref<2x64x50xf32, #tpu.memory_space<vmem>>, vector<2x8x50xf32>,
    %c0_399 = arith.constant 0 : index
    %c0_400 = arith.constant 0 : index
    %c6_401 = arith.constant 6 : index
    %470 = vector.load %arg15[%c0_399, %c0_400, %c6_401] : memref<2x8x57xf32, #tpu.memory_space<vmem>>, vector<2x8x50xf32>
    %c0_402 = arith.constant 0 : index
    %c48 = arith.constant 48 : index
    %c0_403 = arith.constant 0 : index
    %471 = vector.load %arg16[%c0_402, %c48, %c0_403] : memref<2x64x50xf32, #tpu.memory_space<vmem>>, vector<2x8x50xf32>
    tpu.vector_store %arg16[%c0_402, %c48, %c0_403], %470 {strides = array<i32>} : memref<2x64x50xf32, #tpu.memory_space<vmem>>, vector<2x8x50xf32>,
    %c0_404 = arith.constant 0 : index
    %c0_405 = arith.constant 0 : index
    %c7_406 = arith.constant 7 : index
    %472 = vector.load %arg15[%c0_404, %c0_405, %c7_406] : memref<2x8x57xf32, #tpu.memory_space<vmem>>, vector<2x8x50xf32>
    %c0_407 = arith.constant 0 : index
    %c56 = arith.constant 56 : index
    %c0_408 = arith.constant 0 : index
    %473 = vector.load %arg16[%c0_407, %c56, %c0_408] : memref<2x64x50xf32, #tpu.memory_space<vmem>>, vector<2x8x50xf32>
    tpu.vector_store %arg16[%c0_407, %c56, %c0_408], %472 {strides = array<i32>} : memref<2x64x50xf32, #tpu.memory_space<vmem>>, vector<2x8x50xf32>,
    %cst_409 = arith.constant 0.000000e+00 : f32
    %474 = vector.broadcast %cst_409 : f32 to vector<2x16x7xf32>
    %c0_410 = arith.constant 0 : index
    %c0_411 = arith.constant 0 : index
    %c0_412 = arith.constant 0 : index
    %475 = vector.load %arg17[%c0_410, %c0_411, %c0_412] : memref<2x16x57xf32, #tpu.memory_space<vmem>>, vector<2x16x7xf32>
    tpu.vector_store %arg17[%c0_410, %c0_411, %c0_412], %474 {strides = array<i32>} : memref<2x16x57xf32, #tpu.memory_space<vmem>>, vector<2x16x7xf32>,
    %c0_413 = arith.constant 0 : index
    %c0_414 = arith.constant 0 : index
    %476 = vector.load %arg5[%c0_413, %c0_414] : memref<16x64xbf16, #tpu.memory_space<vmem>>, vector<16x64xbf16>
    %c0_415 = arith.constant 0 : index
    %c0_416 = arith.constant 0 : index
    %c0_417 = arith.constant 0 : index
    %477 = vector.load %arg16[%c0_415, %c0_416, %c0_417] : memref<2x64x50xf32, #tpu.memory_space<vmem>>, vector<1x64x50xf32>
    %478 = vector.shape_cast %477 : vector<1x64x50xf32> to vector<64x50xf32>
    %cst_418 = arith.constant dense<0.000000e+00> : vector<16x50xf32>
    %479 = tpu.matmul %476, %478, %cst_418 {dimension_numbers = #tpu.dot_dimension_numbers<[1], [0], [0], [1], [0, 0, 1, 1], [], []>} : vector<16x64xbf16>, vector<64x50xf32>, vector<16x50xf32> -> vector<16x50xf32>
    %c0_419 = arith.constant 0 : index
    %c0_420 = arith.constant 0 : index
    %480 = vector.load %arg6[%c0_419, %c0_420] : memref<16x1xf32, #tpu.memory_space<vmem>>, vector<16x1xf32>
    %481 = vector.broadcast %480 : vector<16x1xf32> to vector<16x50xf32>
    %482 = arith.addf %479, %481 : vector<16x50xf32>
    %cst_421 = arith.constant 0.000000e+00 : f32
    %483 = vector.broadcast %cst_421 : f32 to vector<16x50xf32>
    %484 = arith.maximumf %482, %483 : vector<16x50xf32>
    %c0_422 = arith.constant 0 : index
    %c0_423 = arith.constant 0 : index
    %c7_424 = arith.constant 7 : index
    %485 = vector.load %arg17[%c0_422, %c0_423, %c7_424] : memref<2x16x57xf32, #tpu.memory_space<vmem>>, vector<1x16x50xf32>
    %486 = vector.shape_cast %485 : vector<1x16x50xf32> to vector<16x50xf32>
    %487 = vector.shape_cast %484 : vector<16x50xf32> to vector<1x16x50xf32>
    tpu.vector_store %arg17[%c0_422, %c0_423, %c7_424], %487 {strides = array<i32>} : memref<2x16x57xf32, #tpu.memory_space<vmem>>, vector<1x16x50xf32>,
    %c0_425 = arith.constant 0 : index
    %c0_426 = arith.constant 0 : index
    %488 = vector.load %arg5[%c0_425, %c0_426] : memref<16x64xbf16, #tpu.memory_space<vmem>>, vector<16x64xbf16>
    %c1_427 = arith.constant 1 : index
    %c0_428 = arith.constant 0 : index
    %c0_429 = arith.constant 0 : index
    %489 = vector.load %arg16[%c1_427, %c0_428, %c0_429] : memref<2x64x50xf32, #tpu.memory_space<vmem>>, vector<1x64x50xf32>
    %490 = vector.shape_cast %489 : vector<1x64x50xf32> to vector<64x50xf32>
    %cst_430 = arith.constant dense<0.000000e+00> : vector<16x50xf32>
    %491 = tpu.matmul %488, %490, %cst_430 {dimension_numbers = #tpu.dot_dimension_numbers<[1], [0], [0], [1], [0, 0, 1, 1], [], []>} : vector<16x64xbf16>, vector<64x50xf32>, vector<16x50xf32> -> vector<16x50xf32>
    %c0_431 = arith.constant 0 : index
    %c0_432 = arith.constant 0 : index
    %492 = vector.load %arg6[%c0_431, %c0_432] : memref<16x1xf32, #tpu.memory_space<vmem>>, vector<16x1xf32>
    %493 = vector.broadcast %492 : vector<16x1xf32> to vector<16x50xf32>
    %494 = arith.addf %491, %493 : vector<16x50xf32>
    %cst_433 = arith.constant 0.000000e+00 : f32
    %495 = vector.broadcast %cst_433 : f32 to vector<16x50xf32>
    %496 = arith.maximumf %494, %495 : vector<16x50xf32>
    %c1_434 = arith.constant 1 : index
    %c0_435 = arith.constant 0 : index
    %c7_436 = arith.constant 7 : index
    %497 = vector.load %arg17[%c1_434, %c0_435, %c7_436] : memref<2x16x57xf32, #tpu.memory_space<vmem>>, vector<1x16x50xf32>
    %498 = vector.shape_cast %497 : vector<1x16x50xf32> to vector<16x50xf32>
    %499 = vector.shape_cast %496 : vector<16x50xf32> to vector<1x16x50xf32>
    tpu.vector_store %arg17[%c1_434, %c0_435, %c7_436], %499 {strides = array<i32>} : memref<2x16x57xf32, #tpu.memory_space<vmem>>, vector<1x16x50xf32>,
    %c0_437 = arith.constant 0 : index
    %c0_438 = arith.constant 0 : index
    %c0_439 = arith.constant 0 : index
    %500 = vector.load %arg17[%c0_437, %c0_438, %c0_439] : memref<2x16x57xf32, #tpu.memory_space<vmem>>, vector<2x16x50xf32>
    %c0_440 = arith.constant 0 : index
    %c0_441 = arith.constant 0 : index
    %c0_442 = arith.constant 0 : index
    %501 = vector.load %arg18[%c0_440, %c0_441, %c0_442] : memref<2x128x50xf32, #tpu.memory_space<vmem>>, vector<2x16x50xf32>
    tpu.vector_store %arg18[%c0_440, %c0_441, %c0_442], %500 {strides = array<i32>} : memref<2x128x50xf32, #tpu.memory_space<vmem>>, vector<2x16x50xf32>,
    %c0_443 = arith.constant 0 : index
    %c0_444 = arith.constant 0 : index
    %c1_445 = arith.constant 1 : index
    %502 = vector.load %arg17[%c0_443, %c0_444, %c1_445] : memref<2x16x57xf32, #tpu.memory_space<vmem>>, vector<2x16x50xf32>
    %c0_446 = arith.constant 0 : index
    %c16_447 = arith.constant 16 : index
    %c0_448 = arith.constant 0 : index
    %503 = vector.load %arg18[%c0_446, %c16_447, %c0_448] : memref<2x128x50xf32, #tpu.memory_space<vmem>>, vector<2x16x50xf32>
    tpu.vector_store %arg18[%c0_446, %c16_447, %c0_448], %502 {strides = array<i32>} : memref<2x128x50xf32, #tpu.memory_space<vmem>>, vector<2x16x50xf32>,
    %c0_449 = arith.constant 0 : index
    %c0_450 = arith.constant 0 : index
    %c2_451 = arith.constant 2 : index
    %504 = vector.load %arg17[%c0_449, %c0_450, %c2_451] : memref<2x16x57xf32, #tpu.memory_space<vmem>>, vector<2x16x50xf32>
    %c0_452 = arith.constant 0 : index
    %c32_453 = arith.constant 32 : index
    %c0_454 = arith.constant 0 : index
    %505 = vector.load %arg18[%c0_452, %c32_453, %c0_454] : memref<2x128x50xf32, #tpu.memory_space<vmem>>, vector<2x16x50xf32>
    tpu.vector_store %arg18[%c0_452, %c32_453, %c0_454], %504 {strides = array<i32>} : memref<2x128x50xf32, #tpu.memory_space<vmem>>, vector<2x16x50xf32>,
    %c0_455 = arith.constant 0 : index
    %c0_456 = arith.constant 0 : index
    %c3_457 = arith.constant 3 : index
    %506 = vector.load %arg17[%c0_455, %c0_456, %c3_457] : memref<2x16x57xf32, #tpu.memory_space<vmem>>, vector<2x16x50xf32>
    %c0_458 = arith.constant 0 : index
    %c48_459 = arith.constant 48 : index
    %c0_460 = arith.constant 0 : index
    %507 = vector.load %arg18[%c0_458, %c48_459, %c0_460] : memref<2x128x50xf32, #tpu.memory_space<vmem>>, vector<2x16x50xf32>
    tpu.vector_store %arg18[%c0_458, %c48_459, %c0_460], %506 {strides = array<i32>} : memref<2x128x50xf32, #tpu.memory_space<vmem>>, vector<2x16x50xf32>,
    %c0_461 = arith.constant 0 : index
    %c0_462 = arith.constant 0 : index
    %c4_463 = arith.constant 4 : index
    %508 = vector.load %arg17[%c0_461, %c0_462, %c4_463] : memref<2x16x57xf32, #tpu.memory_space<vmem>>, vector<2x16x50xf32>
    %c0_464 = arith.constant 0 : index
    %c64_465 = arith.constant 64 : index
    %c0_466 = arith.constant 0 : index
    %509 = vector.load %arg18[%c0_464, %c64_465, %c0_466] : memref<2x128x50xf32, #tpu.memory_space<vmem>>, vector<2x16x50xf32>
    tpu.vector_store %arg18[%c0_464, %c64_465, %c0_466], %508 {strides = array<i32>} : memref<2x128x50xf32, #tpu.memory_space<vmem>>, vector<2x16x50xf32>,
    %c0_467 = arith.constant 0 : index
    %c0_468 = arith.constant 0 : index
    %c5_469 = arith.constant 5 : index
    %510 = vector.load %arg17[%c0_467, %c0_468, %c5_469] : memref<2x16x57xf32, #tpu.memory_space<vmem>>, vector<2x16x50xf32>
    %c0_470 = arith.constant 0 : index
    %c80 = arith.constant 80 : index
    %c0_471 = arith.constant 0 : index
    %511 = vector.load %arg18[%c0_470, %c80, %c0_471] : memref<2x128x50xf32, #tpu.memory_space<vmem>>, vector<2x16x50xf32>
    tpu.vector_store %arg18[%c0_470, %c80, %c0_471], %510 {strides = array<i32>} : memref<2x128x50xf32, #tpu.memory_space<vmem>>, vector<2x16x50xf32>,
    %c0_472 = arith.constant 0 : index
    %c0_473 = arith.constant 0 : index
    %c6_474 = arith.constant 6 : index
    %512 = vector.load %arg17[%c0_472, %c0_473, %c6_474] : memref<2x16x57xf32, #tpu.memory_space<vmem>>, vector<2x16x50xf32>
    %c0_475 = arith.constant 0 : index
    %c96 = arith.constant 96 : index
    %c0_476 = arith.constant 0 : index
    %513 = vector.load %arg18[%c0_475, %c96, %c0_476] : memref<2x128x50xf32, #tpu.memory_space<vmem>>, vector<2x16x50xf32>
    tpu.vector_store %arg18[%c0_475, %c96, %c0_476], %512 {strides = array<i32>} : memref<2x128x50xf32, #tpu.memory_space<vmem>>, vector<2x16x50xf32>,
    %c0_477 = arith.constant 0 : index
    %c0_478 = arith.constant 0 : index
    %c7_479 = arith.constant 7 : index
    %514 = vector.load %arg17[%c0_477, %c0_478, %c7_479] : memref<2x16x57xf32, #tpu.memory_space<vmem>>, vector<2x16x50xf32>
    %c0_480 = arith.constant 0 : index
    %c112 = arith.constant 112 : index
    %c0_481 = arith.constant 0 : index
    %515 = vector.load %arg18[%c0_480, %c112, %c0_481] : memref<2x128x50xf32, #tpu.memory_space<vmem>>, vector<2x16x50xf32>
    tpu.vector_store %arg18[%c0_480, %c112, %c0_481], %514 {strides = array<i32>} : memref<2x128x50xf32, #tpu.memory_space<vmem>>, vector<2x16x50xf32>,
    %c0_482 = arith.constant 0 : index
    %c0_483 = arith.constant 0 : index
    %516 = vector.load %arg7[%c0_482, %c0_483] : memref<16x128xbf16, #tpu.memory_space<vmem>>, vector<16x128xbf16>
    %c0_484 = arith.constant 0 : index
    %c0_485 = arith.constant 0 : index
    %c0_486 = arith.constant 0 : index
    %517 = vector.load %arg18[%c0_484, %c0_485, %c0_486] : memref<2x128x50xf32, #tpu.memory_space<vmem>>, vector<1x128x50xf32>
    %518 = vector.shape_cast %517 : vector<1x128x50xf32> to vector<128x50xf32>
    %cst_487 = arith.constant dense<0.000000e+00> : vector<16x50xf32>
    %519 = tpu.matmul %516, %518, %cst_487 {dimension_numbers = #tpu.dot_dimension_numbers<[1], [0], [0], [1], [0, 0, 1, 1], [], []>} : vector<16x128xbf16>, vector<128x50xf32>, vector<16x50xf32> -> vector<16x50xf32>
    %c0_488 = arith.constant 0 : index
    %c0_489 = arith.constant 0 : index
    %520 = vector.load %arg8[%c0_488, %c0_489] : memref<16x1xf32, #tpu.memory_space<vmem>>, vector<16x1xf32>
    %521 = vector.broadcast %520 : vector<16x1xf32> to vector<16x50xf32>
    %522 = arith.addf %519, %521 : vector<16x50xf32>
    %cst_490 = arith.constant 0.000000e+00 : f32
    %523 = vector.broadcast %cst_490 : f32 to vector<16x50xf32>
    %524 = arith.maximumf %522, %523 : vector<16x50xf32>
    %c0_491 = arith.constant 0 : index
    %c0_492 = arith.constant 0 : index
    %525 = vector.load %arg9[%c0_491, %c0_492] : memref<16x8xbf16, #tpu.memory_space<vmem>>, vector<16x8xbf16>
    %c0_493 = arith.constant 0 : index
    %c0_494 = arith.constant 0 : index
    %c7_495 = arith.constant 7 : index
    %526 = vector.load %arg15[%c0_493, %c0_494, %c7_495] : memref<2x8x57xf32, #tpu.memory_space<vmem>>, vector<1x8x50xf32>
    %527 = vector.shape_cast %526 : vector<1x8x50xf32> to vector<8x50xf32>
    %cst_496 = arith.constant dense<0.000000e+00> : vector<16x50xf32>
    %528 = tpu.matmul %525, %527, %cst_496 {dimension_numbers = #tpu.dot_dimension_numbers<[1], [0], [0], [1], [0, 0, 1, 1], [], []>} : vector<16x8xbf16>, vector<8x50xf32>, vector<16x50xf32> -> vector<16x50xf32>
    %c0_497 = arith.constant 0 : index
    %c0_498 = arith.constant 0 : index
    %529 = vector.load %arg10[%c0_497, %c0_498] : memref<16x1xf32, #tpu.memory_space<vmem>>, vector<16x1xf32>
    %530 = vector.broadcast %529 : vector<16x1xf32> to vector<16x50xf32>
    %531 = arith.addf %528, %530 : vector<16x50xf32>
    %532 = arith.addf %524, %531 : vector<16x50xf32>
    %cst_499 = arith.constant 0.000000e+00 : f32
    %533 = vector.broadcast %cst_499 : f32 to vector<16x50xf32>
    %534 = arith.maximumf %532, %533 : vector<16x50xf32>
    %c0_500 = arith.constant 0 : index
    %c0_501 = arith.constant 0 : index
    %c0_502 = arith.constant 0 : index
    %535 = vector.load %arg19[%c0_500, %c0_501, %c0_502] : memref<2x16x50xf32, #tpu.memory_space<vmem>>, vector<1x16x50xf32>
    %536 = vector.shape_cast %535 : vector<1x16x50xf32> to vector<16x50xf32>
    %537 = vector.shape_cast %534 : vector<16x50xf32> to vector<1x16x50xf32>
    tpu.vector_store %arg19[%c0_500, %c0_501, %c0_502], %537 {strides = array<i32>} : memref<2x16x50xf32, #tpu.memory_space<vmem>>, vector<1x16x50xf32>,
    %c0_503 = arith.constant 0 : index
    %c0_504 = arith.constant 0 : index
    %538 = vector.load %arg7[%c0_503, %c0_504] : memref<16x128xbf16, #tpu.memory_space<vmem>>, vector<16x128xbf16>
    %c1_505 = arith.constant 1 : index
    %c0_506 = arith.constant 0 : index
    %c0_507 = arith.constant 0 : index
    %539 = vector.load %arg18[%c1_505, %c0_506, %c0_507] : memref<2x128x50xf32, #tpu.memory_space<vmem>>, vector<1x128x50xf32>
    %540 = vector.shape_cast %539 : vector<1x128x50xf32> to vector<128x50xf32>
    %cst_508 = arith.constant dense<0.000000e+00> : vector<16x50xf32>
    %541 = tpu.matmul %538, %540, %cst_508 {dimension_numbers = #tpu.dot_dimension_numbers<[1], [0], [0], [1], [0, 0, 1, 1], [], []>} : vector<16x128xbf16>, vector<128x50xf32>, vector<16x50xf32> -> vector<16x50xf32>
    %c0_509 = arith.constant 0 : index
    %c0_510 = arith.constant 0 : index
    %542 = vector.load %arg8[%c0_509, %c0_510] : memref<16x1xf32, #tpu.memory_space<vmem>>, vector<16x1xf32>
    %543 = vector.broadcast %542 : vector<16x1xf32> to vector<16x50xf32>
    %544 = arith.addf %541, %543 : vector<16x50xf32>
    %cst_511 = arith.constant 0.000000e+00 : f32
    %545 = vector.broadcast %cst_511 : f32 to vector<16x50xf32>
    %546 = arith.maximumf %544, %545 : vector<16x50xf32>
    %c0_512 = arith.constant 0 : index
    %c0_513 = arith.constant 0 : index
    %547 = vector.load %arg9[%c0_512, %c0_513] : memref<16x8xbf16, #tpu.memory_space<vmem>>, vector<16x8xbf16>
    %c1_514 = arith.constant 1 : index
    %c0_515 = arith.constant 0 : index
    %c7_516 = arith.constant 7 : index
    %548 = vector.load %arg15[%c1_514, %c0_515, %c7_516] : memref<2x8x57xf32, #tpu.memory_space<vmem>>, vector<1x8x50xf32>
    %549 = vector.shape_cast %548 : vector<1x8x50xf32> to vector<8x50xf32>
    %cst_517 = arith.constant dense<0.000000e+00> : vector<16x50xf32>
    %550 = tpu.matmul %547, %549, %cst_517 {dimension_numbers = #tpu.dot_dimension_numbers<[1], [0], [0], [1], [0, 0, 1, 1], [], []>} : vector<16x8xbf16>, vector<8x50xf32>, vector<16x50xf32> -> vector<16x50xf32>
    %c0_518 = arith.constant 0 : index
    %c0_519 = arith.constant 0 : index
    %551 = vector.load %arg10[%c0_518, %c0_519] : memref<16x1xf32, #tpu.memory_space<vmem>>, vector<16x1xf32>
    %552 = vector.broadcast %551 : vector<16x1xf32> to vector<16x50xf32>
    %553 = arith.addf %550, %552 : vector<16x50xf32>
    %554 = arith.addf %546, %553 : vector<16x50xf32>
    %cst_520 = arith.constant 0.000000e+00 : f32
    %555 = vector.broadcast %cst_520 : f32 to vector<16x50xf32>
    %556 = arith.maximumf %554, %555 : vector<16x50xf32>
    %c1_521 = arith.constant 1 : index
    %c0_522 = arith.constant 0 : index
    %c0_523 = arith.constant 0 : index
    %557 = vector.load %arg19[%c1_521, %c0_522, %c0_523] : memref<2x16x50xf32, #tpu.memory_space<vmem>>, vector<1x16x50xf32>
    %558 = vector.shape_cast %557 : vector<1x16x50xf32> to vector<16x50xf32>
    %559 = vector.shape_cast %556 : vector<16x50xf32> to vector<1x16x50xf32>
    tpu.vector_store %arg19[%c1_521, %c0_522, %c0_523], %559 {strides = array<i32>} : memref<2x16x50xf32, #tpu.memory_space<vmem>>, vector<1x16x50xf32>,
    %c0_524 = arith.constant 0 : index
    %c0_525 = arith.constant 0 : index
    %c0_526 = arith.constant 0 : index
    %560 = vector.load %arg19[%c0_524, %c0_525, %c0_526] : memref<2x16x50xf32, #tpu.memory_space<vmem>>, vector<2x16x50xf32>
    %561 = vector.shape_cast %560 : vector<2x16x50xf32> to vector<2x1x16x50xf32>
    %c0_527 = arith.constant 0 : index
    %c0_528 = arith.constant 0 : index
    %c0_529 = arith.constant 0 : index
    %562 = vector.load %arg11[%c0_527, %c0_528, %c0_529] : memref<2x16x50xf32, #tpu.memory_space<vmem>>, vector<2x16x50xf32>
    %563 = vector.shape_cast %562 : vector<2x16x50xf32> to vector<1x2x16x50xf32>
    %564 = vector.broadcast %561 : vector<2x1x16x50xf32> to vector<2x2x16x50xf32>
    %565 = vector.broadcast %563 : vector<1x2x16x50xf32> to vector<2x2x16x50xf32>
    %566 = arith.mulf %564, %565 : vector<2x2x16x50xf32>
    %cst_530 = arith.constant dense<0.000000e+00> : vector<2x2x16xf32>
    %567 = vector.multi_reduction <add>, %566, %cst_530 [3] : vector<2x2x16x50xf32> to vector<2x2x16xf32>
    %cst_531 = arith.constant dense<0.000000e+00> : vector<2x2xf32>
    %568 = vector.multi_reduction <add>, %567, %cst_531 [2] : vector<2x2x16xf32> to vector<2x2xf32>
    %c0_532 = arith.constant 0 : index
    %c0_533 = arith.constant 0 : index
    %569 = vector.load %arg12[%c0_532, %c0_533] : memref<1x2xf32, #tpu.memory_space<vmem>>, vector<1x2xf32>
    %570 = vector.broadcast %569 : vector<1x2xf32> to vector<2x2xf32>
    %571 = arith.addf %568, %570 : vector<2x2xf32>
    %c0_534 = arith.constant 0 : index
    %c0_535 = arith.constant 0 : index
    %572 = vector.load %arg13[%c0_534, %c0_535] : memref<2x2xf32, #tpu.memory_space<vmem>>, vector<2x2xf32>
    tpu.vector_store %arg13[%c0_534, %c0_535], %571 {strides = array<i32>} : memref<2x2xf32, #tpu.memory_space<vmem>>, vector<2x2xf32>,
    return
  }
}

</mosaic_0001>

<bundles_post_ra>
// kernel: tcnnet_forward.1
= control target key start
LH: loop header
LB: loop body
LE: loop exit
PB: predicated region body
PF: predicated region fallthrough
CT: control target
= control target key end

     0   :  { %vm123_vm0 = vcmask 1043456   ;;  %v7107_v8 = vmov 0   ;;  %vm110_vm1 = vcmask 588800   ;;  %s8928_s0 = inlined_call_operand.vmem [shape: bf16[4,72,128], index: 0, kind: input, shape index: {}]   ;;  %s8929_s1 = inlined_call_operand.vmem [shape: bf16[64,72], index: 1, kind: input, shape index: {}]   ;;  %s8930_s2 = inlined_call_operand.vmem [shape: f32[64,1], index: 2, kind: input, shape index: {}]   ;;  %s8931_s3 = inlined_call_operand.vmem [shape: bf16[8,512,50], index: 3, kind: input, shape index: {}]   ;;  %s8932_s4 = inlined_call_operand.vmem [shape: f32[8,1,50], index: 4, kind: input, shape index: {}]   ;;  %s8933_s5 = inlined_call_operand.vmem [shape: bf16[16,64], index: 5, kind: input, shape index: {}]   ;;  %s8934_s6 = inlined_call_operand.vmem [shape: f32[16,1], index: 6, kind: input, shape index: {}]   ;;  %s8935_s7 = inlined_call_operand.vmem [shape: bf16[16,128], index: 7, kind: input, shape index: {}]   ;;  %s8936_s8 = inlined_call_operand.vmem [shape: f32[16,1], index: 8, kind: input, shape index: {}]   ;;  %s8937_s9 = inlined_call_operand.vmem [shape: bf16[16,8], index: 9, kind: input, shape index: {}]   ;;  %s8938_s10 = inlined_call_operand.vmem [shape: f32[16,1], index: 10, kind: input, shape index: {}]   ;;  %s8939_s11 = inlined_call_operand.vmem [shape: f32[2,16,50], index: 11, kind: input, shape index: {}]   ;;  %s8940_s12 = inlined_call_operand.vmem [shape: f32[1,2], index: 12, kind: input, shape index: {}]   ;;  %s8941_s13 = inlined_call_operand.hbm [shape: f32[2,2], index: 13, kind: output, shape index: {}]  }
   0x1   :  { %v6799_v0 = vld [vmem:[%s8928_s0 + $0x20] ss:$0 sps:$4 sm:$0xff]   ;;  %v6801_v1 = vld [vmem:[%s8928_s0 + $0x18] sm:$0xff]   ;;  %v6800_v2 = vld [vmem:[%s8928_s0 + $0x44] ss:$0 sps:$4 sm:$0xff]   ;;  %6797 = vset.pattern.permute.xlu0 %v7107_v8  ;;  %6798 = vset.pattern.permute.xlu1 %v7107_v8 }
   0x2   :  { %6779 = vmatprep.subr.msk.bf16.mxu0 %vm123_vm0, %v6799_v0  ;;  %v125_v3 = vsel %vm123_vm0, %v6799_v0, 0  ;;  %v6802_v4 = vld [vmem:[%s8928_s0 + $0x3c] sm:$0xff]   ;;  %6780 = vmatprep.subr.msk.bf16.mxu1 %vm123_vm0, %v6800_v2  ;;  %v230_v5 = vsel %vm123_vm0, %v6800_v2, 0  ;;  %v6803_v6 = vld [vmem:[%s8928_s0 + $0x10] sm:$0xff]   ;;  %v6805_v9 = vld [vmem:[%s8928_s0 + $0x8] sm:$0xff]  }
   0x3   :  { %6584 = vmatpush3.bf16.msra.mxu0 %v125_v3  ;;  %6602 = vmatpush3.bf16.msra.mxu1 %v230_v5  ;;  %v6804_v7 = vld [vmem:[%s8928_s0 + $0x34] sm:$0xff]   ;;  %v6806_v10 = vld [vmem:[%s8928_s0 + $0x2c] sm:$0xff]   ;;  %v6809_v11 = vld [vmem:[%s8929_s1] sm:$0xff]  }
   0x4   :  { %6585 = vmatprep.subr.bf16.mxu0 %v6801_v1  ;;  %6603 = vmatprep.subr.bf16.mxu1 %v6802_v4  ;;  %v6807_v12 = vld [vmem:[%s8928_s0] sm:$0xff]   ;;  %v6811_v14 = vld [vmem:[%s8928_s0 + $0x68] ss:$0 sps:$4 sm:$0xff]   ;;  %v6812_v15 = vld [vmem:[%s8928_s0 + $0x8c] ss:$0 sps:$4 sm:$0xff]  }
   0x5   :  { %v6808_v13 = vld [vmem:[%s8928_s0 + $0x24] sm:$0xff]   ;;  %6593 = vmatprep.mubr.msk.bf16.mxu0 %vm110_vm1, %v6809_v11  ;;  %6611 = vmatprep.mubr.msk.bf16.mxu1 %vm110_vm1, %v6809_v11  ;;  %v343_v18 = vsel %vm123_vm0, %v6811_v14, 0  ;;  %v456_v20 = vsel %vm123_vm0, %v6812_v15, 0  ;;  %v6815_v21 = vld [vmem:[%s8929_s1 + $0x10] sm:$0xff]   ;;  %v6817_v22 = vld [vmem:[%s8928_s0 + $0x58] sm:$0xff]  }
   0x6   :  { %v6810_v16 = vld [vmem:[%s8929_s1 + $0x8] sm:$0xff]   ;;  %v6813_v17 = vld [vmem:[%s8928_s0 + $0x60] sm:$0xff]   ;;  %v533_v25 = vld [vmem:[%s8930_s2 + $0x10] sm:$0xff] }
   0x7   :  { %6586 = vmatpush3.bf16.msra.mxu0 %v6801_v1  ;;  %6604 = vmatpush3.bf16.msra.mxu1 %v6802_v4  ;;  %v6814_v19 = vld [vmem:[%s8928_s0 + $0x84] sm:$0xff]   ;;  %v6818_v23 = vld [vmem:[%s8928_s0 + $0x7c] sm:$0xff]   ;;  %v6819_v28 = vld [vmem:[%s8928_s0 + $0x50] sm:$0xff]  }
   0x8   :  { %6587 = vmatprep.subr.bf16.mxu0 %v6803_v6  ;;  %6605 = vmatprep.subr.bf16.mxu1 %v6804_v7  ;;  %v531_v24 = vld [vmem:[%s8930_s2] sm:$0xff]  ;;  %v6816_v26 = vld [vmem:[%s8929_s1 + $0x18] sm:$0xff]   ;;  %v532_v27 = vld [vmem:[%s8930_s2 + $0x8] sm:$0xff] }
   0x9   :  { %541 = vperm.xlu0 %6797, %v531_v24   ;;  %v6820_v29 = vld [vmem:[%s8928_s0 + $0x74] sm:$0xff]   ;;  %551 = vperm.xlu1 %6798, %v533_v25   ;;  %v6821_v30 = vld [vmem:[%s8928_s0 + $0x48] sm:$0xff]   ;;  %v6831_v42 = vld [vmem:[%s8931_s3 + $0x60] sm:$0xff]  }
   0xa   :  { %v6822_v31 = vld [vmem:[%s8928_s0 + $0x6c] sm:$0xff]   ;;  %v6823_v32 = vld [vmem:[%s8931_s3 + $0x78] sm:$0xff]   ;;  %v6833_v43 = vld [vmem:[%s8931_s3 + $0x20] sm:$0xff]  }
   0xb   :  { %6588 = vmatpush3.bf16.msra.mxu0 %v6803_v6  ;;  %6606 = vmatpush3.bf16.msra.mxu1 %v6804_v7  ;;  %v6824_v33 = vld [vmem:[%s8931_s3 + $0x38] sm:$0xff]   ;;  %v6825_v34 = vld [vmem:[%s8931_s3 + $0x70] sm:$0xff]   ;;  %v6827_v38 = vld [vmem:[%s8931_s3 + $0x68] sm:$0xff]  }
   0xc   :  { %6589 = vmatprep.subr.bf16.mxu0 %v6805_v9  ;;  %6607 = vmatprep.subr.bf16.mxu1 %v6806_v10  ;;  %v6828_v35 = vld [vmem:[%s8931_s3 + $0xf8] sm:$0xff]   ;;  %v6826_v36 = vld [vmem:[%s8931_s3 + $0x30] sm:$0xff]   ;;  %v6829_v41 = vld [vmem:[%s8931_s3 + $0x28] sm:$0xff]  }
   0xd   :  { %546 = vperm.xlu0 %6797, %v532_v27   ;;  %v6830_v37 = vld [vmem:[%s8931_s3 + $0xb8] sm:$0xff]   ;;  %v6832_v39 = vld [vmem:[%s8931_s3 + $0xf0] sm:$0xff]  }
   0xe   :  { %v6834_v40 = vld [vmem:[%s8931_s3 + $0xb0] sm:$0xff]  }
   0xf   :  { %6590 = vmatpush3.bf16.msra.mxu0 %v6805_v9  ;;  %6608 = vmatpush3.bf16.msra.mxu1 %v6806_v10 }
  0x10   :  { %6591 = vmatprep.subr.bf16.mxu0 %v6807_v12  ;;  %6609 = vmatprep.subr.bf16.mxu1 %v6808_v13 }
  0x13   :  { %6592 = vmatpush3.bf16.msra.mxu0 %v6807_v12  ;;  %6610 = vmatpush3.bf16.msra.mxu1 %v6808_v13 }
  0x14   :  { %6781 = vmatprep.subr.msk.bf16.mxu0 %vm123_vm0, %v6811_v14  ;;  %6782 = vmatprep.subr.msk.bf16.mxu1 %vm123_vm0, %v6812_v15 }
  0x16   :  { %6594 = vmatmul.mubr.msk.bf16.vlgmr.msra.gmra.mxu0 %vm110_vm1, %v6810_v16  ;;  %6612 = vmatmul.mubr.msk.bf16.vlgmr.msra.gmra.mxu1 %vm110_vm1, %v6810_v16 }
  0x17   :  { %6620 = vmatpush3.bf16.msra.mxu0 %v343_v18  ;;  %6638 = vmatpush3.bf16.msra.mxu1 %v456_v20 }
  0x18   :  { %6621 = vmatprep.subr.bf16.mxu0 %v6813_v17  ;;  %6639 = vmatprep.subr.bf16.mxu1 %v6814_v19 }
  0x19   :  { %6597 = vmatprep.mubr.msk.bf16.mxu0 %vm110_vm1, %v6815_v21  ;;  %6615 = vmatprep.mubr.msk.bf16.mxu1 %vm110_vm1, %v6815_v21 }
  0x1b   :  { %6622 = vmatpush3.bf16.msra.mxu0 %v6813_v17  ;;  %6640 = vmatpush3.bf16.msra.mxu1 %v6814_v19 }
  0x1c   :  { %6623 = vmatprep.subr.bf16.mxu0 %v6817_v22  ;;  %6641 = vmatprep.subr.bf16.mxu1 %v6818_v23 }
  0x1e   :  { %6598 = vmatmul.mubr.msk.bf16.gmra.mxu0 %vm110_vm1, %v6816_v26  ;;  %6616 = vmatmul.mubr.msk.bf16.gmra.mxu1 %vm110_vm1, %v6816_v26 }
  0x1f   :  { %6624 = vmatpush3.bf16.msra.mxu0 %v6817_v22  ;;  %6642 = vmatpush3.bf16.msra.mxu1 %v6818_v23 }
  0x20   :  { %6625 = vmatprep.subr.bf16.mxu0 %v6819_v28  ;;  %6643 = vmatprep.subr.bf16.mxu1 %v6820_v29 }
  0x21   :  { %6629 = vmatprep.mubr.msk.bf16.mxu0 %vm110_vm1, %v6809_v11  ;;  %6647 = vmatprep.mubr.msk.bf16.mxu1 %vm110_vm1, %v6809_v11 }
  0x23   :  { %6626 = vmatpush3.bf16.msra.mxu0 %v6819_v28  ;;  %6644 = vmatpush3.bf16.msra.mxu1 %v6820_v29 }
  0x24   :  { %6627 = vmatprep.subr.bf16.mxu0 %v6821_v30  ;;  %6645 = vmatprep.subr.bf16.mxu1 %v6822_v31 }
  0x27   :  { %6628 = vmatpush3.bf16.msra.mxu0 %v6821_v30  ;;  %6646 = vmatpush3.bf16.msra.mxu1 %v6822_v31 }
  0x28   :  { %6175 = vmatprep.subr.bf16.mxu0 %v6823_v32  ;;  %6197 = vmatprep.subr.bf16.mxu1 %v6828_v35 }
  0x2a   :  { %6630 = vmatmul.mubr.msk.bf16.vlgmr.msra.gmra.mxu0 %vm110_vm1, %v6810_v16  ;;  %6648 = vmatmul.mubr.msk.bf16.vlgmr.msra.gmra.mxu1 %vm110_vm1, %v6810_v16 }
  0x2b   :  { %6633 = vmatprep.mubr.msk.bf16.mxu0 %vm110_vm1, %v6815_v21  ;;  %6651 = vmatprep.mubr.msk.bf16.mxu1 %vm110_vm1, %v6815_v21 }
  0x2c   :  { %6176 = vmatpush3.bf16.msra.mxu0 %v6824_v33  ;;  %6198 = vmatpush3.bf16.msra.mxu1 %v6830_v37 }
  0x2d   :  { %6177 = vmatprep.subr.bf16.mxu0 %v6825_v34  ;;  %6199 = vmatprep.subr.bf16.mxu1 %v6832_v39 }
  0x30   :  { %6178 = vmatpush3.bf16.msra.mxu0 %v6826_v36  ;;  %6200 = vmatpush3.bf16.msra.mxu1 %v6834_v40 }
  0x31   :  { %6179 = vmatprep.subr.bf16.mxu0 %v6827_v38 }
  0x32   :  { %6634 = vmatmul.mubr.msk.bf16.gmra.mxu0 %vm110_vm1, %v6816_v26  ;;  %6652 = vmatmul.mubr.msk.bf16.gmra.mxu1 %vm110_vm1, %v6816_v26 }
  0x34   :  { %6180 = vmatpush3.bf16.msra.mxu0 %v6829_v41 }
  0x35   :  { %6181 = vmatprep.subr.bf16.mxu0 %v6831_v42 }
  0x38   :  { %6182 = vmatpush3.bf16.msra.mxu0 %v6833_v43 }
  0x39   :  { %18 = vsyncpa [#allocation9], 0  ;;  %v6835_v2 = vld [vmem:[%s8931_s3 + $0x58] sm:$0xff]   ;;  %v6836_v3 = vld [vmem:[%s8931_s3 + $0xe8] sm:$0xff]   ;;  %vm595_vm2 = vcmask 516096   ;;  %s7108_s23 = smov 64  }
  0x3a   :  { %v6837_v4 = vld [vmem:[%s8931_s3 + $0x18] sm:$0xff]   ;;  %v6838_v6 = vld [vmem:[%s8931_s3 + $0xa8] sm:$0xff]   ;;  %6183 = vmatprep.subr.bf16.mxu0 %v6835_v2  ;;  %6201 = vmatprep.subr.bf16.mxu1 %v6836_v3  ;;  %v6839_v12 = vld [vmem:[%s8931_s3 + $0x50] sm:$0xff]   ;;  %vm606_vm3 = vcmask 1040896   ;;  %vm1037_vm4 = vcmask 56320   ;;  %s7111_s21 = smov 7  }
  0x3b   :  { %6202 = vmatpush3.bf16.msra.mxu1 %v6838_v6  ;;  %v6840_v13 = vld [vmem:[%s8931_s3 + $0xe0] sm:$0xff]   ;;  %v6841_v14 = vld [vmem:[%s8931_s3 + $0x10] sm:$0xff]   ;;  %v6843_v32 = vld [vmem:[%s8931_s3 + $0x48] sm:$0xff]   ;;  %vm1429_vm5 = vcmask 458808   ;;  %vm4257_vm6 = vcmask 408576   ;;  %s7113_s17 = smov 122  }
  0x3c   :  { %6184 = vmatpush3.bf16.msra.mxu0 %v6837_v4  ;;  %v6842_v18 = vld [vmem:[%s8931_s3 + $0xa0] sm:$0xff]   ;;  %6203 = vmatprep.subr.bf16.mxu1 %v6840_v13  ;;  %v6844_v33 = vld [vmem:[%s8931_s3 + $0xd8] sm:$0xff]   ;;  %v6845_v34 = vld [vmem:[%s8931_s3 + $0x8] sm:$0xff]   ;;  %s7114_s18 = smov 123   ;;  %s7115_s19 = smov 124   ;;  %vm7118_vm7 = vmmov 0  }
  0x3d   :  { %6185 = vmatprep.subr.bf16.mxu0 %v6839_v12  ;;  %v6846_v36 = vld [vmem:[%s8931_s3 + $0x98] sm:$0xff]   ;;  %v6857_v12 = vld [vmem:[%s8931_s3 + $0x80] sm:$0xff]   ;;  %s7116_s20 = smov 125   ;;  %s7117_s22 = smov 126   ;;  %vm4375_vm8 = vcmask 523264   ;;  %vm4462_vm9 = vcmask 465976  }
  0x3e   :  { %s7119_s1 = smov 127   ;;  %vm4893_vm10 = vcmask 64512   ;;  %vm5255_vm11 = vcmask 130112   ;;  %vm5284_vm12 = vcmask 1041409   ;;  %vm5289_vm13 = vcmask 123904   ;;  %s7120_s27 = smov [#allocation8]  }
  0x3f   :  { %6204 = vmatpush3.bf16.msra.mxu1 %v6842_v18  ;;  %vm5326_vm14 = vcmask 9216  }
  0x40   :  { %6186 = vmatpush3.bf16.msra.mxu0 %v6841_v14  ;;  %6205 = vmatprep.subr.bf16.mxu1 %v6844_v33 }
  0x41   :  { %6187 = vmatprep.subr.bf16.mxu0 %v6843_v32 }
  0x43   :  { %6206 = vmatpush3.bf16.msra.mxu1 %v6846_v36 }
  0x44   :  { %6188 = vmatpush3.bf16.msra.mxu0 %v6845_v34 }
  0x84   :  { %v552_v11 = vpop.permute.xlu1 %551  ;;  %v542_v19 = vpop.permute.xlu0 %541 }
  0x88   :  { %v547_v42 = vpop.permute.xlu0 %546 }
  0xd6   :  { %v6595_v44 = vpop.f32.mrf.mxu0  ;;  %v6613_v45 = vpop.f32.mrf.mxu1 }
  0xd7   :  { %v299_v1 = vmax.f32 %v6595_v44, %v6613_v45 }
  0xd8   :  { %v161_v46 = vpop.f32.mrf.mxu0  ;;  %v266_v47 = vpop.f32.mrf.mxu1 }
  0xd9   :  { %v297_v7 = vmax.f32 %v161_v46, %v266_v47  ;;  %v6847_v46 = vld [vmem:[%s8931_s3 + $0x40] sm:$0xff]   ;;  %v6848_v47 = vld [vmem:[%s8931_s3 + $0xd0] sm:$0xff]  }
  0xda   :  { %v6596_v48 = vpop.f32.mrf.mxu0  ;;  %v6614_v49 = vpop.f32.mrf.mxu1  ;;  %6189 = vmatprep.subr.bf16.mxu0 %v6847_v46  ;;  %6207 = vmatprep.subr.bf16.mxu1 %v6848_v47 }
  0xdb   :  { %v300_v50 = vmax.f32 %v6596_v48, %v6614_v49 }
  0xdc   :  { %v164_v51 = vpop.f32.mrf.mxu0  ;;  %v269_v52 = vpop.f32.mrf.mxu1 }
  0xdd   :  { %v298_v21 = vmax.f32 %v164_v51, %v269_v52  ;;  %v6849_v52 = vld [vmem:[%s8931_s3] sm:$0xff]  }
  0xde   :  { %v6599_v53 = vpop.f32.mrf.mxu0  ;;  %v6617_v54 = vpop.f32.mrf.mxu1  ;;  %6190 = vmatpush3.bf16.msra.mxu0 %v6849_v52 }
  0xdf   :  { %v303_v55 = vmax.f32 %v6599_v53, %v6617_v54  ;;  %v6850_v53 = vld [vmem:[%s8931_s3 + $0x90] sm:$0xff]  }
  0xe0   :  { %v7332_v56 = vpop.f32.mrf.mxu0  ;;  %v7334_v57 = vpop.f32.mrf.mxu1  ;;  %6208 = vmatpush3.bf16.msra.mxu1 %v6850_v53  ;;  %v6859_v53 = vld [vmem:[%s8931_s3 + $0x168] sm:$0xff]  }
  0xe1   :  { %v301_v58 = vmax.f32 %v7332_v56, %v7334_v57  ;;  %v6876_v56 = vld [vmem:[%s8931_s3 + $0x1d8] sm:$0xff]  }
  0xe2   :  { %v7338_v59 = vpop.f32.mrf.mxu0  ;;  %v7340_v60 = vpop.f32.mrf.mxu1 }
  0xe3   :  { %v304_v61 = vmax.f32 %v7338_v59, %v7340_v60 }
  0xe4   :  { %v7344_v62 = vpop.f32.mrf.mxu0  ;;  %v7346_v63 = vpop.f32.mrf.mxu1 }
  0xe5   :  { %v302_v0 = vmax.f32 %v7344_v62, %v7346_v63  ;;  %v6898_v62 = vld [vmem:[%s8931_s3 + $0x2b0] sm:$0xff]  }
  0xea   :  { %v6631_v5 = vpop.f32.mrf.mxu0  ;;  %v6649_v9 = vpop.f32.mrf.mxu1 }
  0xeb   :  { %v412_v8 = vmax.f32 %v299_v1, %v6631_v5 }
  0xec   :  { %v379_v10 = vpop.f32.mrf.mxu0  ;;  %v492_v17 = vpop.f32.mrf.mxu1 }
  0xed   :  { %v525_v15 = vmax.f32 %v412_v8, %v6649_v9  ;;  %v410_v16 = vmax.f32 %v297_v7, %v379_v10  ;;  %v6852_v7 = vld [vmem:[%s8931_s3 + $0x178] sm:$0xff]   ;;  %v6853_v8 = vld [vmem:[%s8931_s3 + $0x88] sm:$0xff]  }
  0xee   :  { %v6632_v20 = vpop.f32.mrf.mxu0  ;;  %v7376_v25 = vpop.f32.mrf.mxu1  ;;  %6219 = vmatprep.subr.bf16.mxu0 %v6852_v7  ;;  %v6863_v7 = vld [vmem:[%s8931_s3 + $0x160] sm:$0xff]  }
  0xef   :  { %v523_v22 = vmax.f32 %v410_v16, %v492_v17  ;;  %v581_v23 = vadd.f32 %v552_v11, %v525_v15  ;;  %v7374_v24 = vmax.f32 %v300_v50, %v6632_v20  ;;  %v6855_v11 = vld [vmem:[%s8931_s3 + $0xc0] sm:$0xff]   ;;  %v6860_v15 = vld [vmem:[%s8931_s3 + $0x1f8] sm:$0xff]  }
  0xf0   :  { %v382_v26 = vpop.f32.mrf.mxu0  ;;  %v495_v31 = vpop.f32.mrf.mxu1  ;;  %v534_v16 = vld [vmem:[%s8930_s2 + $0x18] sm:$0xff]  ;;  %v535_v20 = vld [vmem:[%s8930_s2 + $0x20] sm:$0xff] }
  0xf1   :  { %v579_v27 = vadd.f32 %v542_v19, %v523_v22  ;;  %v7378_v28 = vmax.f32 %v581_v23, 0.0  ;;  %v526_v29 = vmax.f32 %v7374_v24, %v7376_v25  ;;  %v411_v30 = vmax.f32 %v298_v21, %v382_v26 }
  0xf2   :  { %v6635_v35 = vpop.f32.mrf.mxu0  ;;  %v7398_v40 = vpop.f32.mrf.mxu1 }
  0xf3   :  { %v7394_v37 = vmax.f32 %v579_v27, 0.0  ;;  %v524_v38 = vmax.f32 %v411_v30, %v495_v31  ;;  %v7396_v39 = vmax.f32 %v303_v55, %v6635_v35  ;;  %v720_v41 = vrot.slane %v7378_v28, 2  ;;  %707 = vst.msk [vmem:[#allocation2 + $0x4] sm:$0x1] %vm595_vm2, %v7378_v28  ;;  %v536_v30 = vld [vmem:[%s8930_s2 + $0x28] sm:$0xff] }
  0xf4   :  { %v7403_v43 = vpop.f32.mrf.mxu0  ;;  %v734_v44 = vrot.slane %v7378_v28, 4  ;;  %v748_v45 = vrot.slane %v7378_v28, 6  ;;  %v7417_v50 = vpop.f32.mrf.mxu1  ;;  %v713_v22 = vrot.slane %v7378_v28, 1  ;;  %v727_v23 = vrot.slane %v7378_v28, 3 }
  0xf5   :  { %v580_v48 = vadd.f32 %v547_v42, %v524_v38  ;;  %v529_v49 = vmax.f32 %v7396_v39, %v7398_v40  ;;  %598 = vrot.lane.b32.xlu0 %v7394_v37, %s7108_s23  ;;  %v610_v51 = vrot.slane %v7394_v37, 2  ;;  %596 = vst.msk [vmem:[#allocation2] sm:$0x1] %vm595_vm2, %v7394_v37  ;;  %722 = vst.msk [vmem:[#allocation2 + $0xc] sm:$0x1] %vm595_vm2, %v720_v41  ;;  %v624_v55 = vrot.slane %v7394_v37, 4 }
  0xf6   :  { %v6636_v54 = vpop.f32.mrf.mxu0  ;;  %v638_v1 = vrot.slane %v7394_v37, 6  ;;  %736 = vst.msk [vmem:[#allocation2 + $0x14] sm:$0x1] %vm595_vm2, %v734_v44  ;;  %750 = vst.msk [vmem:[#allocation2 + $0x1c] sm:$0x1] %vm595_vm2, %v748_v45  ;;  %v7447_v4 = vpop.f32.mrf.mxu1  ;;  %v602_v5 = vrot.slane %v7394_v37, 1 }
  0xf7   :  { %v7439_v2 = vmax.f32 %v580_v48, 0.0  ;;  %v7444_v3 = vmax.f32 %v304_v61, %v6636_v54  ;;  %613 = vrot.lane.b32.xlu1 %v610_v51, %s7108_s23  ;;  %612 = vst.msk [vmem:[#allocation2 + $0x8] sm:$0x1] %vm595_vm2, %v610_v51  ;;  %626 = vst.msk [vmem:[#allocation2 + $0x10] sm:$0x1] %vm595_vm2, %v624_v55  ;;  %v617_v59 = vrot.slane %v7394_v37, 3 }
  0xf8   :  { %640 = vst.msk [vmem:[#allocation2 + $0x18] sm:$0x1] %vm595_vm2, %v638_v1  ;;  %v6851_v61 = vld [vmem:[%s8931_s3 + $0xc8] sm:$0xff]   ;;  %v631_v13 = vrot.slane %v7394_v37, 5  ;;  %v645_v14 = vrot.slane %v7394_v37, 7  ;;  %v741_v26 = vrot.slane %v7378_v28, 5 }
  0xf9   :  { %v530_v6 = vmax.f32 %v7444_v3, %v7447_v4  ;;  %603 = vrot.lane.b32.xlu0 %v602_v5, %s7108_s23  ;;  %v665_v60 = vrot.slane %v7439_v2, 2  ;;  %652 = vst.msk [vmem:[#allocation2 + $0x2] sm:$0x1] %vm595_vm2, %v7439_v2  ;;  %v693_v9 = vrot.slane %v7439_v2, 6  ;;  %v679_v10 = vrot.slane %v7439_v2, 4  ;;  %6209 = vmatprep.subr.bf16.mxu1 %v6851_v61  ;;  %v6856_v48 = vld [vmem:[%s8931_s3 + $0x170] sm:$0xff]  }
  0xfa   :  { %6210 = vmatpush3.bf16.msra.mxu1 %v6853_v8  ;;  %v672_v17 = vrot.slane %v7439_v2, 3  ;;  %v658_v18 = vrot.slane %v7439_v2, 1  ;;  %v700_v19 = vrot.slane %v7439_v2, 7  ;;  %v686_v21 = vrot.slane %v7439_v2, 5  ;;  %v6858_v51 = vld [vmem:[%s8931_s3 + $0x130] sm:$0xff]   ;;  %v6963_v39 = vld [vmem:[%s8931_s3 + $0x458] sm:$0xff]  }
  0xfb   :  { %618 = vrot.lane.b32.xlu1 %v617_v59, %s7108_s23  ;;  %667 = vst.msk [vmem:[#allocation2 + $0xa] sm:$0x1] %vm595_vm2, %v665_v60  ;;  %681 = vst.msk [vmem:[#allocation2 + $0x12] sm:$0x1] %vm595_vm2, %v679_v10  ;;  %6211 = vmatprep.subr.bf16.mxu1 %v6855_v11  ;;  %v755_v27 = vrot.slane %v7378_v28, 7  ;;  %v6864_v8 = vld [vmem:[%s8931_s3 + $0x1f0] sm:$0xff]  }
  0xfc   :  { %695 = vst.msk [vmem:[#allocation2 + $0x1a] sm:$0x1] %vm595_vm2, %v693_v9  ;;  %v6866_v11 = vld [vmem:[%s8931_s3 + $0x1b0] sm:$0xff]  }
  0xfd   :  { %627 = vrot.lane.b32.xlu0 %v624_v55, %s7108_s23 }
  0xfe   :  { %6212 = vmatpush3.bf16.msra.mxu1 %v6857_v12 }
  0xff   :  { %641 = vrot.lane.b32.xlu1 %v638_v1, %s7108_s23  ;;  %6241 = vmatprep.subr.bf16.mxu1 %v6860_v15 }
 0x101   :  { %632 = vrot.lane.b32.xlu0 %v631_v13, %s7108_s23 }
 0x103   :  { %646 = vrot.lane.b32.xlu1 %v645_v14, %s7108_s23 }
 0x105   :  { %668 = vrot.lane.b32.xlu0 %v665_v60, %s7108_s23 }
 0x107   :  { %556 = vperm.xlu1 %6798, %v534_v16  }
 0x109   :  { %673 = vrot.lane.b32.xlu0 %v672_v17, %s7108_s23 }
 0x10b   :  { %654 = vrot.lane.b32.xlu1 %v7439_v2, %s7108_s23  ;;  %v6881_v2 = vld [vmem:[%s8931_s3 + $0x100] sm:$0xff]  }
 0x10d   :  { %696 = vrot.lane.b32.xlu0 %v693_v9, %s7108_s23 }
 0x10f   :  { %659 = vrot.lane.b32.xlu1 %v658_v18, %s7108_s23 }
 0x111   :  { %701 = vrot.lane.b32.xlu0 %v700_v19, %s7108_s23 }
 0x113   :  { %682 = vrot.lane.b32.xlu1 %v679_v10, %s7108_s23  ;;  %v6865_v10 = vld [vmem:[%s8931_s3 + $0x120] sm:$0xff]  }
 0x115   :  { %561 = vperm.xlu0 %6797, %v535_v20   ;;  %v6870_v20 = vld [vmem:[%s8931_s3 + $0x1a8] sm:$0xff]  }
 0x117   :  { %687 = vrot.lane.b32.xlu1 %v686_v21, %s7108_s23 }
 0x119   :  { %709 = vrot.lane.b32.xlu0 %v7378_v28, %s7108_s23 }
 0x11b   :  { %723 = vrot.lane.b32.xlu1 %v720_v41, %s7108_s23 }
 0x11d   :  { %714 = vrot.lane.b32.xlu0 %v713_v22, %s7108_s23 }
 0x11f   :  { %728 = vrot.lane.b32.xlu1 %v727_v23, %s7108_s23 }
 0x121   :  { %737 = vrot.lane.b32.xlu0 %v734_v44, %s7108_s23 }
 0x123   :  { %751 = vrot.lane.b32.xlu1 %v748_v45, %s7108_s23  ;;  %v6854_v45 = vld [vmem:[%s8931_s3 + $0x138] sm:$0xff]  }
 0x125   :  { %742 = vrot.lane.b32.xlu0 %v741_v26, %s7108_s23 }
 0x127   :  { %756 = vrot.lane.b32.xlu1 %v755_v27, %s7108_s23 }
 0x12b   :  { %566 = vperm.xlu1 %6798, %v536_v30  }
 0x167   :  { %v599_v31 = vpop.permute.xlu0 %598 }
 0x168   :  { %601 = vst.msk [vmem:[#allocation2 + $0x1] sm:$0x1] %vm595_vm2, %v599_v31  ;;  %v6871_v31 = vld [vmem:[%s8931_s3 + $0x150] sm:$0xff]  }
 0x169   :  { %609 = vst.msk [vmem:[#allocation2 + $0x1] sm:$0x1] %vm606_vm3, %v602_v5  ;;  %v614_v32 = vpop.permute.xlu1 %613  ;;  %v6861_v5 = vld [vmem:[%s8931_s3 + $0x128] sm:$0xff]  }
 0x16a   :  { %616 = vst.msk [vmem:[#allocation2 + $0x9] sm:$0x1] %vm595_vm2, %v614_v32 }
 0x16b   :  { %623 = vst.msk [vmem:[#allocation2 + $0x9] sm:$0x1] %vm606_vm3, %v617_v59  ;;  %v604_v33 = vpop.permute.xlu0 %603  ;;  %v6862_v59 = vld [vmem:[%s8931_s3 + $0x1b8] sm:$0xff]  }
 0x16c   :  { %607 = vst.msk [vmem:[#allocation2] sm:$0x1] %vm606_vm3, %v604_v33  ;;  %v6872_v33 = vld [vmem:[%s8931_s3 + $0x1e0] sm:$0xff]  }
 0x16d   :  { %v619_v34 = vpop.permute.xlu1 %618 }
 0x16e   :  { %621 = vst.msk [vmem:[#allocation2 + $0x8] sm:$0x1] %vm606_vm3, %v619_v34 }
 0x16f   :  { %v628_v35 = vpop.permute.xlu0 %627 }
 0x170   :  { %630 = vst.msk [vmem:[#allocation2 + $0x11] sm:$0x1] %vm595_vm2, %v628_v35 }
 0x171   :  { %637 = vst.msk [vmem:[#allocation2 + $0x11] sm:$0x1] %vm606_vm3, %v631_v13  ;;  %v642_v36 = vpop.permute.xlu1 %641 }
 0x172   :  { %644 = vst.msk [vmem:[#allocation2 + $0x19] sm:$0x1] %vm595_vm2, %v642_v36 }
 0x173   :  { %651 = vst.msk [vmem:[#allocation2 + $0x19] sm:$0x1] %vm606_vm3, %v645_v14  ;;  %v633_v38 = vpop.permute.xlu0 %632  ;;  %v1040_v37 = vld [vmem:[#allocation2] sm:$0x3]  ;;  %v6867_v14 = vld [vmem:[%s8931_s3 + $0x158] sm:$0xff]  }
 0x174   :  { %635 = vst.msk [vmem:[#allocation2 + $0x10] sm:$0x1] %vm606_vm3, %v633_v38  ;;  %v1044_v47 = vpack.c.bf16 %v1040_v37, %v1040_v37  ;;  %v6874_v38 = vld [vmem:[%s8931_s3 + $0x1a0] sm:$0xff]   ;;  %v414_v37 = vmax.f32 %v301_v58, %v7403_v43 }
 0x175   :  { %v647_v41 = vpop.permute.xlu1 %646  ;;  %v1041_v42 = vld [vmem:[#allocation2 + $0x8] sm:$0x3] }
 0x176   :  { %649 = vst.msk [vmem:[#allocation2 + $0x18] sm:$0x1] %vm606_vm3, %v647_v41  ;;  %v1045_v44 = vpack.c.bf16 %v1041_v42, %v1041_v42  ;;  %v6875_v42 = vld [vmem:[%s8931_s3 + $0x148] sm:$0xff]  }
 0x177   :  { %v669_v46 = vpop.permute.xlu0 %668 }
 0x178   :  { %671 = vst.msk [vmem:[#allocation2 + $0xb] sm:$0x1] %vm595_vm2, %v669_v46  ;;  %1343 = vmatprep.mubr.bf16.mxu0 %v1045_v44  ;;  %v6878_v46 = vld [vmem:[%s8931_s3 + $0x198] sm:$0xff]  }
 0x179   :  { %678 = vst.msk [vmem:[#allocation2 + $0xb] sm:$0x1] %vm606_vm3, %v672_v17  ;;  %1344 = vmatmul.mubr.bf16.vlgmr.msra.gmra.mxu0 %v1044_v47  ;;  %v6868_v17 = vld [vmem:[%s8931_s3 + $0x1e8] sm:$0xff]   ;;  %v527_v47 = vmax.f32 %v414_v37, %v7417_v50  ;;  %v6880_v50 = vld [vmem:[%s8931_s3 + $0x1d0] sm:$0xff]   ;;  %v6894_v37 = vld [vmem:[%s8931_s3 + $0x2b8] sm:$0xff]  }
 0x17a   :  { %6220 = vmatpush3.bf16.msra.mxu0 %v6854_v45  ;;  %v6877_v45 = vld [vmem:[%s8931_s3 + $0x108] sm:$0xff]  }
 0x17b   :  { %v674_v52 = vpop.permute.xlu0 %673  ;;  %6221 = vmatprep.subr.bf16.mxu0 %v6856_v48  ;;  %v1042_v54 = vld [vmem:[#allocation2 + $0x10] sm:$0x3]  ;;  %v6879_v48 = vld [vmem:[%s8931_s3 + $0x140] sm:$0xff]  }
 0x17c   :  { %676 = vst.msk [vmem:[#allocation2 + $0xa] sm:$0x1] %vm606_vm3, %v674_v52  ;;  %v1046_v61 = vpack.c.bf16 %v1042_v54, %v1042_v54 }
 0x17d   :  { %v1043_v55 = vld [vmem:[#allocation2 + $0x18] sm:$0x3] }
 0x17e   :  { %6222 = vmatpush3.bf16.msra.mxu0 %v6858_v51  ;;  %v1047_v1 = vpack.c.bf16 %v1043_v55, %v1043_v55 }
 0x17f   :  { %v697_v60 = vpop.permute.xlu0 %696  ;;  %6223 = vmatprep.subr.bf16.mxu0 %v6859_v53 }
 0x180   :  { %699 = vst.msk [vmem:[#allocation2 + $0x1b] sm:$0x1] %vm595_vm2, %v697_v60  ;;  %1383 = vmatprep.mubr.bf16.mxu1 %v1047_v1 }
 0x181   :  { %706 = vst.msk [vmem:[#allocation2 + $0x1b] sm:$0x1] %vm606_vm3, %v700_v19  ;;  %1384 = vmatmul.mubr.bf16.vlgmr.msra.gmra.mxu1 %v1046_v61 }
 0x182   :  { %6224 = vmatpush3.bf16.msra.mxu0 %v6861_v5  ;;  %6242 = vmatpush3.bf16.msra.mxu1 %v6862_v59  ;;  %v557_v9 = vpop.permute.xlu1 %556  ;;  %v6883_v59 = vld [vmem:[%s8931_s3 + $0x1c8] sm:$0xff]  }
 0x183   :  { %v582_v12 = vadd.f32 %v557_v9, %v526_v29  ;;  %v702_v13 = vpop.permute.xlu0 %701  ;;  %6225 = vmatprep.subr.bf16.mxu0 %v6863_v7  ;;  %6243 = vmatprep.subr.bf16.mxu1 %v6864_v8  ;;  %v1433_v15 = vld [vmem:[#allocation2 + $0x8] sm:$0xc]  ;;  %v6869_v29 = vld [vmem:[%s8931_s3 + $0x118] sm:$0xff]  }
 0x184   :  { %704 = vst.msk [vmem:[#allocation2 + $0x1a] sm:$0x1] %vm606_vm3, %v702_v13  ;;  %v1437_v16 = vpack.c.bf16 %v1433_v15, %v1433_v15  ;;  %v6884_v7 = vld [vmem:[%s8931_s3 + $0x278] sm:$0xff]   ;;  %v537_v13 = vld [vmem:[%s8930_s2 + $0x30] sm:$0xff] }
 0x185   :  { %v7612_v19 = vmax.f32 %v582_v12, 0.0  ;;  %v6885_v12 = vld [vmem:[%s8931_s3 + $0x188] sm:$0xff]  }
 0x186   :  { %6226 = vmatpush3.bf16.msra.mxu0 %v6865_v10  ;;  %6244 = vmatpush3.bf16.msra.mxu1 %v6866_v11  ;;  %v655_v24 = vpop.permute.xlu1 %654  ;;  %v1518_v25 = vrot.slane %v1437_v16, 1 }
 0x187   :  { %762 = vst.msk [vmem:[#allocation2 + $0x6] sm:$0x1] %vm595_vm2, %v7612_v19  ;;  %657 = vst.msk [vmem:[#allocation2 + $0x3] sm:$0x1] %vm595_vm2, %v655_v24  ;;  %764 = vrot.lane.b32.xlu1 %v7612_v19, %s7108_s23  ;;  %6227 = vmatprep.subr.bf16.mxu0 %v6867_v14  ;;  %v775_v30 = vrot.slane %v7612_v19, 2  ;;  %v789_v32 = vrot.slane %v7612_v19, 4 }
 0x188   :  { %664 = vst.msk [vmem:[#allocation2 + $0x3] sm:$0x1] %vm606_vm3, %v658_v18  ;;  %1749 = vmatprep.mubr.bf16.mxu0 %v1518_v25  ;;  %6245 = vmatprep.subr.bf16.mxu1 %v6868_v17  ;;  %v803_v34 = vrot.slane %v7612_v19, 6  ;;  %v768_v35 = vrot.slane %v7612_v19, 1  ;;  %v6873_v18 = vld [vmem:[%s8931_s3 + $0x110] sm:$0xff]   ;;  %v782_v41 = vrot.slane %v7612_v19, 3 }
 0x189   :  { %778 = vrot.lane.b32.xlu0 %v775_v30, %s7108_s23  ;;  %777 = vst.msk [vmem:[#allocation2 + $0xe] sm:$0x1] %vm595_vm2, %v775_v30  ;;  %791 = vst.msk [vmem:[#allocation2 + $0x16] sm:$0x1] %vm595_vm2, %v789_v32  ;;  %v796_v53 = vrot.slane %v7612_v19, 5  ;;  %v810_v5 = vrot.slane %v7612_v19, 7 }
 0x18a   :  { %6228 = vmatpush3.bf16.msra.mxu0 %v6869_v29  ;;  %6246 = vmatpush3.bf16.msra.mxu1 %v6870_v20  ;;  %v660_v36 = vpop.permute.xlu1 %659  ;;  %805 = vst.msk [vmem:[#allocation2 + $0x1e] sm:$0x1] %vm595_vm2, %v803_v34  ;;  %v6886_v14 = vld [vmem:[%s8931_s3 + $0x238] sm:$0xff]   ;;  %v6888_v17 = vld [vmem:[%s8931_s3 + $0x270] sm:$0xff]  }
 0x18b   :  { %662 = vst.msk [vmem:[#allocation2 + $0x2] sm:$0x1] %vm606_vm3, %v660_v36  ;;  %769 = vrot.lane.b32.xlu1 %v768_v35, %s7108_s23  ;;  %6229 = vmatprep.subr.bf16.mxu0 %v6871_v31  ;;  %v1435_v44 = vld [vmem:[#allocation2 + $0x18] sm:$0xc]  ;;  %v6890_v29 = vld [vmem:[%s8931_s3 + $0x230] sm:$0xff]   ;;  %v398_v36 = vpop.f32.mrf.mxu0 }
 0x18c   :  { %6247 = vmatprep.subr.bf16.mxu1 %v6872_v33  ;;  %v1439_v57 = vpack.c.bf16 %v1435_v44, %v1435_v44  ;;  %v6891_v30 = vld [vmem:[%s8931_s3 + $0x2f8] sm:$0xff]   ;;  %v6892_v33 = vld [vmem:[%s8931_s3 + $0x268] sm:$0xff]  }
 0x18d   :  { %783 = vrot.lane.b32.xlu0 %v782_v41, %s7108_s23  ;;  %v6950_v19 = vld [vmem:[%s8931_s3 + $0x438] sm:$0xff]  }
 0x18e   :  { %6230 = vmatpush3.bf16.msra.mxu0 %v6873_v18  ;;  %6248 = vmatpush3.bf16.msra.mxu1 %v6874_v38  ;;  %v683_v58 = vpop.permute.xlu1 %682  ;;  %v1520_v43 = vrot.slane %v1439_v57, 1  ;;  %v6893_v38 = vld [vmem:[%s8931_s3 + $0x228] sm:$0xff]   ;;  %v415_v57 = vmax.f32 %v302_v0, %v398_v36 }
 0x18f   :  { %685 = vst.msk [vmem:[#allocation2 + $0x13] sm:$0x1] %vm595_vm2, %v683_v58  ;;  %792 = vrot.lane.b32.xlu1 %v789_v32, %s7108_s23  ;;  %6231 = vmatprep.subr.bf16.mxu0 %v6875_v42 }
 0x190   :  { %692 = vst.msk [vmem:[#allocation2 + $0x13] sm:$0x1] %vm606_vm3, %v686_v21  ;;  %6249 = vmatprep.subr.bf16.mxu1 %v6876_v56  ;;  %1789 = vmatprep.mubr.bf16.mxu1 %v1520_v43  ;;  %v562_v51 = vpop.permute.xlu0 %561  ;;  %v6882_v21 = vld [vmem:[%s8931_s3 + $0x190] sm:$0xff]   ;;  %v6897_v43 = vld [vmem:[%s8931_s3 + $0x220] sm:$0xff]  }
 0x191   :  { %v583_v52 = vadd.f32 %v562_v51, %v527_v47  ;;  %806 = vrot.lane.b32.xlu0 %v803_v34, %s7108_s23  ;;  %v6896_v56 = vld [vmem:[%s8931_s3 + $0x2f0] sm:$0xff]   ;;  %v6900_v47 = vld [vmem:[%s8931_s3 + $0x2e8] sm:$0xff]  }
 0x192   :  { %6232 = vmatpush3.bf16.msra.mxu0 %v6877_v45  ;;  %6250 = vmatpush3.bf16.msra.mxu1 %v6878_v46  ;;  %v688_v54 = vpop.permute.xlu1 %687  ;;  %v1432_v55 = vld [vmem:[#allocation2] sm:$0xc]  ;;  %v538_v45 = vld [vmem:[%s8930_s2 + $0x38] sm:$0xff] }
 0x193   :  { %v7692_v1 = vmax.f32 %v583_v52, 0.0  ;;  %690 = vst.msk [vmem:[#allocation2 + $0x12] sm:$0x1] %vm606_vm3, %v688_v54  ;;  %797 = vrot.lane.b32.xlu1 %v796_v53, %s7108_s23  ;;  %6233 = vmatprep.subr.bf16.mxu0 %v6879_v48  ;;  %v1436_v60 = vpack.c.bf16 %v1432_v55, %v1432_v55  ;;  %v6899_v46 = vld [vmem:[%s8931_s3 + $0x258] sm:$0xff]   ;;  %v6902_v54 = vld [vmem:[%s8931_s3 + $0x2a8] sm:$0xff]   ;;  %v6903_v55 = vld [vmem:[%s8931_s3 + $0x250] sm:$0xff]  }
 0x194   :  { %6251 = vmatprep.subr.bf16.mxu1 %v6880_v50  ;;  %v710_v61 = vpop.permute.xlu0 %709  ;;  %v6901_v52 = vld [vmem:[%s8931_s3 + $0x218] sm:$0xff]  }
 0x195   :  { %817 = vst.msk [vmem:[#allocation2 + $0x20] sm:$0x1] %vm595_vm2, %v7692_v1  ;;  %712 = vst.msk [vmem:[#allocation2 + $0x5] sm:$0x1] %vm595_vm2, %v710_v61  ;;  %811 = vrot.lane.b32.xlu0 %v810_v5, %s7108_s23  ;;  %v830_v8 = vrot.slane %v7692_v1, 2  ;;  %v1517_v9 = vrot.slane %v1436_v60, 1 }
 0x196   :  { %v858_v10 = vrot.slane %v7692_v1, 6  ;;  %719 = vst.msk [vmem:[#allocation2 + $0x5] sm:$0x1] %vm606_vm3, %v713_v22  ;;  %6234 = vmatpush3.bf16.msra.mxu0 %v6881_v2  ;;  %6252 = vmatpush3.bf16.msra.mxu1 %v6882_v21  ;;  %v724_v11 = vpop.permute.xlu1 %723  ;;  %v844_v15 = vrot.slane %v7692_v1, 4  ;;  %v6887_v22 = vld [vmem:[%s8931_s3 + $0x1c0] sm:$0xff]   ;;  %v837_v24 = vrot.slane %v7692_v1, 3 }
 0x197   :  { %726 = vst.msk [vmem:[#allocation2 + $0xd] sm:$0x1] %vm595_vm2, %v724_v11  ;;  %833 = vrot.lane.b32.xlu1 %v830_v8, %s7108_s23  ;;  %832 = vst.msk [vmem:[#allocation2 + $0x28] sm:$0x1] %vm595_vm2, %v830_v8  ;;  %6253 = vmatprep.subr.bf16.mxu1 %v6883_v59  ;;  %v823_v42 = vrot.slane %v7692_v1, 1  ;;  %v865_v28 = vrot.slane %v7692_v1, 7 }
 0x198   :  { %860 = vst.msk [vmem:[#allocation2 + $0x38] sm:$0x1] %vm595_vm2, %v858_v10  ;;  %6263 = vmatprep.subr.bf16.mxu0 %v6884_v7  ;;  %v715_v16 = vpop.permute.xlu0 %714  ;;  %846 = vst.msk [vmem:[#allocation2 + $0x30] sm:$0x1] %vm595_vm2, %v844_v15  ;;  %v851_v21 = vrot.slane %v7692_v1, 5  ;;  %v6904_v59 = vld [vmem:[%s8931_s3 + $0x2e0] sm:$0xff]  }
 0x199   :  { %733 = vst.msk [vmem:[#allocation2 + $0xd] sm:$0x1] %vm606_vm3, %v727_v23  ;;  %717 = vst.msk [vmem:[#allocation2 + $0x4] sm:$0x1] %vm606_vm3, %v715_v16  ;;  %1750 = vmatmul.mubr.bf16.vlgmr.msra.gmra.mxu0 %v1517_v9  ;;  %571 = vperm.xlu0 %6797, %v537_v13   ;;  %v6889_v23 = vld [vmem:[%s8931_s3 + $0x180] sm:$0xff]   ;;  %v6905_v61 = vld [vmem:[%s8931_s3 + $0x210] sm:$0xff]  }
 0x19a   :  { %6254 = vmatpush3.bf16.msra.mxu1 %v6885_v12  ;;  %6264 = vmatpush3.bf16.msra.mxu0 %v6886_v14  ;;  %v729_v25 = vpop.permute.xlu1 %728  ;;  %v1434_v20 = vld [vmem:[#allocation2 + $0x10] sm:$0xc]  ;;  %v6906_v7 = vld [vmem:[%s8931_s3 + $0x2a0] sm:$0xff]   ;;  %v6907_v11 = vld [vmem:[%s8931_s3 + $0x248] sm:$0xff]  }
 0x19b   :  { %731 = vst.msk [vmem:[#allocation2 + $0xc] sm:$0x1] %vm606_vm3, %v729_v25  ;;  %838 = vrot.lane.b32.xlu1 %v837_v24, %s7108_s23  ;;  %6255 = vmatprep.subr.bf16.mxu1 %v6887_v22  ;;  %v1438_v31 = vpack.c.bf16 %v1434_v20, %v1434_v20  ;;  %v6908_v12 = vld [vmem:[%s8931_s3 + $0x2d8] sm:$0xff]   ;;  %v6909_v16 = vld [vmem:[%s8931_s3 + $0x208] sm:$0xff]  }
 0x19c   :  { %v738_v32 = vpop.permute.xlu0 %737  ;;  %6265 = vmatprep.subr.bf16.mxu0 %v6888_v17  ;;  %v6910_v17 = vld [vmem:[%s8931_s3 + $0x298] sm:$0xff]  }
 0x19d   :  { %740 = vst.msk [vmem:[#allocation2 + $0x15] sm:$0x1] %vm595_vm2, %v738_v32  ;;  %819 = vrot.lane.b32.xlu0 %v7692_v1, %s7108_s23  ;;  %v1519_v34 = vrot.slane %v1438_v31, 1  ;;  %v6914_v31 = vld [vmem:[%s8931_s3 + $0x290] sm:$0xff]  }
 0x19e   :  { %747 = vst.msk [vmem:[#allocation2 + $0x15] sm:$0x1] %vm606_vm3, %v741_v26  ;;  %6256 = vmatpush3.bf16.msra.mxu1 %v6889_v23  ;;  %6266 = vmatpush3.bf16.msra.mxu0 %v6890_v29  ;;  %v752_v18 = vpop.permute.xlu1 %751  ;;  %v6895_v26 = vld [vmem:[%s8931_s3 + $0x260] sm:$0xff]   ;;  %v6912_v29 = vld [vmem:[%s8931_s3 + $0x2d0] sm:$0xff]  }
 0x19f   :  { %754 = vst.msk [vmem:[#allocation2 + $0x1d] sm:$0x1] %vm595_vm2, %v752_v18  ;;  %861 = vrot.lane.b32.xlu1 %v858_v10, %s7108_s23  ;;  %6285 = vmatprep.subr.bf16.mxu1 %v6891_v30  ;;  %v6911_v23 = vld [vmem:[%s8931_s3 + $0x240] sm:$0xff]   ;;  %v6916_v18 = vld [vmem:[%s8931_s3 + $0x288] sm:$0xff]  }
 0x1a0   :  { %761 = vst.msk [vmem:[#allocation2 + $0x1d] sm:$0x1] %vm606_vm3, %v755_v27  ;;  %v743_v44 = vpop.permute.xlu0 %742  ;;  %6267 = vmatprep.subr.bf16.mxu0 %v6892_v33  ;;  %v511_v27 = vpop.f32.mrf.mxu1  ;;  %v1837_v20 = vld [vmem:[#allocation2] sm:$0x30]  ;;  %v6915_v33 = vld [vmem:[%s8931_s3 + $0x2c8] sm:$0xff]  }
 0x1a1   :  { %745 = vst.msk [vmem:[#allocation2 + $0x14] sm:$0x1] %vm606_vm3, %v743_v44  ;;  %1790 = vmatmul.mubr.bf16.vlgmr.msra.gmra.mxu1 %v1519_v34  ;;  %824 = vrot.lane.b32.xlu0 %v823_v42, %s7108_s23  ;;  %v528_v48 = vmax.f32 %v415_v57, %v511_v27  ;;  %v6913_v30 = vld [vmem:[%s8931_s3 + $0x200] sm:$0xff]   ;;  %v1841_v32 = vpack.c.bf16 %v1837_v20, %v1837_v20  ;;  %v6919_v34 = vld [vmem:[%s8931_s3 + $0x378] sm:$0xff]  }
 0x1a2   :  { %6268 = vmatpush3.bf16.msra.mxu0 %v6893_v38  ;;  %6286 = vmatpush3.bf16.msra.mxu1 %v6894_v37  ;;  %v757_v58 = vpop.permute.xlu1 %756  ;;  %v1838_v63 = vld [vmem:[#allocation2 + $0x8] sm:$0x30]  ;;  %v6920_v38 = vld [vmem:[%s8931_s3 + $0x338] sm:$0xff]   ;;  %v6917_v44 = vld [vmem:[%s8931_s3 + $0x2c0] sm:$0xff]  }
 0x1a3   :  { %759 = vst.msk [vmem:[#allocation2 + $0x1c] sm:$0x1] %vm606_vm3, %v757_v58  ;;  %866 = vrot.lane.b32.xlu1 %v865_v28, %s7108_s23  ;;  %6269 = vmatprep.subr.bf16.mxu0 %v6895_v26  ;;  %v1842_v0 = vpack.c.bf16 %v1838_v63, %v1838_v63  ;;  %v1922_v37 = vrot.slane %v1841_v32, 2  ;;  %v6918_v27 = vld [vmem:[%s8931_s3 + $0x280] sm:$0xff]   ;;  %v6922_v58 = vld [vmem:[%s8931_s3 + $0x330] sm:$0xff]   ;;  %v6924_v63 = vld [vmem:[%s8931_s3 + $0x3f8] sm:$0xff]  }
 0x1a4   :  { %6287 = vmatprep.subr.bf16.mxu1 %v6896_v56  ;;  %v6921_v56 = vld [vmem:[%s8931_s3 + $0x370] sm:$0xff]   ;;  %v6951_v20 = vld [vmem:[%s8931_s3 + $0x3c0] sm:$0xff]  }
 0x1a5   :  { %847 = vrot.lane.b32.xlu0 %v844_v15, %s7108_s23  ;;  %v1923_v51 = vrot.slane %v1842_v0, 2  ;;  %v6925_v0 = vld [vmem:[%s8931_s3 + $0x328] sm:$0xff]  }
 0x1a6   :  { %6270 = vmatpush3.bf16.msra.mxu0 %v6897_v43  ;;  %6288 = vmatpush3.bf16.msra.mxu1 %v6898_v62  ;;  %v567_v50 = vpop.permute.xlu1 %566  ;;  %v6923_v62 = vld [vmem:[%s8931_s3 + $0x368] sm:$0xff]  }
 0x1a7   :  { %v584_v2 = vadd.f32 %v567_v50, %v528_v48  ;;  %2154 = vmatprep.mubr.bf16.mxu0 %v1923_v51  ;;  %576 = vperm.xlu1 %6798, %v538_v45   ;;  %v6926_v45 = vld [vmem:[%s8931_s3 + $0x3b8] sm:$0xff]   ;;  %v6928_v48 = vld [vmem:[%s8931_s3 + $0x3f0] sm:$0xff]   ;;  %v6930_v50 = vld [vmem:[%s8931_s3 + $0x320] sm:$0xff]  }
 0x1a8   :  { %6271 = vmatprep.subr.bf16.mxu0 %v6899_v46  ;;  %6289 = vmatprep.subr.bf16.mxu1 %v6900_v47  ;;  %v1839_v57 = vld [vmem:[#allocation2 + $0x10] sm:$0x30]  ;;  %v6927_v47 = vld [vmem:[%s8931_s3 + $0x360] sm:$0xff]  }
 0x1a9   :  { %v7827_v60 = vmax.f32 %v584_v2, 0.0  ;;  %852 = vrot.lane.b32.xlu0 %v851_v21, %s7108_s23  ;;  %v1843_v43 = vpack.c.bf16 %v1839_v57, %v1839_v57  ;;  %v6929_v51 = vld [vmem:[%s8931_s3 + $0x3b0] sm:$0xff]   ;;  %v6933_v2 = vld [vmem:[%s8931_s3 + $0x3a8] sm:$0xff]  }
 0x1aa   :  { %6272 = vmatpush3.bf16.msra.mxu0 %v6901_v52  ;;  %6290 = vmatpush3.bf16.msra.mxu1 %v6902_v54  ;;  %v1840_v8 = vld [vmem:[#allocation2 + $0x18] sm:$0x30]  ;;  %v6932_v54 = vld [vmem:[%s8931_s3 + $0x3e8] sm:$0xff]  }
 0x1ab   :  { %872 = vst.msk [vmem:[#allocation2 + $0x22] sm:$0x1] %vm595_vm2, %v7827_v60  ;;  %874 = vrot.lane.b32.xlu1 %v7827_v60, %s7108_s23  ;;  %6273 = vmatprep.subr.bf16.mxu0 %v6903_v55  ;;  %v885_v9 = vrot.slane %v7827_v60, 2  ;;  %v1844_v10 = vpack.c.bf16 %v1840_v8, %v1840_v8  ;;  %v899_v13 = vrot.slane %v7827_v60, 4  ;;  %v913_v14 = vrot.slane %v7827_v60, 6  ;;  %v6931_v52 = vld [vmem:[%s8931_s3 + $0x358] sm:$0xff]  }
 0x1ac   :  { %6291 = vmatprep.subr.bf16.mxu1 %v6904_v59  ;;  %v878_v22 = vrot.slane %v7827_v60, 1  ;;  %v892_v25 = vrot.slane %v7827_v60, 3  ;;  %v906_v36 = vrot.slane %v7827_v60, 5  ;;  %v920_v26 = vrot.slane %v7827_v60, 7  ;;  %v6934_v55 = vld [vmem:[%s8931_s3 + $0x318] sm:$0xff]   ;;  %v6935_v59 = vld [vmem:[%s8931_s3 + $0x350] sm:$0xff]  }
 0x1ad   :  { %888 = vrot.lane.b32.xlu0 %v885_v9, %s7108_s23  ;;  %887 = vst.msk [vmem:[#allocation2 + $0x2a] sm:$0x1] %vm595_vm2, %v885_v9  ;;  %v1925_v15 = vrot.slane %v1844_v10, 2  ;;  %901 = vst.msk [vmem:[#allocation2 + $0x32] sm:$0x1] %vm595_vm2, %v899_v13  ;;  %v1924_v46 = vrot.slane %v1843_v43, 2 }
 0x1ae   :  { %6274 = vmatpush3.bf16.msra.mxu0 %v6905_v61  ;;  %6292 = vmatpush3.bf16.msra.mxu1 %v6906_v7  ;;  %915 = vst.msk [vmem:[#allocation2 + $0x3a] sm:$0x1] %vm595_vm2, %v913_v14  ;;  %v6936_v61 = vld [vmem:[%s8931_s3 + $0x3e0] sm:$0xff]   ;;  %v6938_v8 = vld [vmem:[%s8931_s3 + $0x310] sm:$0xff]   ;;  %v6939_v9 = vld [vmem:[%s8931_s3 + $0x348] sm:$0xff]  }
 0x1af   :  { %2194 = vmatprep.mubr.bf16.mxu1 %v1925_v15  ;;  %879 = vrot.lane.b32.xlu1 %v878_v22, %s7108_s23  ;;  %v6937_v7 = vld [vmem:[%s8931_s3 + $0x3a0] sm:$0xff]   ;;  %v6940_v10 = vld [vmem:[%s8931_s3 + $0x3d8] sm:$0xff]   ;;  %v6952_v43 = vld [vmem:[%s8931_s3 + $0x470] sm:$0xff]  }
 0x1b0   :  { %6275 = vmatprep.subr.bf16.mxu0 %v6907_v11  ;;  %6293 = vmatprep.subr.bf16.mxu1 %v6908_v12  ;;  %v6941_v11 = vld [vmem:[%s8931_s3 + $0x398] sm:$0xff]   ;;  %v6942_v12 = vld [vmem:[%s8931_s3 + $0x308] sm:$0xff]   ;;  %v6945_v15 = vld [vmem:[%s8931_s3 + $0x300] sm:$0xff]  }
 0x1b1   :  { %893 = vrot.lane.b32.xlu0 %v892_v25, %s7108_s23 }
 0x1b2   :  { %6276 = vmatpush3.bf16.msra.mxu0 %v6909_v16  ;;  %6294 = vmatpush3.bf16.msra.mxu1 %v6910_v17  ;;  %v6946_v16 = vld [vmem:[%s8931_s3 + $0x390] sm:$0xff]   ;;  %v6947_v17 = vld [vmem:[%s8931_s3 + $0x3c8] sm:$0xff]  }
 0x1b3   :  { %902 = vrot.lane.b32.xlu1 %v899_v13, %s7108_s23  ;;  %6277 = vmatprep.subr.bf16.mxu0 %v6911_v23  ;;  %v6943_v13 = vld [vmem:[%s8931_s3 + $0x340] sm:$0xff]   ;;  %v6948_v23 = vld [vmem:[%s8931_s3 + $0x478] sm:$0xff]  }
 0x1b4   :  { %6295 = vmatprep.subr.bf16.mxu1 %v6912_v29  ;;  %v6949_v29 = vld [vmem:[%s8931_s3 + $0x388] sm:$0xff]  }
 0x1b5   :  { %916 = vrot.lane.b32.xlu0 %v913_v14, %s7108_s23  ;;  %v6944_v14 = vld [vmem:[%s8931_s3 + $0x3d0] sm:$0xff]  }
 0x1b6   :  { %6278 = vmatpush3.bf16.msra.mxu0 %v6913_v30  ;;  %6296 = vmatpush3.bf16.msra.mxu1 %v6914_v31  ;;  %v6953_v30 = vld [vmem:[%s8931_s3 + $0x380] sm:$0xff]   ;;  %v6956_v31 = vld [vmem:[%s8931_s3 + $0x4f8] sm:$0xff]  }
 0x1b7   :  { %907 = vrot.lane.b32.xlu1 %v906_v36, %s7108_s23  ;;  %6297 = vmatprep.subr.bf16.mxu1 %v6915_v33 }
 0x1b8   :  { %6307 = vmatprep.subr.bf16.mxu0 %v6919_v34 }
 0x1b9   :  { %2155 = vmatmul.mubr.bf16.vlgmr.msra.gmra.mxu0 %v1922_v37  ;;  %921 = vrot.lane.b32.xlu0 %v920_v26, %s7108_s23 }
 0x1ba   :  { %6298 = vmatpush3.bf16.msra.mxu1 %v6916_v18  ;;  %6308 = vmatpush3.bf16.msra.mxu0 %v6920_v38 }
 0x1bb   :  { %6299 = vmatprep.subr.bf16.mxu1 %v6917_v44  ;;  %6309 = vmatprep.subr.bf16.mxu0 %v6921_v56 }
 0x1be   :  { %6300 = vmatpush3.bf16.msra.mxu1 %v6918_v27  ;;  %6310 = vmatpush3.bf16.msra.mxu0 %v6922_v58 }
 0x1bf   :  { %6311 = vmatprep.subr.bf16.mxu0 %v6923_v62  ;;  %6329 = vmatprep.subr.bf16.mxu1 %v6924_v63 }
 0x1c1   :  { %2195 = vmatmul.mubr.bf16.vlgmr.msra.gmra.mxu1 %v1924_v46 }
 0x1c2   :  { %6312 = vmatpush3.bf16.msra.mxu0 %v6925_v0  ;;  %6330 = vmatpush3.bf16.msra.mxu1 %v6926_v45  ;;  %v6954_v0 = vld [vmem:[%s8931_s3 + $0x430] sm:$0xff]  }
 0x1c3   :  { %6313 = vmatprep.subr.bf16.mxu0 %v6927_v47  ;;  %6331 = vmatprep.subr.bf16.mxu1 %v6928_v48 }
 0x1c6   :  { %6332 = vmatpush3.bf16.msra.mxu1 %v6929_v51  ;;  %6314 = vmatpush3.bf16.msra.mxu0 %v6930_v50  ;;  %v6957_v50 = vld [vmem:[%s8931_s3 + $0x428] sm:$0xff]  }
 0x1c7   :  { %6315 = vmatprep.subr.bf16.mxu0 %v6931_v52  ;;  %6333 = vmatprep.subr.bf16.mxu1 %v6932_v54  ;;  %v6958_v52 = vld [vmem:[%s8931_s3 + $0x4b8] sm:$0xff]  }
 0x1ca   :  { %6334 = vmatpush3.bf16.msra.mxu1 %v6933_v2  ;;  %6316 = vmatpush3.bf16.msra.mxu0 %v6934_v55  ;;  %v6959_v2 = vld [vmem:[%s8931_s3 + $0x460] sm:$0xff]   ;;  %v6960_v55 = vld [vmem:[%s8931_s3 + $0x4f0] sm:$0xff]  }
 0x1cb   :  { %6317 = vmatprep.subr.bf16.mxu0 %v6935_v59  ;;  %6335 = vmatprep.subr.bf16.mxu1 %v6936_v61 }
 0x1ce   :  { %6336 = vmatpush3.bf16.msra.mxu1 %v6937_v7  ;;  %6318 = vmatpush3.bf16.msra.mxu0 %v6938_v8 }
 0x1cf   :  { %6319 = vmatprep.subr.bf16.mxu0 %v6939_v9  ;;  %6337 = vmatprep.subr.bf16.mxu1 %v6940_v10  ;;  %v6961_v9 = vld [vmem:[%s8931_s3 + $0x420] sm:$0xff]   ;;  %v6962_v10 = vld [vmem:[%s8931_s3 + $0x4b0] sm:$0xff]  }
 0x1d2   :  { %6338 = vmatpush3.bf16.msra.mxu1 %v6941_v11  ;;  %6320 = vmatpush3.bf16.msra.mxu0 %v6942_v12 }
 0x1d3   :  { %6321 = vmatprep.subr.bf16.mxu0 %v6943_v13  ;;  %6339 = vmatprep.subr.bf16.mxu1 %v6944_v14  ;;  %v6965_v14 = vld [vmem:[%s8931_s3 + $0x418] sm:$0xff]  }
 0x1d6   :  { %6322 = vmatpush3.bf16.msra.mxu0 %v6945_v15  ;;  %6340 = vmatpush3.bf16.msra.mxu1 %v6946_v16  ;;  %v6966_v15 = vld [vmem:[%s8931_s3 + $0x4a8] sm:$0xff]  }
 0x1d7   :  { %6341 = vmatprep.subr.bf16.mxu1 %v6947_v17  ;;  %6351 = vmatprep.subr.bf16.mxu0 %v6948_v23 }
 0x1da   :  { %6342 = vmatpush3.bf16.msra.mxu1 %v6949_v29  ;;  %v6968_v29 = vld [vmem:[%s8931_s3 + $0x4e0] sm:$0xff]  }
 0x1db   :  { %6343 = vmatprep.subr.bf16.mxu1 %v6951_v20 }
 0x1de   :  { %6344 = vmatpush3.bf16.msra.mxu1 %v6953_v30 }
 0x1df   :  { %6373 = vmatprep.subr.bf16.mxu1 %v6956_v31 }
 0x1f9   :  { %v765_v32 = vpop.permute.xlu1 %764 }
 0x1fa   :  { %767 = vst.msk [vmem:[#allocation2 + $0x7] sm:$0x1] %vm595_vm2, %v765_v32  ;;  %v6969_v32 = vld [vmem:[%s8931_s3 + $0x410] sm:$0xff]  }
 0x1fb   :  { %774 = vst.msk [vmem:[#allocation2 + $0x7] sm:$0x1] %vm606_vm3, %v768_v35  ;;  %v779_v33 = vpop.permute.xlu0 %778 }
 0x1fc   :  { %781 = vst.msk [vmem:[#allocation2 + $0xf] sm:$0x1] %vm595_vm2, %v779_v33  ;;  %v6970_v33 = vld [vmem:[%s8931_s3 + $0x4a0] sm:$0xff]  }
 0x1fd   :  { %788 = vst.msk [vmem:[#allocation2 + $0xf] sm:$0x1] %vm606_vm3, %v782_v41  ;;  %v770_v34 = vpop.permute.xlu1 %769 }
 0x1fe   :  { %772 = vst.msk [vmem:[#allocation2 + $0x6] sm:$0x1] %vm606_vm3, %v770_v34  ;;  %v6971_v34 = vld [vmem:[%s8931_s3 + $0x448] sm:$0xff]  }
 0x1ff   :  { %v784_v18 = vpop.permute.xlu0 %783 }
 0x200   :  { %786 = vst.msk [vmem:[#allocation2 + $0xe] sm:$0x1] %vm606_vm3, %v784_v18 }
 0x201   :  { %v793_v38 = vpop.permute.xlu1 %792 }
 0x202   :  { %795 = vst.msk [vmem:[#allocation2 + $0x17] sm:$0x1] %vm595_vm2, %v793_v38  ;;  %v6972_v38 = vld [vmem:[%s8931_s3 + $0x4d8] sm:$0xff]  }
 0x203   :  { %802 = vst.msk [vmem:[#allocation2 + $0x17] sm:$0x1] %vm606_vm3, %v796_v53  ;;  %v807_v35 = vpop.permute.xlu0 %806 }
 0x204   :  { %809 = vst.msk [vmem:[#allocation2 + $0x1f] sm:$0x1] %vm595_vm2, %v807_v35 }
 0x205   :  { %816 = vst.msk [vmem:[#allocation2 + $0x1f] sm:$0x1] %vm606_vm3, %v810_v5  ;;  %v798_v41 = vpop.permute.xlu1 %797  ;;  %v2242_v37 = vld [vmem:[#allocation2] sm:$0xc0] }
 0x206   :  { %800 = vst.msk [vmem:[#allocation2 + $0x16] sm:$0x1] %vm606_vm3, %v798_v41  ;;  %v2246_v57 = vpack.c.bf16 %v2242_v37, %v2242_v37  ;;  %v6973_v41 = vld [vmem:[%s8931_s3 + $0x408] sm:$0xff]   ;;  %v6974_v37 = vld [vmem:[%s8931_s3 + $0x498] sm:$0xff]  }
 0x207   :  { %v812_v44 = vpop.permute.xlu0 %811  ;;  %v2243_v56 = vld [vmem:[#allocation2 + $0x8] sm:$0xc0] }
 0x208   :  { %814 = vst.msk [vmem:[#allocation2 + $0x1e] sm:$0x1] %vm606_vm3, %v812_v44  ;;  %v2247_v27 = vpack.c.bf16 %v2243_v56, %v2243_v56  ;;  %v2327_v5 = vrot.slane %v2246_v57, 3  ;;  %v6976_v57 = vld [vmem:[%s8931_s3 + $0x4d0] sm:$0xff]  }
 0x209   :  { %v834_v58 = vpop.permute.xlu1 %833 }
 0x20a   :  { %836 = vst.msk [vmem:[#allocation2 + $0x29] sm:$0x1] %vm595_vm2, %v834_v58  ;;  %v2328_v53 = vrot.slane %v2247_v27, 3  ;;  %v6978_v58 = vld [vmem:[%s8931_s3 + $0x490] sm:$0xff]  }
 0x20b   :  { %843 = vst.msk [vmem:[#allocation2 + $0x29] sm:$0x1] %vm606_vm3, %v837_v24  ;;  %v6955_v24 = vld [vmem:[%s8931_s3 + $0x468] sm:$0xff]  }
 0x20c   :  { %2559 = vmatprep.mubr.bf16.mxu0 %v2328_v53 }
 0x20d   :  { %2560 = vmatmul.mubr.bf16.vlgmr.msra.gmra.mxu0 %v2327_v5  ;;  %v839_v62 = vpop.permute.xlu1 %838  ;;  %v2244_v63 = vld [vmem:[#allocation2 + $0x10] sm:$0xc0] }
 0x20e   :  { %6352 = vmatpush3.bf16.msra.mxu0 %v6950_v19  ;;  %841 = vst.msk [vmem:[#allocation2 + $0x28] sm:$0x1] %vm606_vm3, %v839_v62  ;;  %v2248_v46 = vpack.c.bf16 %v2244_v63, %v2244_v63  ;;  %v6979_v19 = vld [vmem:[%s8931_s3 + $0x4c8] sm:$0xff]   ;;  %v6980_v63 = vld [vmem:[%s8931_s3 + $0x578] sm:$0xff]  }
 0x20f   :  { %6353 = vmatprep.subr.bf16.mxu0 %v6952_v43  ;;  %v2245_v45 = vld [vmem:[#allocation2 + $0x18] sm:$0xc0] }
 0x210   :  { %v2249_v47 = vpack.c.bf16 %v2245_v45, %v2245_v45  ;;  %v2329_v54 = vrot.slane %v2248_v46, 3  ;;  %v6981_v45 = vld [vmem:[%s8931_s3 + $0x488] sm:$0xff]  }
 0x211   :  { %v862_v48 = vpop.permute.xlu1 %861 }
 0x212   :  { %6354 = vmatpush3.bf16.msra.mxu0 %v6954_v0  ;;  %864 = vst.msk [vmem:[#allocation2 + $0x39] sm:$0x1] %vm595_vm2, %v862_v48  ;;  %v2330_v51 = vrot.slane %v2249_v47, 3  ;;  %v6983_v47 = vld [vmem:[%s8931_s3 + $0x4c0] sm:$0xff]  }
 0x213   :  { %871 = vst.msk [vmem:[#allocation2 + $0x39] sm:$0x1] %vm606_vm3, %v865_v28  ;;  %6355 = vmatprep.subr.bf16.mxu0 %v6955_v24  ;;  %v6982_v24 = vld [vmem:[%s8931_s3 + $0x538] sm:$0xff]  }
 0x214   :  { %v572_v59 = vpop.permute.xlu0 %571  ;;  %2599 = vmatprep.mubr.bf16.mxu1 %v2330_v51  ;;  %v6984_v51 = vld [vmem:[%s8931_s3 + $0x570] sm:$0xff]  }
 0x215   :  { %v585_v61 = vadd.f32 %v572_v59, %v529_v49  ;;  %2600 = vmatmul.mubr.bf16.vlgmr.msra.gmra.mxu1 %v2329_v54  ;;  %v867_v7 = vpop.permute.xlu1 %866  ;;  %v2648_v8 = vld [vmem:[#allocation2 + $0x28] sm:$0x3]  ;;  %v6985_v54 = vld [vmem:[%s8931_s3 + $0x480] sm:$0xff]  }
 0x216   :  { %6356 = vmatpush3.bf16.msra.mxu0 %v6957_v50  ;;  %6374 = vmatpush3.bf16.msra.mxu1 %v6958_v52  ;;  %869 = vst.msk [vmem:[#allocation2 + $0x38] sm:$0x1] %vm606_vm3, %v867_v7  ;;  %v2652_v28 = vpack.c.bf16 %v2648_v8, %v2648_v8  ;;  %v6964_v49 = vld [vmem:[%s8931_s3 + $0x4e8] sm:$0xff]   ;;  %v6988_v7 = vld [vmem:[%s8931_s3 + $0x5f8] sm:$0xff]  }
 0x217   :  { %v8068_v11 = vmax.f32 %v585_v61, 0.0  ;;  %6357 = vmatprep.subr.bf16.mxu0 %v6959_v2  ;;  %6375 = vmatprep.subr.bf16.mxu1 %v6960_v55  ;;  %v6986_v2 = vld [vmem:[%s8931_s3 + $0x530] sm:$0xff]   ;;  %v6987_v55 = vld [vmem:[%s8931_s3 + $0x568] sm:$0xff]  }
 0x218   :  { %v820_v40 = vpop.permute.xlu0 %819  ;;  %2952 = vmatprep.mubr.bf16.mxu0 %v2652_v28  ;;  %v6990_v28 = vld [vmem:[%s8931_s3 + $0x5b8] sm:$0xff]  }
 0x219   :  { %927 = vst.msk [vmem:[#allocation2 + $0x24] sm:$0x1] %vm595_vm2, %v8068_v11  ;;  %822 = vst.msk [vmem:[#allocation2 + $0x21] sm:$0x1] %vm595_vm2, %v820_v40  ;;  %929 = vrot.lane.b32.xlu1 %v8068_v11, %s7108_s23  ;;  %v940_v12 = vrot.slane %v8068_v11, 2  ;;  %v954_v13 = vrot.slane %v8068_v11, 4 }
 0x21a   :  { %829 = vst.msk [vmem:[#allocation2 + $0x21] sm:$0x1] %vm606_vm3, %v823_v42  ;;  %6358 = vmatpush3.bf16.msra.mxu0 %v6961_v9  ;;  %6376 = vmatpush3.bf16.msra.mxu1 %v6962_v10  ;;  %v968_v16 = vrot.slane %v8068_v11, 6  ;;  %v933_v17 = vrot.slane %v8068_v11, 1  ;;  %v6967_v42 = vld [vmem:[%s8931_s3 + $0x450] sm:$0xff]   ;;  %v947_v20 = vrot.slane %v8068_v11, 3 }
 0x21b   :  { %943 = vrot.lane.b32.xlu0 %v940_v12, %s7108_s23  ;;  %942 = vst.msk [vmem:[#allocation2 + $0x2c] sm:$0x1] %vm595_vm2, %v940_v12  ;;  %6359 = vmatprep.subr.bf16.mxu0 %v6963_v39  ;;  %956 = vst.msk [vmem:[#allocation2 + $0x34] sm:$0x1] %vm595_vm2, %v954_v13  ;;  %v961_v1 = vrot.slane %v8068_v11, 5  ;;  %v975_v3 = vrot.slane %v8068_v11, 7 }
 0x21c   :  { %6377 = vmatprep.subr.bf16.mxu1 %v6964_v49  ;;  %v825_v23 = vpop.permute.xlu0 %824  ;;  %970 = vst.msk [vmem:[#allocation2 + $0x3c] sm:$0x1] %vm595_vm2, %v968_v16  ;;  %v6992_v39 = vld [vmem:[%s8931_s3 + $0x5f0] sm:$0xff]   ;;  %v7046_v11 = vld [vmem:[%s8931_s3 + $0x738] sm:$0xff]  }
 0x21d   :  { %827 = vst.msk [vmem:[#allocation2 + $0x20] sm:$0x1] %vm606_vm3, %v825_v23  ;;  %934 = vrot.lane.b32.xlu1 %v933_v17, %s7108_s23  ;;  %v2650_v30 = vld [vmem:[#allocation2 + $0x38] sm:$0x3] }
 0x21e   :  { %6360 = vmatpush3.bf16.msra.mxu0 %v6965_v14  ;;  %6378 = vmatpush3.bf16.msra.mxu1 %v6966_v15  ;;  %v2654_v31 = vpack.c.bf16 %v2650_v30, %v2650_v30  ;;  %v6994_v14 = vld [vmem:[%s8931_s3 + $0x5b0] sm:$0xff]   ;;  %v6998_v30 = vld [vmem:[%s8931_s3 + $0x5a8] sm:$0xff]  }
 0x21f   :  { %948 = vrot.lane.b32.xlu0 %v947_v20, %s7108_s23  ;;  %6361 = vmatprep.subr.bf16.mxu0 %v6967_v42  ;;  %v6996_v42 = vld [vmem:[%s8931_s3 + $0x5e8] sm:$0xff]  }
 0x220   :  { %6379 = vmatprep.subr.bf16.mxu1 %v6968_v29  ;;  %2992 = vmatprep.mubr.bf16.mxu1 %v2654_v31  ;;  %v848_v18 = vpop.permute.xlu0 %847  ;;  %v6997_v29 = vld [vmem:[%s8931_s3 + $0x518] sm:$0xff]  }
 0x221   :  { %850 = vst.msk [vmem:[#allocation2 + $0x31] sm:$0x1] %vm595_vm2, %v848_v18  ;;  %957 = vrot.lane.b32.xlu1 %v954_v13, %s7108_s23  ;;  %v6993_v13 = vld [vmem:[%s8931_s3 + $0x520] sm:$0xff]  }
 0x222   :  { %857 = vst.msk [vmem:[#allocation2 + $0x31] sm:$0x1] %vm606_vm3, %v851_v21  ;;  %6362 = vmatpush3.bf16.msra.mxu0 %v6969_v32  ;;  %6380 = vmatpush3.bf16.msra.mxu1 %v6970_v33  ;;  %v577_v35 = vpop.permute.xlu1 %576  ;;  %v6975_v21 = vld [vmem:[%s8931_s3 + $0x440] sm:$0xff]   ;;  %v6999_v32 = vld [vmem:[%s8931_s3 + $0x550] sm:$0xff]  }
 0x223   :  { %v586_v44 = vadd.f32 %v577_v35, %v530_v6  ;;  %971 = vrot.lane.b32.xlu0 %v968_v16, %s7108_s23  ;;  %6363 = vmatprep.subr.bf16.mxu0 %v6971_v34  ;;  %v6977_v6 = vld [vmem:[%s8931_s3 + $0x400] sm:$0xff]   ;;  %v6995_v16 = vld [vmem:[%s8931_s3 + $0x558] sm:$0xff]   ;;  %v7001_v35 = vld [vmem:[%s8931_s3 + $0x510] sm:$0xff]  }
 0x224   :  { %6381 = vmatprep.subr.bf16.mxu1 %v6972_v38  ;;  %v853_v56 = vpop.permute.xlu0 %852  ;;  %v2647_v62 = vld [vmem:[#allocation2 + $0x20] sm:$0x3] }
 0x225   :  { %v8146_v27 = vmax.f32 %v586_v44, 0.0  ;;  %855 = vst.msk [vmem:[#allocation2 + $0x30] sm:$0x1] %vm606_vm3, %v853_v56  ;;  %962 = vrot.lane.b32.xlu1 %v961_v1, %s7108_s23  ;;  %v2651_v46 = vpack.c.bf16 %v2647_v62, %v2647_v62  ;;  %v7000_v33 = vld [vmem:[%s8931_s3 + $0x5e0] sm:$0xff]  }
 0x226   :  { %6364 = vmatpush3.bf16.msra.mxu0 %v6973_v41  ;;  %6382 = vmatpush3.bf16.msra.mxu1 %v6974_v37  ;;  %v875_v4 = vpop.permute.xlu1 %874  ;;  %v7002_v41 = vld [vmem:[%s8931_s3 + $0x5a0] sm:$0xff]   ;;  %v7109_v37 = vmov 1966171168  }
 0x227   :  { %982 = vst.msk [vmem:[#allocation2 + $0x26] sm:$0x1] %vm595_vm2, %v8146_v27  ;;  %877 = vst.msk [vmem:[#allocation2 + $0x23] sm:$0x1] %vm595_vm2, %v875_v4  ;;  %976 = vrot.lane.b32.xlu0 %v975_v3, %s7108_s23  ;;  %6365 = vmatprep.subr.bf16.mxu0 %v6975_v21  ;;  %v995_v53 = vrot.slane %v8146_v27, 2  ;;  %v1009_v5 = vrot.slane %v8146_v27, 4  ;;  %v1394_v44 = vunpack.c.l.s4 %v7109_v37  ;;  %v1396_v21 = vlaneseq }
 0x228   :  { %884 = vst.msk [vmem:[#allocation2 + $0x23] sm:$0x1] %vm606_vm3, %v878_v22  ;;  %6383 = vmatprep.subr.bf16.mxu1 %v6976_v57  ;;  %v889_v43 = vpop.permute.xlu0 %888  ;;  %v1023_v0 = vrot.slane %v8146_v27, 6  ;;  %v1002_v50 = vrot.slane %v8146_v27, 3  ;;  %v1016_v60 = vrot.slane %v8146_v27, 5  ;;  %v1030_v49 = vrot.slane %v8146_v27, 7 }
 0x229   :  { %891 = vst.msk [vmem:[#allocation2 + $0x2b] sm:$0x1] %vm595_vm2, %v889_v43  ;;  %984 = vrot.lane.b32.xlu1 %v8146_v27, %s7108_s23  ;;  %997 = vst.msk [vmem:[#allocation2 + $0x2e] sm:$0x1] %vm595_vm2, %v995_v53  ;;  %v7003_v4 = vld [vmem:[%s8931_s3 + $0x548] sm:$0xff]   ;;  %v1395_v43 = vunpack.c.0.s8 %v1394_v44  ;;  %v8299_v62 = vshrl.u32 %v1396_v21, 7 }
 0x22a   :  { %1011 = vst.msk [vmem:[#allocation2 + $0x36] sm:$0x1] %vm595_vm2, %v1009_v5  ;;  %6366 = vmatpush3.bf16.msra.mxu0 %v6977_v6  ;;  %6384 = vmatpush3.bf16.msra.mxu1 %v6978_v58  ;;  %v880_v22 = vpop.permute.xlu1 %879  ;;  %1025 = vst.msk [vmem:[#allocation2 + $0x3e] sm:$0x1] %vm595_vm2, %v1023_v0  ;;  %v7004_v6 = vld [vmem:[%s8931_s3 + $0x5d8] sm:$0xff]   ;;  %v7025_v37 = vld [vmem:[%s8931_s3 + $0x6b0] sm:$0xff]  }
 0x22b   :  { %898 = vst.msk [vmem:[#allocation2 + $0x2b] sm:$0x1] %vm606_vm3, %v892_v25  ;;  %882 = vst.msk [vmem:[#allocation2 + $0x22] sm:$0x1] %vm606_vm3, %v880_v22  ;;  %998 = vrot.lane.b32.xlu0 %v995_v53, %s7108_s23  ;;  %6385 = vmatprep.subr.bf16.mxu1 %v6979_v19  ;;  %v988_v25 = vrot.slane %v8146_v27, 1  ;;  %v7026_v44 = vld [vmem:[%s8931_s3 + $0x620] sm:$0xff]  }
 0x22c   :  { %6395 = vmatprep.subr.bf16.mxu0 %v6980_v63  ;;  %v894_v48 = vpop.permute.xlu0 %893  ;;  %v2649_v61 = vld [vmem:[#allocation2 + $0x30] sm:$0x3]  ;;  %v5409_v53 = vld [vmem:[%s8932_s4] ss:$0 sm:$0xff]  ;;  %v7005_v63 = vld [vmem:[%s8931_s3 + $0x508] sm:$0xff]  }
 0x22d   :  { %2953 = vmatmul.mubr.bf16.vlgmr.msra.gmra.mxu0 %v2651_v46  ;;  %896 = vst.msk [vmem:[#allocation2 + $0x2a] sm:$0x1] %vm606_vm3, %v894_v48  ;;  %989 = vrot.lane.b32.xlu1 %v988_v25, %s7108_s23  ;;  %v2653_v9 = vpack.c.bf16 %v2649_v61, %v2649_v61  ;;  %v7059_v27 = vld [vmem:[%s8931_s3 + $0x758] sm:$0xff]  }
 0x22e   :  { %6386 = vmatpush3.bf16.msra.mxu1 %v6981_v45  ;;  %6396 = vmatpush3.bf16.msra.mxu0 %v6982_v24  ;;  %v903_v52 = vpop.permute.xlu1 %902  ;;  %v7007_v45 = vld [vmem:[%s8931_s3 + $0x540] sm:$0xff]   ;;  %v7008_v24 = vld [vmem:[%s8931_s3 + $0x5d0] sm:$0xff]  }
 0x22f   :  { %905 = vst.msk [vmem:[#allocation2 + $0x33] sm:$0x1] %vm595_vm2, %v903_v52  ;;  %1003 = vrot.lane.b32.xlu0 %v1002_v50, %s7108_s23  ;;  %6387 = vmatprep.subr.bf16.mxu1 %v6983_v47 }
 0x230   :  { %912 = vst.msk [vmem:[#allocation2 + $0x33] sm:$0x1] %vm606_vm3, %v906_v36  ;;  %6397 = vmatprep.subr.bf16.mxu0 %v6984_v51  ;;  %v917_v59 = vpop.permute.xlu0 %916  ;;  %v6989_v36 = vld [vmem:[%s8931_s3 + $0x528] sm:$0xff]  }
 0x231   :  { %919 = vst.msk [vmem:[#allocation2 + $0x3b] sm:$0x1] %vm595_vm2, %v917_v59  ;;  %1012 = vrot.lane.b32.xlu1 %v1009_v5, %s7108_s23  ;;  %v7110_v5 = vmov 0.0  }
 0x232   :  { %926 = vst.msk [vmem:[#allocation2 + $0x3b] sm:$0x1] %vm606_vm3, %v920_v26  ;;  %6388 = vmatpush3.bf16.msra.mxu1 %v6985_v54  ;;  %6398 = vmatpush3.bf16.msra.mxu0 %v6986_v2  ;;  %v908_v8 = vpop.permute.xlu1 %907  ;;  %v6991_v26 = vld [vmem:[%s8931_s3 + $0x560] sm:$0xff]   ;;  %v8314_v54 = vsub.s32 %v1395_v43, %v8299_v62 }
 0x233   :  { %910 = vst.msk [vmem:[#allocation2 + $0x32] sm:$0x1] %vm606_vm3, %v908_v8  ;;  %1026 = vrot.lane.b32.xlu0 %v1023_v0, %s7108_s23  ;;  %6399 = vmatprep.subr.bf16.mxu0 %v6987_v55  ;;  %v7006_v0 = vld [vmem:[%s8931_s3 + $0x598] sm:$0xff]   ;;  %v3040_v48 = vld [vmem:[#allocation2 + $0x20] sm:$0xc]  ;;  %v7010_v55 = vld [vmem:[%s8931_s3 + $0x590] sm:$0xff]  }
 0x234   :  { %6417 = vmatprep.subr.bf16.mxu1 %v6988_v7  ;;  %v922_v10 = vpop.permute.xlu0 %921  ;;  %v3041_v40 = vld [vmem:[#allocation2 + $0x28] sm:$0xc]  ;;  %1038 = vst.msk [vmem:[#allocation3] sm:$0xff] %vm1037_vm4, %v7110_v5  ;;  %1039 = vst.msk [vmem:[#allocation3 + $0x8] sm:$0xff] %vm1037_vm4, %v7110_v5  ;;  %v7009_v2 = vld [vmem:[%s8931_s3 + $0x500] sm:$0xff]   ;;  %v3044_v61 = vpack.c.bf16 %v3040_v48, %v3040_v48 }
 0x235   :  { %2993 = vmatmul.mubr.bf16.vlgmr.msra.gmra.mxu1 %v2653_v9  ;;  %924 = vst.msk [vmem:[#allocation2 + $0x3a] sm:$0x1] %vm606_vm3, %v922_v10  ;;  %1017 = vrot.lane.b32.xlu1 %v1016_v60, %s7108_s23  ;;  %v3045_v12 = vpack.c.bf16 %v3041_v40, %v3041_v40  ;;  %v7011_v7 = vld [vmem:[%s8931_s3 + $0x5c8] sm:$0xff]   ;;  %v7015_v8 = vld [vmem:[%s8931_s3 + $0x678] sm:$0xff]   ;;  %v7013_v40 = vld [vmem:[%s8931_s3 + $0x5c0] sm:$0xff]  }
 0x236   :  { %6400 = vmatpush3.bf16.msra.mxu0 %v6989_v36  ;;  %6418 = vmatpush3.bf16.msra.mxu1 %v6990_v28  ;;  %4344 = vst.msk [vmem:[#allocation5] sm:$0xff] %vm1037_vm4, %v7110_v5  ;;  %4345 = vst.msk [vmem:[#allocation5 + $0x8] sm:$0xff] %vm1037_vm4, %v7110_v5  ;;  %v7012_v9 = vld [vmem:[%s8931_s3 + $0x588] sm:$0xff]   ;;  %v7016_v10 = vld [vmem:[%s8931_s3 + $0x638] sm:$0xff]  }
 0x237   :  { %1031 = vrot.lane.b32.xlu0 %v1030_v49, %s7108_s23  ;;  %6401 = vmatprep.subr.bf16.mxu0 %v6991_v26  ;;  %v3126_v15 = vrot.slane %v3045_v12, 1  ;;  %4346 = vst.msk [vmem:[#allocation5 + $0x10] sm:$0xff] %vm1037_vm4, %v7110_v5  ;;  %4347 = vst.msk [vmem:[#allocation5 + $0x18] sm:$0xff] %vm1037_vm4, %v7110_v5  ;;  %v8333_v26 = vsub.s32 0, %v8299_v62  ;;  %v7017_v12 = vld [vmem:[%s8931_s3 + $0x670] sm:$0xff]   ;;  %v7032_v43 = vld [vmem:[%s8931_s3 + $0x6e0] sm:$0xff]  }
 0x238   :  { %6419 = vmatprep.subr.bf16.mxu1 %v6992_v39  ;;  %v3125_v39 = vrot.slane %v3044_v61, 1  ;;  %v5507_v48 = vld [vmem:[%s8932_s4 + $0x1] ss:$0 sm:$0xff]  ;;  %v7040_v61 = vld [vmem:[%s8931_s3 + $0x6d0] sm:$0xff]  }
 0x239   :  { %v6191_v23 = vpop.f32.mrf.mxu0  ;;  %3357 = vmatprep.mubr.bf16.mxu0 %v3126_v15 }
 0x23a   :  { %6402 = vmatpush3.bf16.msra.mxu0 %v6993_v13  ;;  %6420 = vmatpush3.bf16.msra.mxu1 %v6994_v14  ;;  %v3042_v15 = vld [vmem:[#allocation2 + $0x30] sm:$0xc] }
 0x23b   :  { %v6192_v31 = vpop.f32.mrf.mxu0  ;;  %6403 = vmatprep.subr.bf16.mxu0 %v6995_v16  ;;  %6421 = vmatprep.subr.bf16.mxu1 %v6996_v42  ;;  %v7014_v42 = vld [vmem:[%s8931_s3 + $0x580] sm:$0xff]  }
 0x23c   :  { %v3043_v34 = vld [vmem:[#allocation2 + $0x38] sm:$0xc]  ;;  %v6193_v58 = vadd.f32 %v6192_v31, %v6191_v23  ;;  %v7019_v31 = vld [vmem:[%s8931_s3 + $0x668] sm:$0xff]  }
 0x23d   :  { %v6194_v18 = vpop.f32.mrf.mxu0  ;;  %v3047_v38 = vpack.c.bf16 %v3043_v34, %v3043_v34  ;;  %v7021_v34 = vld [vmem:[%s8931_s3 + $0x628] sm:$0xff]  }
 0x23e   :  { %6404 = vmatpush3.bf16.msra.mxu0 %v6997_v29  ;;  %6422 = vmatpush3.bf16.msra.mxu1 %v6998_v30  ;;  %v1346_v46 = vadd.f32 %v6193_v58, %v5409_v53  ;;  %v7018_v29 = vld [vmem:[%s8931_s3 + $0x630] sm:$0xff]   ;;  %v3046_v30 = vpack.c.bf16 %v3042_v15, %v3042_v15  ;;  %v7022_v18 = vld [vmem:[%s8931_s3 + $0x6b8] sm:$0xff]   ;;  %v7045_v15 = vld [vmem:[%s8931_s3 + $0x688] sm:$0xff]  }
 0x23f   :  { %v6195_v56 = vpop.f32.mrf.mxu0  ;;  %6405 = vmatprep.subr.bf16.mxu0 %v6999_v32  ;;  %6423 = vmatprep.subr.bf16.mxu1 %v7000_v33  ;;  %v3128_v57 = vrot.slane %v3047_v38, 1  ;;  %v7020_v32 = vld [vmem:[%s8931_s3 + $0x6f8] sm:$0xff]  }
 0x240   :  { %v3127_v38 = vrot.slane %v3046_v30, 1  ;;  %v7027_v56 = vld [vmem:[%s8931_s3 + $0x658] sm:$0xff]  }
 0x241   :  { %v6213_v19 = vpop.f32.mrf.mxu1  ;;  %3397 = vmatprep.mubr.bf16.mxu1 %v3128_v57  ;;  %v7028_v57 = vld [vmem:[%s8931_s3 + $0x6e8] sm:$0xff]   ;;  %v7030_v58 = vld [vmem:[%s8931_s3 + $0x618] sm:$0xff]  }
 0x242   :  { %6406 = vmatpush3.bf16.msra.mxu0 %v7001_v35  ;;  %6424 = vmatpush3.bf16.msra.mxu1 %v7002_v41  ;;  %v7023_v35 = vld [vmem:[%s8931_s3 + $0x660] sm:$0xff]   ;;  %v7024_v41 = vld [vmem:[%s8931_s3 + $0x6f0] sm:$0xff]  }
 0x243   :  { %v6214_v22 = vpop.f32.mrf.mxu1  ;;  %6407 = vmatprep.subr.bf16.mxu0 %v7003_v4  ;;  %6425 = vmatprep.subr.bf16.mxu1 %v7004_v6  ;;  %v7029_v6 = vld [vmem:[%s8931_s3 + $0x6a8] sm:$0xff]  }
 0x244   :  { %v6215_v47 = vadd.f32 %v6214_v22, %v6213_v19  ;;  %v7031_v19 = vld [vmem:[%s8931_s3 + $0x650] sm:$0xff]  }
 0x245   :  { %v6216_v51 = vpop.f32.mrf.mxu1  ;;  %v7034_v22 = vld [vmem:[%s8931_s3 + $0x610] sm:$0xff]  }
 0x246   :  { %v1386_v52 = vadd.f32 %v6215_v47, %v1346_v46  ;;  %6408 = vmatpush3.bf16.msra.mxu0 %v7005_v63  ;;  %6426 = vmatpush3.bf16.msra.mxu1 %v7006_v0  ;;  %v7033_v0 = vld [vmem:[%s8931_s3 + $0x6a0] sm:$0xff]   ;;  %v7036_v46 = vld [vmem:[%s8931_s3 + $0x6d8] sm:$0xff]  }
 0x247   :  { %v6217_v59 = vpop.f32.mrf.mxu1  ;;  %6409 = vmatprep.subr.bf16.mxu0 %v7007_v45  ;;  %6427 = vmatprep.subr.bf16.mxu1 %v7008_v24  ;;  %v7035_v24 = vld [vmem:[%s8931_s3 + $0x648] sm:$0xff]  }
 0x248   :  { %v1391_v36 = vmax.f32 %v1386_v52, 0.0  ;;  %v7037_v52 = vld [vmem:[%s8931_s3 + $0x698] sm:$0xff]   ;;  %v7039_v59 = vld [vmem:[%s8931_s3 + $0x640] sm:$0xff]  }
 0x24a   :  { %v1399_v28 = vrot.slane %v1391_v36, %v8314_v54  ;;  %6410 = vmatpush3.bf16.msra.mxu0 %v7009_v2  ;;  %6428 = vmatpush3.bf16.msra.mxu1 %v7010_v55  ;;  %v7038_v2 = vld [vmem:[%s8931_s3 + $0x608] sm:$0xff]  }
 0x24b   :  { %6429 = vmatprep.subr.bf16.mxu1 %v7011_v7  ;;  %6439 = vmatprep.subr.bf16.mxu0 %v7015_v8 }
 0x24c   :  { %v1400_v13 = vcombine.high %v1399_v28, %v1399_v28  ;;  %v1407_v14 = vrot.slane %v1399_v28, %v8314_v54 }
 0x24d   :  { %3358 = vmatmul.mubr.bf16.vlgmr.msra.gmra.mxu0 %v3125_v39 }
 0x24e   :  { %6430 = vmatpush3.bf16.msra.mxu1 %v7012_v9  ;;  %v1418_v16 = vrot.slane %v1407_v14, %v8333_v26  ;;  %v1414_v23 = vrot.slane %v1400_v13, %v8314_v54  ;;  %6440 = vmatpush3.bf16.msra.mxu0 %v7016_v10  ;;  %v7041_v9 = vld [vmem:[%s8931_s3 + $0x690] sm:$0xff]   ;;  %v7042_v10 = vld [vmem:[%s8931_s3 + $0x600] sm:$0xff]  }
 0x24f   :  { %6431 = vmatprep.subr.bf16.mxu1 %v7013_v40  ;;  %6441 = vmatprep.subr.bf16.mxu0 %v7017_v12  ;;  %v7043_v40 = vld [vmem:[%s8931_s3 + $0x6c8] sm:$0xff]   ;;  %v7044_v12 = vld [vmem:[%s8931_s3 + $0x778] sm:$0xff]  }
 0x250   :  { %1423 = vrot.lane.b32.xlu0 %v1418_v16, %s7111_s21  ;;  %v1422_v33 = vrot.slane %v1414_v23, %v8333_v26  ;;  %v7047_v16 = vld [vmem:[%s8931_s3 + $0x6c0] sm:$0xff]  }
 0x252   :  { %6432 = vmatpush3.bf16.msra.mxu1 %v7014_v42  ;;  %6442 = vmatpush3.bf16.msra.mxu0 %v7018_v29 }
 0x253   :  { %6443 = vmatprep.subr.bf16.mxu0 %v7019_v31  ;;  %6461 = vmatprep.subr.bf16.mxu1 %v7020_v32  ;;  %v7049_v31 = vld [vmem:[%s8931_s3 + $0x680] sm:$0xff]   ;;  %v7052_v32 = vld [vmem:[%s8931_s3 + $0x7f8] sm:$0xff]  }
 0x254   :  { %1425 = vrot.lane.b32.xlu0 %v1422_v33, %s7111_s21 }
 0x255   :  { %3398 = vmatmul.mubr.bf16.vlgmr.msra.gmra.mxu1 %v3127_v38 }
 0x256   :  { %6444 = vmatpush3.bf16.msra.mxu0 %v7021_v34  ;;  %6462 = vmatpush3.bf16.msra.mxu1 %v7022_v18 }
 0x257   :  { %6445 = vmatprep.subr.bf16.mxu0 %v7023_v35  ;;  %6463 = vmatprep.subr.bf16.mxu1 %v7024_v41 }
 0x259   :  { %v6235_v4 = vpop.f32.mrf.mxu0 }
 0x25a   :  { %6464 = vmatpush3.bf16.msra.mxu1 %v7025_v37  ;;  %6446 = vmatpush3.bf16.msra.mxu0 %v7026_v44  ;;  %v5605_v37 = vld [vmem:[%s8932_s4 + $0x2] ss:$0 sm:$0xff] }
 0x25b   :  { %v6236_v53 = vpop.f32.mrf.mxu0  ;;  %6447 = vmatprep.subr.bf16.mxu0 %v7027_v56  ;;  %6465 = vmatprep.subr.bf16.mxu1 %v7028_v57 }
 0x25c   :  { %v6237_v47 = vadd.f32 %v6236_v53, %v6235_v4 }
 0x25d   :  { %v6238_v63 = vpop.f32.mrf.mxu0 }
 0x25e   :  { %6466 = vmatpush3.bf16.msra.mxu1 %v7029_v6  ;;  %6448 = vmatpush3.bf16.msra.mxu0 %v7030_v58  ;;  %v1752_v7 = vadd.f32 %v6237_v47, %v5507_v48 }
 0x25f   :  { %v6239_v45 = vpop.f32.mrf.mxu0  ;;  %6449 = vmatprep.subr.bf16.mxu0 %v7031_v19  ;;  %6467 = vmatprep.subr.bf16.mxu1 %v7032_v43 }
 0x261   :  { %v6257_v51 = vpop.f32.mrf.mxu1 }
 0x262   :  { %6468 = vmatpush3.bf16.msra.mxu1 %v7033_v0  ;;  %6450 = vmatpush3.bf16.msra.mxu0 %v7034_v22 }
 0x263   :  { %v6258_v55 = vpop.f32.mrf.mxu1  ;;  %6451 = vmatprep.subr.bf16.mxu0 %v7035_v24  ;;  %6469 = vmatprep.subr.bf16.mxu1 %v7036_v46 }
 0x264   :  { %v6259_v8 = vadd.f32 %v6258_v55, %v6257_v51 }
 0x265   :  { %v6260_v36 = vpop.f32.mrf.mxu1 }
 0x266   :  { %v1792_v28 = vadd.f32 %v6259_v8, %v1752_v7  ;;  %6470 = vmatpush3.bf16.msra.mxu1 %v7037_v52  ;;  %6452 = vmatpush3.bf16.msra.mxu0 %v7038_v2 }
 0x267   :  { %v6261_v39 = vpop.f32.mrf.mxu1  ;;  %6453 = vmatprep.subr.bf16.mxu0 %v7039_v59  ;;  %6471 = vmatprep.subr.bf16.mxu1 %v7040_v61 }
 0x268   :  { %v1797_v13 = vmax.f32 %v1792_v28, 0.0  ;;  %v7048_v28 = vld [vmem:[%s8931_s3 + $0x770] sm:$0xff]  }
 0x26a   :  { %v1805_v14 = vrot.slane %v1797_v13, %v8314_v54  ;;  %6472 = vmatpush3.bf16.msra.mxu1 %v7041_v9  ;;  %6454 = vmatpush3.bf16.msra.mxu0 %v7042_v10 }
 0x26b   :  { %6473 = vmatprep.subr.bf16.mxu1 %v7043_v40  ;;  %6483 = vmatprep.subr.bf16.mxu0 %v7044_v12  ;;  %v7051_v12 = vld [vmem:[%s8931_s3 + $0x768] sm:$0xff]  }
 0x26c   :  { %v1806_v42 = vcombine.high %v1805_v14, %v1805_v14  ;;  %v1813_v23 = vrot.slane %v1805_v14, %v8314_v54 }
 0x26e   :  { %v1824_v29 = vrot.slane %v1813_v23, %v8333_v26  ;;  %v1820_v30 = vrot.slane %v1806_v42, %v8314_v54  ;;  %6474 = vmatpush3.bf16.msra.mxu1 %v7045_v15  ;;  %v7054_v42 = vld [vmem:[%s8931_s3 + $0x728] sm:$0xff]  }
 0x26f   :  { %6475 = vmatprep.subr.bf16.mxu1 %v7047_v16  ;;  %v7053_v16 = vld [vmem:[%s8931_s3 + $0x7b8] sm:$0xff]  }
 0x270   :  { %1829 = vrot.lane.b32.xlu1 %v1824_v29, %s7111_s21  ;;  %v1828_v33 = vrot.slane %v1820_v30, %v8333_v26  ;;  %v7055_v30 = vld [vmem:[%s8931_s3 + $0x760] sm:$0xff]  }
 0x272   :  { %6476 = vmatpush3.bf16.msra.mxu1 %v7049_v31  ;;  %v7056_v31 = vld [vmem:[%s8931_s3 + $0x7f0] sm:$0xff]  }
 0x273   :  { %6505 = vmatprep.subr.bf16.mxu1 %v7052_v32  ;;  %v7057_v32 = vld [vmem:[%s8931_s3 + $0x720] sm:$0xff]  }
 0x274   :  { %1831 = vrot.lane.b32.xlu1 %v1828_v33, %s7111_s21  ;;  %v7058_v33 = vld [vmem:[%s8931_s3 + $0x7b0] sm:$0xff]  }
 0x279   :  { %v6279_v34 = vpop.f32.mrf.mxu0 }
 0x27b   :  { %v6280_v18 = vpop.f32.mrf.mxu0 }
 0x27c   :  { %v6281_v41 = vadd.f32 %v6280_v18, %v6279_v34  ;;  %v7060_v18 = vld [vmem:[%s8931_s3 + $0x7e8] sm:$0xff]  }
 0x27d   :  { %v6282_v38 = vpop.f32.mrf.mxu0 }
 0x27e   :  { %v2157_v57 = vadd.f32 %v6281_v41, %v5605_v37  ;;  %v7061_v41 = vld [vmem:[%s8931_s3 + $0x718] sm:$0xff]   ;;  %v7062_v37 = vld [vmem:[%s8931_s3 + $0x7a8] sm:$0xff]  }
 0x27f   :  { %v6283_v35 = vpop.f32.mrf.mxu0 }
 0x281   :  { %v6301_v44 = vpop.f32.mrf.mxu1 }
 0x283   :  { %v6302_v56 = vpop.f32.mrf.mxu1 }
 0x284   :  { %v6303_v4 = vadd.f32 %v6302_v56, %v6301_v44  ;;  %v7063_v44 = vld [vmem:[%s8931_s3 + $0x750] sm:$0xff]   ;;  %v7064_v56 = vld [vmem:[%s8931_s3 + $0x7e0] sm:$0xff]  }
 0x285   :  { %v6304_v6 = vpop.f32.mrf.mxu1 }
 0x286   :  { %v2197_v58 = vadd.f32 %v6303_v4, %v2157_v57  ;;  %v7065_v57 = vld [vmem:[%s8931_s3 + $0x710] sm:$0xff]   ;;  %v7066_v4 = vld [vmem:[%s8931_s3 + $0x7a0] sm:$0xff]   ;;  %v7067_v6 = vld [vmem:[%s8931_s3 + $0x748] sm:$0xff]  }
 0x287   :  { %v6305_v53 = vpop.f32.mrf.mxu1 }
 0x288   :  { %v2202_v19 = vmax.f32 %v2197_v58, 0.0  ;;  %v7068_v58 = vld [vmem:[%s8931_s3 + $0x7d8] sm:$0xff]  }
 0x28a   :  { %v2210_v43 = vrot.slane %v2202_v19, %v8314_v54 }
 0x28b   :  { %v930_v63 = vpop.permute.xlu1 %929 }
 0x28c   :  { %v2211_v0 = vcombine.high %v2210_v43, %v2210_v43  ;;  %932 = vst.msk [vmem:[#allocation2 + $0x25] sm:$0x1] %vm595_vm2, %v930_v63  ;;  %v2218_v22 = vrot.slane %v2210_v43, %v8314_v54  ;;  %v7069_v63 = vld [vmem:[%s8931_s3 + $0x708] sm:$0xff]  }
 0x28d   :  { %939 = vst.msk [vmem:[#allocation2 + $0x25] sm:$0x1] %vm606_vm3, %v933_v17  ;;  %v944_v45 = vpop.permute.xlu0 %943 }
 0x28e   :  { %946 = vst.msk [vmem:[#allocation2 + $0x2d] sm:$0x1] %vm595_vm2, %v944_v45  ;;  %v2229_v24 = vrot.slane %v2218_v22, %v8333_v26  ;;  %v2225_v46 = vrot.slane %v2211_v0, %v8314_v54  ;;  %v7070_v0 = vld [vmem:[%s8931_s3 + $0x798] sm:$0xff]   ;;  %v7071_v22 = vld [vmem:[%s8931_s3 + $0x740] sm:$0xff]   ;;  %v7072_v45 = vld [vmem:[%s8931_s3 + $0x7d0] sm:$0xff]  }
 0x28f   :  { %953 = vst.msk [vmem:[#allocation2 + $0x2d] sm:$0x1] %vm606_vm3, %v947_v20  ;;  %v935_v47 = vpop.permute.xlu1 %934 }
 0x290   :  { %2234 = vrot.lane.b32.xlu0 %v2229_v24, %s7111_s21  ;;  %937 = vst.msk [vmem:[#allocation2 + $0x24] sm:$0x1] %vm606_vm3, %v935_v47  ;;  %v2233_v17 = vrot.slane %v2225_v46, %v8333_v26  ;;  %v7073_v46 = vld [vmem:[%s8931_s3 + $0x700] sm:$0xff]   ;;  %v7074_v47 = vld [vmem:[%s8931_s3 + $0x790] sm:$0xff]  }
 0x291   :  { %v949_v48 = vpop.permute.xlu0 %948 }
 0x292   :  { %951 = vst.msk [vmem:[#allocation2 + $0x2c] sm:$0x1] %vm606_vm3, %v949_v48 }
 0x293   :  { %v958_v51 = vpop.permute.xlu1 %957 }
 0x294   :  { %2236 = vrot.lane.b32.xlu0 %v2233_v17, %s7111_s21  ;;  %960 = vst.msk [vmem:[#allocation2 + $0x35] sm:$0x1] %vm595_vm2, %v958_v51  ;;  %v7075_v17 = vld [vmem:[%s8931_s3 + $0x7c8] sm:$0xff]  }
 0x295   :  { %967 = vst.msk [vmem:[#allocation2 + $0x35] sm:$0x1] %vm606_vm3, %v961_v1  ;;  %v972_v20 = vpop.permute.xlu0 %971  ;;  %v7076_v51 = vld [vmem:[%s8931_s3 + $0x788] sm:$0xff]  }
 0x296   :  { %974 = vst.msk [vmem:[#allocation2 + $0x3d] sm:$0x1] %vm595_vm2, %v972_v20 }
 0x297   :  { %981 = vst.msk [vmem:[#allocation2 + $0x3d] sm:$0x1] %vm606_vm3, %v975_v3  ;;  %v963_v52 = vpop.permute.xlu1 %962  ;;  %v3445_v2 = vld [vmem:[#allocation2 + $0x20] sm:$0x30] }
 0x298   :  { %965 = vst.msk [vmem:[#allocation2 + $0x34] sm:$0x1] %vm606_vm3, %v963_v52  ;;  %v3449_v61 = vpack.c.bf16 %v3445_v2, %v3445_v2  ;;  %v7077_v52 = vld [vmem:[%s8931_s3 + $0x7c0] sm:$0xff]  }
 0x299   :  { %v977_v55 = vpop.permute.xlu0 %976  ;;  %v3446_v59 = vld [vmem:[#allocation2 + $0x28] sm:$0x30] }
 0x29a   :  { %979 = vst.msk [vmem:[#allocation2 + $0x3c] sm:$0x1] %vm606_vm3, %v977_v55  ;;  %v3450_v7 = vpack.c.bf16 %v3446_v59, %v3446_v59  ;;  %v3530_v36 = vrot.slane %v3449_v61, 2  ;;  %v7078_v55 = vld [vmem:[%s8931_s3 + $0x780] sm:$0xff]  }
 0x29b   :  { %v985_v8 = vpop.permute.xlu1 %984 }
 0x29c   :  { %987 = vst.msk [vmem:[#allocation2 + $0x27] sm:$0x1] %vm595_vm2, %v985_v8  ;;  %v3531_v1 = vrot.slane %v3450_v7, 2 }
 0x29d   :  { %994 = vst.msk [vmem:[#allocation2 + $0x27] sm:$0x1] %vm606_vm3, %v988_v25  ;;  %v999_v3 = vpop.permute.xlu0 %998  ;;  %v7050_v25 = vld [vmem:[%s8931_s3 + $0x730] sm:$0xff]   ;;  %s5334_s3 = sshll.u32 %s7120_s27, 4  ;;  %s5335_s3 = int_to_ptr.vmem [resolvable:$true] %s5334_s3 }
 0x29e   :  { %1001 = vst.msk [vmem:[#allocation2 + $0x2f] sm:$0x1] %vm595_vm2, %v999_v3  ;;  %3762 = vmatprep.mubr.bf16.mxu0 %v3531_v1  ;;  %p7090_p1 = scmp.lt.s32.totalorder %s5335_s3, %s5335_s3 }
 0x29f   :  { %1008 = vst.msk [vmem:[#allocation2 + $0x2f] sm:$0x1] %vm606_vm3, %v1002_v50  ;;  %v990_v9 = vpop.permute.xlu1 %989  ;;  %3763 = vmatmul.mubr.bf16.vlgmr.msra.gmra.mxu0 %v3530_v36  ;;  %v3447_v10 = vld [vmem:[#allocation2 + $0x30] sm:$0x30] }
 0x2a0   :  { %992 = vst.msk [vmem:[#allocation2 + $0x26] sm:$0x1] %vm606_vm3, %v990_v9  ;;  %6484 = vmatpush3.bf16.msra.mxu0 %v7046_v11  ;;  %v3451_v13 = vpack.c.bf16 %v3447_v10, %v3447_v10  ;;  %v5703_v9 = vld [vmem:[%s8932_s4 + $0x3] ss:$0 sm:$0xff] }
 0x2a1   :  { %v1004_v39 = vpop.permute.xlu0 %1003  ;;  %6485 = vmatprep.subr.bf16.mxu0 %v7048_v28  ;;  %v3448_v40 = vld [vmem:[#allocation2 + $0x38] sm:$0x30] }
 0x2a2   :  { %1006 = vst.msk [vmem:[#allocation2 + $0x2e] sm:$0x1] %vm606_vm3, %v1004_v39  ;;  %v3452_v50 = vpack.c.bf16 %v3448_v40, %v3448_v40  ;;  %v3532_v29 = vrot.slane %v3451_v13, 2 }
 0x2a3   :  { %v1013_v14 = vpop.permute.xlu1 %1012 }
 0x2a4   :  { %1015 = vst.msk [vmem:[#allocation2 + $0x37] sm:$0x1] %vm595_vm2, %v1013_v14  ;;  %6486 = vmatpush3.bf16.msra.mxu0 %v7050_v25  ;;  %v3533_v15 = vrot.slane %v3452_v50, 2 }
 0x2a5   :  { %1022 = vst.msk [vmem:[#allocation2 + $0x37] sm:$0x1] %vm606_vm3, %v1016_v60  ;;  %v1027_v23 = vpop.permute.xlu0 %1026  ;;  %6487 = vmatprep.subr.bf16.mxu0 %v7051_v12 }
 0x2a6   :  { %1029 = vst.msk [vmem:[#allocation2 + $0x3f] sm:$0x1] %vm595_vm2, %v1027_v23  ;;  %3802 = vmatprep.mubr.bf16.mxu1 %v3533_v15 }
 0x2a7   :  { %1036 = vst.msk [vmem:[#allocation2 + $0x3f] sm:$0x1] %vm606_vm3, %v1030_v49  ;;  %3803 = vmatmul.mubr.bf16.vlgmr.msra.gmra.mxu1 %v3532_v29  ;;  %v1018_v60 = vpop.permute.xlu1 %1017  ;;  %v3850_v24 = vld [vmem:[#allocation2 + $0x20] sm:$0xc0] }
 0x2a8   :  { %6506 = vmatpush3.bf16.msra.mxu1 %v7053_v16  ;;  %1020 = vst.msk [vmem:[#allocation2 + $0x36] sm:$0x1] %vm606_vm3, %v1018_v60  ;;  %6488 = vmatpush3.bf16.msra.mxu0 %v7054_v42  ;;  %v3854_v48 = vpack.c.bf16 %v3850_v24, %v3850_v24 }
 0x2a9   :  { %v1032_v34 = vpop.permute.xlu0 %1031  ;;  %6489 = vmatprep.subr.bf16.mxu0 %v7055_v30  ;;  %6507 = vmatprep.subr.bf16.mxu1 %v7056_v31  ;;  %v3851_v49 = vld [vmem:[#allocation2 + $0x28] sm:$0xc0] }
 0x2aa   :  { %1034 = vst.msk [vmem:[#allocation2 + $0x3e] sm:$0x1] %vm606_vm3, %v1032_v34  ;;  %v3855_v38 = vpack.c.bf16 %v3851_v49, %v3851_v49  ;;  %v3935_v20 = vrot.slane %v3854_v48, 3 }
 0x2ac   :  { %6490 = vmatpush3.bf16.msra.mxu0 %v7057_v32  ;;  %6508 = vmatpush3.bf16.msra.mxu1 %v7058_v33  ;;  %v3936_v35 = vrot.slane %v3855_v38, 3 }
 0x2ad   :  { %6491 = vmatprep.subr.bf16.mxu0 %v7059_v27  ;;  %6509 = vmatprep.subr.bf16.mxu1 %v7060_v18  ;;  %v5801_v18 = vld [vmem:[%s8932_s4 + $0x4] ss:$0 sm:$0xff] }
 0x2ae   :  { %4167 = vmatprep.mubr.bf16.mxu0 %v3936_v35 }
 0x2af   :  { %v3852_v2 = vld [vmem:[#allocation2 + $0x30] sm:$0xc0] }
 0x2b0   :  { %6492 = vmatpush3.bf16.msra.mxu0 %v7061_v41  ;;  %6510 = vmatpush3.bf16.msra.mxu1 %v7062_v37  ;;  %v3856_v59 = vpack.c.bf16 %v3852_v2, %v3852_v2 }
 0x2b1   :  { %6493 = vmatprep.subr.bf16.mxu0 %v7063_v44  ;;  %6511 = vmatprep.subr.bf16.mxu1 %v7064_v56  ;;  %v3853_v53 = vld [vmem:[#allocation2 + $0x38] sm:$0xc0] }
 0x2b2   :  { %v3857_v19 = vpack.c.bf16 %v3853_v53, %v3853_v53  ;;  %v3937_v7 = vrot.slane %v3856_v59, 3 }
 0x2b4   :  { %6494 = vmatpush3.bf16.msra.mxu0 %v7065_v57  ;;  %6512 = vmatpush3.bf16.msra.mxu1 %v7066_v4  ;;  %v3938_v43 = vrot.slane %v3857_v19, 3 }
 0x2b5   :  { %6495 = vmatprep.subr.bf16.mxu0 %v7067_v6  ;;  %6513 = vmatprep.subr.bf16.mxu1 %v7068_v58 }
 0x2b6   :  { %4207 = vmatprep.mubr.bf16.mxu1 %v3938_v43 }
 0x2b8   :  { %6496 = vmatpush3.bf16.msra.mxu0 %v7069_v63  ;;  %6514 = vmatpush3.bf16.msra.mxu1 %v7070_v0 }
 0x2b9   :  { %6497 = vmatprep.subr.bf16.mxu0 %v7071_v22  ;;  %6515 = vmatprep.subr.bf16.mxu1 %v7072_v45 }
 0x2bc   :  { %6498 = vmatpush3.bf16.msra.mxu0 %v7073_v46  ;;  %6516 = vmatpush3.bf16.msra.mxu1 %v7074_v47  ;;  %v5899_v46 = vld [vmem:[%s8932_s4 + $0x5] ss:$0 sm:$0xff] }
 0x2bd   :  { %6517 = vmatprep.subr.bf16.mxu1 %v7075_v17  ;;  %6655 = vmatprep.subr.mxu0 %v7110_v5 }
 0x2bf   :  { %4168 = vmatmul.mubr.bf16.vlgmr.msra.gmra.mxu0 %v3935_v20 }
 0x2c0   :  { %6518 = vmatpush3.bf16.msra.mxu1 %v7076_v51  ;;  %6671 = vmatprep.mubr.msk.bf16.mxu0 %vm7118_vm7, %v7110_v5 }
 0x2c1   :  { %6519 = vmatprep.subr.bf16.mxu1 %v7077_v52 }
 0x2c2   :  { %v1424_v61 = vpop.permute.xlu0 %1423 }
 0x2c3   :  { %1430 = vst.msk [vmem:[#allocation3] sm:$0x1] %vm1429_vm5, %v1424_v61 }
 0x2c4   :  { %6520 = vmatpush3.bf16.msra.mxu1 %v7078_v55 }
 0x2c5   :  { %6675 = vmatprep.subr.mxu1 %v7110_v5 }
 0x2c6   :  { %v1426_v8 = vpop.permute.xlu0 %1425 }
 0x2c7   :  { %1431 = vst.msk [vmem:[#allocation3 + $0x8] sm:$0x1] %vm1429_vm5, %v1426_v8  ;;  %4208 = vmatmul.mubr.bf16.vlgmr.msra.gmra.mxu1 %v3937_v7 }
 0x2c8   :  { %6691 = vmatprep.mubr.msk.bf16.mxu1 %vm7118_vm7, %v7110_v5 }
 0x2cd   :  { %v6323_v1 = vpop.f32.mrf.mxu0 }
 0x2cf   :  { %v6324_v11 = vpop.f32.mrf.mxu0 }
 0x2d0   :  { %v6325_v28 = vadd.f32 %v6324_v11, %v6323_v1 }
 0x2d1   :  { %v6326_v3 = vpop.f32.mrf.mxu0 }
 0x2d2   :  { %v2562_v39 = vadd.f32 %v6325_v28, %v5703_v9 }
 0x2d3   :  { %v6327_v36 = vpop.f32.mrf.mxu0 }
 0x2d5   :  { %v6345_v10 = vpop.f32.mrf.mxu1 }
 0x2d7   :  { %v6346_v25 = vpop.f32.mrf.mxu1 }
 0x2d8   :  { %v6347_v40 = vadd.f32 %v6346_v25, %v6345_v10  ;;  %v5997_v10 = vld [vmem:[%s8932_s4 + $0x6] ss:$0 sm:$0xff] }
 0x2d9   :  { %v6348_v12 = vpop.f32.mrf.mxu1 }
 0x2da   :  { %v2602_v13 = vadd.f32 %v6347_v40, %v2562_v39 }
 0x2db   :  { %v6349_v50 = vpop.f32.mrf.mxu1 }
 0x2dc   :  { %v2607_v14 = vmax.f32 %v2602_v13, 0.0 }
 0x2de   :  { %v2615_v15 = vrot.slane %v2607_v14, %v8314_v54 }
 0x2e0   :  { %v2616_v16 = vcombine.high %v2615_v15, %v2615_v15  ;;  %v2623_v42 = vrot.slane %v2615_v15, %v8314_v54 }
 0x2e2   :  { %v1830_v23 = vpop.permute.xlu1 %1829  ;;  %v2634_v29 = vrot.slane %v2623_v42, %v8333_v26  ;;  %v2630_v30 = vrot.slane %v2616_v16, %v8314_v54 }
 0x2e3   :  { %1835 = vst.msk [vmem:[#allocation3 + $0x1] sm:$0x1] %vm1429_vm5, %v1830_v23 }
 0x2e4   :  { %2639 = vrot.lane.b32.xlu1 %v2634_v29, %s7111_s21  ;;  %v2638_v60 = vrot.slane %v2630_v30, %v8333_v26 }
 0x2e6   :  { %v1832_v31 = vpop.permute.xlu1 %1831 }
 0x2e7   :  { %1836 = vst.msk [vmem:[#allocation3 + $0x9] sm:$0x1] %vm1429_vm5, %v1832_v31 }
 0x2e8   :  { %2641 = vrot.lane.b32.xlu1 %v2638_v60, %s7111_s21 }
 0x2ed   :  { %v6367_v32 = vpop.f32.mrf.mxu0 }
 0x2ef   :  { %v6368_v33 = vpop.f32.mrf.mxu0 }
 0x2f0   :  { %v6369_v49 = vadd.f32 %v6368_v33, %v6367_v32 }
 0x2f1   :  { %v6370_v34 = vpop.f32.mrf.mxu0 }
 0x2f2   :  { %v2955_v41 = vadd.f32 %v6369_v49, %v5801_v18 }
 0x2f3   :  { %v6371_v27 = vpop.f32.mrf.mxu0 }
 0x2f5   :  { %v6389_v38 = vpop.f32.mrf.mxu1 }
 0x2f7   :  { %v6390_v35 = vpop.f32.mrf.mxu1 }
 0x2f8   :  { %v6391_v37 = vadd.f32 %v6390_v35, %v6389_v38 }
 0x2f9   :  { %v6392_v44 = vpop.f32.mrf.mxu1 }
 0x2fa   :  { %v2995_v56 = vadd.f32 %v6391_v37, %v2955_v41  ;;  %v6095_v41 = vld [vmem:[%s8932_s4 + $0x7] ss:$0 sm:$0xff]  ;;  %s7112_s4 = smov 121  }
 0x2fb   :  { %v6393_v57 = vpop.f32.mrf.mxu1 }
 0x2fc   :  { %v3000_v4 = vmax.f32 %v2995_v56, 0.0 }
 0x2fe   :  { %v3008_v6 = vrot.slane %v3000_v4, %v8314_v54 }
 0x300   :  { %v3016_v58 = vrot.slane %v3008_v6, %v8314_v54  ;;  %v3009_v16 = vcombine.high %v3008_v6, %v3008_v6 }
 0x302   :  { %v2235_v53 = vpop.permute.xlu0 %2234  ;;  %v3027_v19 = vrot.slane %v3016_v58, %v8333_v26  ;;  %v3023_v31 = vrot.slane %v3009_v16, %v8314_v54 }
 0x303   :  { %2240 = vst.msk [vmem:[#allocation3 + $0x2] sm:$0x1] %vm1429_vm5, %v2235_v53 }
 0x304   :  { %3032 = vrot.lane.b32.xlu0 %v3027_v19, %s7111_s21  ;;  %v3031_v32 = vrot.slane %v3023_v31, %v8333_v26 }
 0x306   :  { %v2237_v43 = vpop.permute.xlu0 %2236 }
 0x307   :  { %2241 = vst.msk [vmem:[#allocation3 + $0xa] sm:$0x1] %vm1429_vm5, %v2237_v43 }
 0x30d   :  { %v6411_v63 = vpop.f32.mrf.mxu0 }
 0x30f   :  { %v6412_v0 = vpop.f32.mrf.mxu0 }
 0x310   :  { %v6413_v24 = vadd.f32 %v6412_v0, %v6411_v63 }
 0x311   :  { %v6414_v22 = vpop.f32.mrf.mxu0 }
 0x312   :  { %v3360_v17 = vadd.f32 %v6413_v24, %v5899_v46 }
 0x313   :  { %v6415_v45 = vpop.f32.mrf.mxu0 }
 0x315   :  { %v6433_v47 = vpop.f32.mrf.mxu1 }
 0x317   :  { %v6434_v48 = vpop.f32.mrf.mxu1 }
 0x318   :  { %v6435_v51 = vadd.f32 %v6434_v48, %v6433_v47 }
 0x319   :  { %v6436_v20 = vpop.f32.mrf.mxu1 }
 0x31a   :  { %v3400_v52 = vadd.f32 %v6435_v51, %v3360_v17 }
 0x31b   :  { %v6437_v2 = vpop.f32.mrf.mxu1 }
 0x31c   :  { %v3405_v55 = vmax.f32 %v3400_v52, 0.0 }
 0x31e   :  { %v3413_v59 = vrot.slane %v3405_v55, %v8314_v54 }
 0x320   :  { %v3421_v61 = vrot.slane %v3413_v59, %v8314_v54  ;;  %v3414_v19 = vcombine.high %v3413_v59, %v3413_v59  ;;  %v4359_v59 = vld [vmem:[%s8934_s6 + $0x8] sm:$0xff] }
 0x322   :  { %v3432_v7 = vrot.slane %v3421_v61, %v8333_v26  ;;  %v3428_v45 = vrot.slane %v3414_v19, %v8314_v54  ;;  %v4358_v61 = vld [vmem:[%s8934_s6] sm:$0xff] }
 0x324   :  { %3437 = vrot.lane.b32.xlu1 %v3432_v7, %s7111_s21  ;;  %v3436_v46 = vrot.slane %v3428_v45, %v8333_v26 }
 0x356   :  { %v2640_v8 = vpop.permute.xlu1 %2639 }
 0x357   :  { %2645 = vst.msk [vmem:[#allocation3 + $0x3] sm:$0x1] %vm1429_vm5, %v2640_v8 }
 0x35a   :  { %v2642_v1 = vpop.permute.xlu1 %2641 }
 0x35b   :  { %2646 = vst.msk [vmem:[#allocation3 + $0xb] sm:$0x1] %vm1429_vm5, %v2642_v1 }
 0x35f   :  { %v6455_v11 = vpop.f32.mrf.mxu0 }
 0x361   :  { %v6456_v3 = vpop.f32.mrf.mxu0 }
 0x362   :  { %v6457_v9 = vadd.f32 %v6456_v3, %v6455_v11 }
 0x363   :  { %v6458_v36 = vpop.f32.mrf.mxu0 }
 0x364   :  { %v3765_v40 = vadd.f32 %v6457_v9, %v5997_v10 }
 0x365   :  { %v6459_v28 = vpop.f32.mrf.mxu0 }
 0x367   :  { %v6477_v25 = vpop.f32.mrf.mxu1 }
 0x369   :  { %v6478_v39 = vpop.f32.mrf.mxu1 }
 0x36a   :  { %v6479_v12 = vadd.f32 %v6478_v39, %v6477_v25 }
 0x36b   :  { %v6480_v13 = vpop.f32.mrf.mxu1 }
 0x36c   :  { %v3805_v50 = vadd.f32 %v6479_v12, %v3765_v40 }
 0x36d   :  { %v6481_v14 = vpop.f32.mrf.mxu1 }
 0x36e   :  { %v3810_v15 = vmax.f32 %v3805_v50, 0.0 }
 0x370   :  { %v3818_v42 = vrot.slane %v3810_v15, %v8314_v54 }
 0x372   :  { %v3826_v23 = vrot.slane %v3818_v42, %v8314_v54  ;;  %v3819_v29 = vcombine.high %v3818_v42, %v3818_v42 }
 0x374   :  { %v3837_v30 = vrot.slane %v3826_v23, %v8333_v26  ;;  %v3833_v33 = vrot.slane %v3819_v29, %v8314_v54 }
 0x376   :  { %v3033_v60 = vpop.permute.xlu0 %3032  ;;  %3842 = vrot.lane.b32.xlu0 %v3837_v30, %s7111_s21  ;;  %v3841_v34 = vrot.slane %v3833_v33, %v8333_v26 }
 0x377   :  { %3038 = vst.msk [vmem:[#allocation3 + $0x4] sm:$0x1] %vm1429_vm5, %v3033_v60 }
 0x37a   :  { %3034 = vrot.lane.b32.xlu0 %v3031_v32, %s7111_s21  ;;  %v7079_v32 = vld [vmem:[%s8933_s5] sm:$0xff]  }
 0x37e   :  { %3844 = vrot.lane.b32.xlu0 %v3841_v34, %s7111_s21 }
 0x37f   :  { %v6499_v27 = vpop.f32.mrf.mxu0 }
 0x381   :  { %v6500_v49 = vpop.f32.mrf.mxu0 }
 0x382   :  { %v6501_v35 = vadd.f32 %v6500_v49, %v6499_v27 }
 0x383   :  { %v6502_v18 = vpop.f32.mrf.mxu0 }
 0x384   :  { %v4170_v56 = vadd.f32 %v6501_v35, %v6095_v41 }
 0x385   :  { %v6503_v38 = vpop.f32.mrf.mxu0 }
 0x386   :  { %v7080_v38 = vld [vmem:[%s8933_s5] sm:$0xff]  }
 0x387   :  { %v6521_v37 = vpop.f32.mrf.mxu1 }
 0x389   :  { %v6522_v44 = vpop.f32.mrf.mxu1 }
 0x38a   :  { %v6523_v57 = vadd.f32 %v6522_v44, %v6521_v37 }
 0x38b   :  { %v6524_v4 = vpop.f32.mrf.mxu1 }
 0x38c   :  { %v4210_v6 = vadd.f32 %v6523_v57, %v4170_v56 }
 0x38d   :  { %v6525_v58 = vpop.f32.mrf.mxu1 }
 0x38e   :  { %v4215_v53 = vmax.f32 %v4210_v6, 0.0 }
 0x390   :  { %v4223_v43 = vrot.slane %v4215_v53, %v8314_v54 }
 0x392   :  { %v4231_v63 = vrot.slane %v4223_v43, %v8314_v54  ;;  %v4224_v0 = vcombine.high %v4223_v43, %v4223_v43 }
 0x394   :  { %v4242_v22 = vrot.slane %v4231_v63, %v8333_v26  ;;  %v4238_v47 = vrot.slane %v4224_v0, %v8314_v54 }
 0x396   :  { %4247 = vrot.lane.b32.xlu1 %v4242_v22, %s7111_s21  ;;  %v3438_v24 = vpop.permute.xlu1 %3437  ;;  %v4246_v48 = vrot.slane %v4238_v47, %v8333_v26 }
 0x397   :  { %3443 = vst.msk [vmem:[#allocation3 + $0x5] sm:$0x1] %vm1429_vm5, %v3438_v24 }
 0x39a   :  { %3439 = vrot.lane.b32.xlu1 %v3436_v46, %s7111_s21 }
 0x39e   :  { %4249 = vrot.lane.b32.xlu1 %v4246_v48, %s7111_s21 }
 0x3e8   :  { %v3843_v17 = vpop.permute.xlu0 %3842 }
 0x3e9   :  { %3848 = vst.msk [vmem:[#allocation3 + $0x6] sm:$0x1] %vm1429_vm5, %v3843_v17 }
 0x3ec   :  { %v3035_v51 = vpop.permute.xlu0 %3034 }
 0x3ed   :  { %3039 = vst.msk [vmem:[#allocation3 + $0xc] sm:$0x1] %vm1429_vm5, %v3035_v51 }
 0x3f0   :  { %v3845_v20 = vpop.permute.xlu0 %3844 }
 0x3f1   :  { %3849 = vst.msk [vmem:[#allocation3 + $0xe] sm:$0x1] %vm1429_vm5, %v3845_v20 }
 0x408   :  { %v4248_v52 = vpop.permute.xlu1 %4247 }
 0x409   :  { %4253 = vst.msk [vmem:[#allocation3 + $0x7] sm:$0x1] %vm1429_vm5, %v4248_v52 }
 0x40c   :  { %v3440_v2 = vpop.permute.xlu1 %3439 }
 0x40d   :  { %3444 = vst.msk [vmem:[#allocation3 + $0xd] sm:$0x1] %vm1429_vm5, %v3440_v2 }
 0x410   :  { %v8663_v54 = vld [vmem:[#allocation3] sm:$0xff]  ;;  %v4250_v26 = vpop.permute.xlu1 %4249 }
 0x411   :  { %4258 = vst.msk [vmem:[#allocation4] sm:$0xff] %vm4257_vm6, %v8663_v54  ;;  %4336 = vrot.lane.b32.xlu0 %v8663_v54, %s7112_s4  ;;  %4324 = vrot.lane.b32.xlu1 %v8663_v54, %s7113_s17 }
 0x412   :  { %4254 = vst.msk [vmem:[#allocation3 + $0xf] sm:$0x1] %vm1429_vm5, %v4250_v26 }
 0x415   :  { %4312 = vrot.lane.b32.xlu0 %v8663_v54, %s7114_s18  ;;  %4300 = vrot.lane.b32.xlu1 %v8663_v54, %s7115_s19 }
 0x418   :  { %v4350_v33 = vld [vmem:[#allocation4] sm:$0xff] }
 0x419   :  { %v8676_v55 = vld [vmem:[#allocation3 + $0x8] sm:$0xff]  ;;  %4288 = vrot.lane.b32.xlu1 %v8663_v54, %s7116_s20 }
 0x41a   :  { %4259 = vst.msk [vmem:[#allocation4 + $0x40] sm:$0xff] %vm4257_vm6, %v8676_v55  ;;  %4338 = vrot.lane.b32.xlu0 %v8676_v55, %s7112_s4 }
 0x41d   :  { %4276 = vrot.lane.b32.xlu1 %v8663_v54, %s7117_s22 }
 0x41e   :  { %4326 = vrot.lane.b32.xlu0 %v8676_v55, %s7113_s17 }
 0x421   :  { %4264 = vrot.lane.b32.xlu1 %v8663_v54, %s7119_s1  ;;  %v4468_v35 = vld [vmem:[#allocation4 + $0x40] sm:$0xff] }
 0x422   :  { %4314 = vrot.lane.b32.xlu0 %v8676_v55, %s7114_s18 }
 0x425   :  { %4290 = vrot.lane.b32.xlu1 %v8676_v55, %s7116_s20 }
 0x426   :  { %4302 = vrot.lane.b32.xlu0 %v8676_v55, %s7115_s19 }
 0x429   :  { %4266 = vrot.lane.b32.xlu1 %v8676_v55, %s7119_s1 }
 0x42a   :  { %4278 = vrot.lane.b32.xlu0 %v8676_v55, %s7117_s22 }
 0x42d   :  { %4362 = vperm.xlu1 %6798, %v4358_v61  }
 0x42e   :  { %4367 = vperm.xlu0 %6797, %v4359_v59  }
 0x431   :  { %4480 = vperm.xlu1 %6798, %v4358_v61  }
 0x432   :  { %4485 = vperm.xlu0 %6797, %v4359_v59  }
 0x483   :  { %v4337_v7 = vpop.permute.xlu0 %4336  ;;  %v4325_v8 = vpop.permute.xlu1 %4324 }
 0x484   :  { %4342 = vst.msk [vmem:[#allocation4 + $0x38] sm:$0xff] %vm4257_vm6, %v4337_v7  ;;  %4330 = vst.msk [vmem:[#allocation4 + $0x30] sm:$0xff] %vm4257_vm6, %v4325_v8 }
 0x487   :  { %v4313_v1 = vpop.permute.xlu0 %4312  ;;  %v4301_v11 = vpop.permute.xlu1 %4300 }
 0x488   :  { %4318 = vst.msk [vmem:[#allocation4 + $0x28] sm:$0xff] %vm4257_vm6, %v4313_v1  ;;  %4306 = vst.msk [vmem:[#allocation4 + $0x20] sm:$0xff] %vm4257_vm6, %v4301_v11  ;;  %v4777_v1 = vld [vmem:[%s8936_s8 + $0x8] sm:$0xff]  ;;  %v4776_v11 = vld [vmem:[%s8936_s8] sm:$0xff] }
 0x48b   :  { %v4289_v36 = vpop.permute.xlu1 %4288  ;;  %v4357_v28 = vld [vmem:[#allocation4 + $0x38] sm:$0xff]  ;;  %v4356_v9 = vld [vmem:[#allocation4 + $0x30] sm:$0xff] }
 0x48c   :  { %v4339_v3 = vpop.permute.xlu0 %4338  ;;  %4294 = vst.msk [vmem:[#allocation4 + $0x18] sm:$0xff] %vm4257_vm6, %v4289_v36  ;;  %6656 = vmatpush3.msra.mxu0 %v4357_v28 }
 0x48d   :  { %4343 = vst.msk [vmem:[#allocation4 + $0x78] sm:$0xff] %vm4257_vm6, %v4339_v3  ;;  %6657 = vmatprep.subr.mxu0 %v7110_v5  ;;  %v4873_v3 = vld [vmem:[%s8938_s10 + $0x8] sm:$0xff] }
 0x48e   :  { %6658 = vmatpush3.msra.mxu0 %v4356_v9 }
 0x48f   :  { %6659 = vmatprep.subr.mxu0 %v7110_v5  ;;  %v4277_v25 = vpop.permute.xlu1 %4276  ;;  %v4355_v39 = vld [vmem:[#allocation4 + $0x28] sm:$0xff]  ;;  %v4354_v40 = vld [vmem:[#allocation4 + $0x20] sm:$0xff] }
 0x490   :  { %v4327_v10 = vpop.permute.xlu0 %4326  ;;  %4282 = vst.msk [vmem:[#allocation4 + $0x10] sm:$0xff] %vm4257_vm6, %v4277_v25  ;;  %6660 = vmatpush3.msra.mxu0 %v4355_v39 }
 0x491   :  { %4331 = vst.msk [vmem:[#allocation4 + $0x70] sm:$0xff] %vm4257_vm6, %v4327_v10  ;;  %6661 = vmatprep.subr.mxu0 %v7110_v5 }
 0x492   :  { %6662 = vmatpush3.msra.mxu0 %v4354_v40 }
 0x493   :  { %6663 = vmatprep.subr.mxu0 %v7110_v5  ;;  %v4265_v13 = vpop.permute.xlu1 %4264  ;;  %v4353_v50 = vld [vmem:[#allocation4 + $0x18] sm:$0xff] }
 0x494   :  { %v4315_v12 = vpop.permute.xlu0 %4314  ;;  %v4475_v14 = vld [vmem:[#allocation4 + $0x78] sm:$0xff]  ;;  %4270 = vst.msk [vmem:[#allocation4 + $0x8] sm:$0xff] %vm4257_vm6, %v4265_v13  ;;  %6664 = vmatpush3.msra.mxu0 %v4353_v50 }
 0x495   :  { %4319 = vst.msk [vmem:[#allocation4 + $0x68] sm:$0xff] %vm4257_vm6, %v4315_v12  ;;  %6676 = vmatpush3.msra.mxu1 %v4475_v14  ;;  %6665 = vmatprep.subr.mxu0 %v7110_v5 }
 0x496   :  { %6677 = vmatprep.subr.mxu1 %v7110_v5 }
 0x497   :  { %v4291_v16 = vpop.permute.xlu1 %4290  ;;  %v4352_v42 = vld [vmem:[#allocation4 + $0x10] sm:$0xff] }
 0x498   :  { %v4303_v15 = vpop.permute.xlu0 %4302  ;;  %v4474_v23 = vld [vmem:[#allocation4 + $0x70] sm:$0xff]  ;;  %4295 = vst.msk [vmem:[#allocation4 + $0x58] sm:$0xff] %vm4257_vm6, %v4291_v16  ;;  %6666 = vmatpush3.msra.mxu0 %v4352_v42 }
 0x499   :  { %4307 = vst.msk [vmem:[#allocation4 + $0x60] sm:$0xff] %vm4257_vm6, %v4303_v15  ;;  %6678 = vmatpush3.msra.mxu1 %v4474_v23  ;;  %6667 = vmatprep.subr.mxu0 %v7110_v5 }
 0x49a   :  { %6679 = vmatprep.subr.mxu1 %v7110_v5 }
 0x49b   :  { %v4267_v30 = vpop.permute.xlu1 %4266  ;;  %v4351_v31 = vld [vmem:[#allocation4 + $0x8] sm:$0xff] }
 0x49c   :  { %v4279_v29 = vpop.permute.xlu0 %4278  ;;  %v4473_v60 = vld [vmem:[#allocation4 + $0x68] sm:$0xff]  ;;  %4271 = vst.msk [vmem:[#allocation4 + $0x48] sm:$0xff] %vm4257_vm6, %v4267_v30  ;;  %6668 = vmatpush3.msra.mxu0 %v4351_v31 }
 0x49d   :  { %4283 = vst.msk [vmem:[#allocation4 + $0x50] sm:$0xff] %vm4257_vm6, %v4279_v29  ;;  %6680 = vmatpush3.msra.mxu1 %v4473_v60  ;;  %6669 = vmatprep.subr.mxu0 %v7110_v5 }
 0x49e   :  { %6681 = vmatprep.subr.mxu1 %v7110_v5  ;;  %6670 = vmatpush3.msra.mxu0 %v4350_v33 }
 0x49f   :  { %6672 = vmatmul.mubr.msk.bf16.vlgmr.msra.gmra.mxu0 %vm4375_vm8, %v7079_v32  ;;  %6695 = vmatprep.subr.mxu0 %v7110_v5  ;;  %v4471_v27 = vld [vmem:[#allocation4 + $0x58] sm:$0xff] }
 0x4a0   :  { %v4472_v34 = vld [vmem:[#allocation4 + $0x60] sm:$0xff]  ;;  %6727 = vmatprep.mubr.msk.bf16.mxu0 %vm7118_vm7, %v7110_v5 }
 0x4a1   :  { %6682 = vmatpush3.msra.mxu1 %v4472_v34 }
 0x4a2   :  { %6683 = vmatprep.subr.mxu1 %v7110_v5 }
 0x4a3   :  { %6684 = vmatpush3.msra.mxu1 %v4471_v27  ;;  %v4469_v18 = vld [vmem:[#allocation4 + $0x48] sm:$0xff] }
 0x4a4   :  { %6685 = vmatprep.subr.mxu1 %v7110_v5  ;;  %v4470_v49 = vld [vmem:[#allocation4 + $0x50] sm:$0xff] }
 0x4a5   :  { %6686 = vmatpush3.msra.mxu1 %v4470_v49 }
 0x4a6   :  { %6687 = vmatprep.subr.mxu1 %v7110_v5 }
 0x4a7   :  { %6688 = vmatpush3.msra.mxu1 %v4469_v18 }
 0x4a8   :  { %6689 = vmatprep.subr.mxu1 %v7110_v5  ;;  %v4363_v41 = vpop.permute.xlu1 %4362 }
 0x4a9   :  { %6690 = vmatpush3.msra.mxu1 %v4468_v35  ;;  %v4368_v4 = vpop.permute.xlu0 %4367 }
 0x4aa   :  { %6692 = vmatmul.mubr.msk.bf16.vlgmr.msra.gmra.mxu1 %vm4375_vm8, %v7080_v38  ;;  %6731 = vmatprep.subr.mxu1 %v7110_v5 }
 0x4ab   :  { %6733 = vmatprep.mubr.msk.bf16.mxu1 %vm7118_vm7, %v7110_v5 }
 0x4ac   :  { %v4481_v43 = vpop.permute.xlu1 %4480 }
 0x4ad   :  { %v4486_v24 = vpop.permute.xlu0 %4485 }
 0x55f   :  { %v4445_v37 = vpop.f32.mrf.mxu0 }
 0x560   :  { %v4446_v44 = vadd.f32 %v4445_v37, %v4363_v41 }
 0x561   :  { %v6673_v56 = vpop.f32.mrf.mxu0 }
 0x562   :  { %v4452_v57 = vmax.f32 %v4446_v44, 0.0 }
 0x563   :  { %v4448_v6 = vpop.f32.mrf.mxu0 }
 0x564   :  { %v4449_v58 = vadd.f32 %v4448_v6, %v4368_v4  ;;  %4456 = vrot.lane.b32.xlu1 %v4452_v57, %s7111_s21 }
 0x565   :  { %v6674_v53 = vpop.f32.mrf.mxu0 }
 0x566   :  { %v4453_v19 = vmax.f32 %v4449_v58, 0.0 }
 0x568   :  { %4458 = vrot.lane.b32.xlu0 %v4453_v19, %s7111_s21 }
 0x56a   :  { %v4562_v63 = vpop.f32.mrf.mxu1 }
 0x56b   :  { %v4563_v0 = vadd.f32 %v4562_v63, %v4481_v43 }
 0x56c   :  { %v6693_v22 = vpop.f32.mrf.mxu1 }
 0x56d   :  { %v4569_v45 = vmax.f32 %v4563_v0, 0.0 }
 0x56e   :  { %v4565_v46 = vpop.f32.mrf.mxu1 }
 0x56f   :  { %v4566_v47 = vadd.f32 %v4565_v46, %v4486_v24  ;;  %4573 = vrot.lane.b32.xlu1 %v4569_v45, %s7111_s21 }
 0x570   :  { %v6694_v48 = vpop.f32.mrf.mxu1 }
 0x571   :  { %v4570_v17 = vmax.f32 %v4566_v47, 0.0 }
 0x573   :  { %4575 = vrot.lane.b32.xlu0 %v4570_v17, %s7111_s21  ;;  %4890 = vrot.lane.b32.xlu1 %v8663_v54, %s7112_s4  ;;  %v7081_v54 = vld [vmem:[%s8937_s9] sm:$0xff]  }
 0x5d6   :  { %v4457_v51 = vpop.permute.xlu1 %4456 }
 0x5d7   :  { %4463 = vst.msk [vmem:[#allocation5] sm:$0xff] %vm4462_vm9, %v4457_v51 }
 0x5da   :  { %v4459_v20 = vpop.permute.xlu0 %4458 }
 0x5db   :  { %4464 = vst.msk [vmem:[#allocation5 + $0x8] sm:$0xff] %vm4462_vm9, %v4459_v20 }
 0x5de   :  { %v4582_v52 = vld [vmem:[#allocation5] sm:$0xff] }
 0x5df   :  { %4586 = vst.msk [vmem:[#allocation6] sm:$0xff] %vm4257_vm6, %v4582_v52  ;;  %4742 = vrot.lane.b32.xlu1 %v4582_v52, %s7112_s4  ;;  %4670 = vrot.lane.b32.xlu0 %v4582_v52, %s7115_s19 }
 0x5e1   :  { %v4574_v2 = vpop.permute.xlu1 %4573 }
 0x5e2   :  { %4580 = vst.msk [vmem:[#allocation5 + $0x10] sm:$0xff] %vm4462_vm9, %v4574_v2  ;;  %v4583_v26 = vld [vmem:[#allocation5 + $0x8] sm:$0xff] }
 0x5e3   :  { %4587 = vst.msk [vmem:[#allocation6 + $0x8] sm:$0xff] %vm4257_vm6, %v4583_v26  ;;  %4718 = vrot.lane.b32.xlu1 %v4582_v52, %s7113_s17  ;;  %4646 = vrot.lane.b32.xlu0 %v4582_v52, %s7116_s20 }
 0x5e5   :  { %v4576_v59 = vpop.permute.xlu0 %4575  ;;  %v4891_v61 = vpop.permute.xlu1 %4890 }
 0x5e6   :  { %4581 = vst.msk [vmem:[#allocation5 + $0x18] sm:$0xff] %vm4462_vm9, %v4576_v59  ;;  %6732 = vmatpush3.msra.mxu1 %v4891_v61  ;;  %v7082_v61 = vld [vmem:[%s8935_s7] sm:$0xff]  }
 0x5e7   :  { %6734 = vmatmul.mubr.msk.bf16.vlgmr.msra.gmra.mxu1 %vm4893_vm10, %v7081_v54  ;;  %6737 = vmatprep.subr.mxu1 %v7110_v5 }
 0x5e8   :  { %4694 = vrot.lane.b32.xlu1 %v4582_v52, %s7114_s18  ;;  %6769 = vmatprep.mubr.msk.bf16.mxu1 %vm7118_vm7, %v7110_v5 }
 0x5e9   :  { %v4584_v7 = vld [vmem:[#allocation5 + $0x10] sm:$0xff] }
 0x5ea   :  { %4588 = vst.msk [vmem:[#allocation6 + $0x80] sm:$0xff] %vm4257_vm6, %v4584_v7  ;;  %4746 = vrot.lane.b32.xlu0 %v4584_v7, %s7112_s4  ;;  %v4761_v59 = vld [vmem:[#allocation6 + $0x8] sm:$0xff] }
 0x5ec   :  { %4698 = vrot.lane.b32.xlu1 %v4584_v7, %s7114_s18 }
 0x5ed   :  { %v4585_v8 = vld [vmem:[#allocation5 + $0x18] sm:$0xff] }
 0x5ee   :  { %4589 = vst.msk [vmem:[#allocation6 + $0x88] sm:$0xff] %vm4257_vm6, %v4585_v8  ;;  %4722 = vrot.lane.b32.xlu0 %v4584_v7, %s7113_s17 }
 0x5f0   :  { %4696 = vrot.lane.b32.xlu1 %v4583_v26, %s7114_s18 }
 0x5f2   :  { %4744 = vrot.lane.b32.xlu0 %v4583_v26, %s7112_s4 }
 0x5f4   :  { %4672 = vrot.lane.b32.xlu1 %v4583_v26, %s7115_s19 }
 0x5f6   :  { %4720 = vrot.lane.b32.xlu0 %v4583_v26, %s7113_s17 }
 0x5f8   :  { %4674 = vrot.lane.b32.xlu1 %v4584_v7, %s7115_s19 }
 0x5fa   :  { %4648 = vrot.lane.b32.xlu0 %v4583_v26, %s7116_s20 }
 0x5fc   :  { %4650 = vrot.lane.b32.xlu1 %v4584_v7, %s7116_s20 }
 0x5fe   :  { %4748 = vrot.lane.b32.xlu0 %v4585_v8, %s7112_s4 }
 0x600   :  { %4700 = vrot.lane.b32.xlu1 %v4585_v8, %s7114_s18 }
 0x602   :  { %4724 = vrot.lane.b32.xlu0 %v4585_v8, %s7113_s17 }
 0x604   :  { %4676 = vrot.lane.b32.xlu1 %v4585_v8, %s7115_s19 }
 0x606   :  { %4624 = vrot.lane.b32.xlu0 %v4583_v26, %s7117_s22 }
 0x608   :  { %4652 = vrot.lane.b32.xlu1 %v4585_v8, %s7116_s20 }
 0x60a   :  { %4622 = vrot.lane.b32.xlu0 %v4582_v52, %s7117_s22 }
 0x60c   :  { %4628 = vrot.lane.b32.xlu1 %v4585_v8, %s7117_s22 }
 0x60e   :  { %4600 = vrot.lane.b32.xlu0 %v4583_v26, %s7119_s1 }
 0x610   :  { %4604 = vrot.lane.b32.xlu1 %v4585_v8, %s7119_s1 }
 0x612   :  { %4598 = vrot.lane.b32.xlu0 %v4582_v52, %s7119_s1 }
 0x614   :  { %5110 = vrot.lane.b32.xlu1 %v8676_v55, %s7112_s4  ;;  %v4872_v55 = vld [vmem:[%s8938_s10] sm:$0xff] }
 0x616   :  { %4626 = vrot.lane.b32.xlu0 %v4584_v7, %s7117_s22 }
 0x618   :  { %4785 = vperm.xlu1 %6798, %v4777_v1  }
 0x61a   :  { %4602 = vrot.lane.b32.xlu0 %v4584_v7, %s7119_s1  ;;  %v4760_v7 = vld [vmem:[#allocation6] sm:$0xff] }
 0x61c   :  { %5004 = vperm.xlu1 %6798, %v4777_v1  }
 0x61e   :  { %4780 = vperm.xlu0 %6797, %v4776_v11  }
 0x620   :  { %4881 = vperm.xlu1 %6798, %v4873_v3  }
 0x622   :  { %4999 = vperm.xlu0 %6797, %v4776_v11  }
 0x624   :  { %5101 = vperm.xlu1 %6798, %v4873_v3  }
 0x626   :  { %4876 = vperm.xlu0 %6797, %v4872_v55  }
 0x62a   :  { %5096 = vperm.xlu0 %6797, %v4872_v55   ;;  %v4980_v55 = vld [vmem:[#allocation6 + $0x88] sm:$0xff] }
 0x651   :  { %v4671_v36 = vpop.permute.xlu0 %4670  ;;  %v4743_v28 = vpop.permute.xlu1 %4742 }
 0x652   :  { %4682 = vst.msk [vmem:[#allocation6 + $0x40] sm:$0xff] %vm4257_vm6, %v4671_v36  ;;  %4754 = vst.msk [vmem:[#allocation6 + $0x70] sm:$0xff] %vm4257_vm6, %v4743_v28  ;;  %v7083_v36 = vld [vmem:[%s8935_s7] sm:$0xff]  }
 0x653   :  { %v7084_v28 = vld [vmem:[%s8937_s9] sm:$0xff]  }
 0x655   :  { %v4647_v9 = vpop.permute.xlu0 %4646  ;;  %v4719_v10 = vpop.permute.xlu1 %4718 }
 0x656   :  { %4658 = vst.msk [vmem:[#allocation6 + $0x30] sm:$0xff] %vm4257_vm6, %v4647_v9  ;;  %4730 = vst.msk [vmem:[#allocation6 + $0x60] sm:$0xff] %vm4257_vm6, %v4719_v10  ;;  %v4979_v9 = vld [vmem:[#allocation6 + $0x80] sm:$0xff] }
 0x659   :  { %v4774_v30 = vld [vmem:[#allocation6 + $0x70] sm:$0xff]  ;;  %v4768_v44 = vld [vmem:[#allocation6 + $0x40] sm:$0xff] }
 0x65a   :  { %v4695_v25 = vpop.permute.xlu1 %4694 }
 0x65b   :  { %4706 = vst.msk [vmem:[#allocation6 + $0x50] sm:$0xff] %vm4257_vm6, %v4695_v25 }
 0x65c   :  { %v4747_v39 = vpop.permute.xlu0 %4746 }
 0x65d   :  { %4756 = vst.msk [vmem:[#allocation6 + $0xf0] sm:$0xff] %vm4257_vm6, %v4747_v39  ;;  %v4772_v33 = vld [vmem:[#allocation6 + $0x60] sm:$0xff]  ;;  %v4766_v53 = vld [vmem:[#allocation6 + $0x30] sm:$0xff] }
 0x65e   :  { %v4699_v40 = vpop.permute.xlu1 %4698 }
 0x65f   :  { %4708 = vst.msk [vmem:[#allocation6 + $0xd0] sm:$0xff] %vm4257_vm6, %v4699_v40 }
 0x660   :  { %v4723_v12 = vpop.permute.xlu0 %4722 }
 0x661   :  { %4732 = vst.msk [vmem:[#allocation6 + $0xe0] sm:$0xff] %vm4257_vm6, %v4723_v12 }
 0x662   :  { %v4697_v13 = vpop.permute.xlu1 %4696  ;;  %v4770_v18 = vld [vmem:[#allocation6 + $0x50] sm:$0xff] }
 0x663   :  { %4707 = vst.msk [vmem:[#allocation6 + $0x58] sm:$0xff] %vm4257_vm6, %v4697_v13 }
 0x664   :  { %v4745_v50 = vpop.permute.xlu0 %4744  ;;  %v4993_v56 = vld [vmem:[#allocation6 + $0xf0] sm:$0xff] }
 0x665   :  { %4755 = vst.msk [vmem:[#allocation6 + $0x78] sm:$0xff] %vm4257_vm6, %v4745_v50 }
 0x666   :  { %v4673_v14 = vpop.permute.xlu1 %4672  ;;  %v4989_v45 = vld [vmem:[#allocation6 + $0xd0] sm:$0xff] }
 0x667   :  { %4683 = vst.msk [vmem:[#allocation6 + $0x48] sm:$0xff] %vm4257_vm6, %v4673_v14 }
 0x668   :  { %v4721_v15 = vpop.permute.xlu0 %4720  ;;  %v4991_v19 = vld [vmem:[#allocation6 + $0xe0] sm:$0xff] }
 0x669   :  { %4731 = vst.msk [vmem:[#allocation6 + $0x68] sm:$0xff] %vm4257_vm6, %v4721_v15 }
 0x66a   :  { %v4675_v16 = vpop.permute.xlu1 %4674  ;;  %v4771_v27 = vld [vmem:[#allocation6 + $0x58] sm:$0xff] }
 0x66b   :  { %4684 = vst.msk [vmem:[#allocation6 + $0xc0] sm:$0xff] %vm4257_vm6, %v4675_v16 }
 0x66c   :  { %v4649_v42 = vpop.permute.xlu0 %4648  ;;  %v4775_v23 = vld [vmem:[#allocation6 + $0x78] sm:$0xff] }
 0x66d   :  { %4659 = vst.msk [vmem:[#allocation6 + $0x38] sm:$0xff] %vm4257_vm6, %v4649_v42  ;;  %6696 = vmatpush3.msra.mxu0 %v4775_v23 }
 0x66e   :  { %6697 = vmatprep.subr.mxu0 %v7110_v5  ;;  %v4651_v29 = vpop.permute.xlu1 %4650  ;;  %v4769_v35 = vld [vmem:[#allocation6 + $0x48] sm:$0xff] }
 0x66f   :  { %4660 = vst.msk [vmem:[#allocation6 + $0xb0] sm:$0xff] %vm4257_vm6, %v4651_v29  ;;  %6698 = vmatpush3.msra.mxu0 %v4774_v30 }
 0x670   :  { %v4749_v31 = vpop.permute.xlu0 %4748  ;;  %6699 = vmatprep.subr.mxu0 %v7110_v5  ;;  %v4773_v60 = vld [vmem:[#allocation6 + $0x68] sm:$0xff] }
 0x671   :  { %4757 = vst.msk [vmem:[#allocation6 + $0xf8] sm:$0xff] %vm4257_vm6, %v4749_v31  ;;  %6700 = vmatpush3.msra.mxu0 %v4773_v60 }
 0x672   :  { %6701 = vmatprep.subr.mxu0 %v7110_v5  ;;  %v4701_v32 = vpop.permute.xlu1 %4700  ;;  %v4987_v48 = vld [vmem:[#allocation6 + $0xc0] sm:$0xff] }
 0x673   :  { %4709 = vst.msk [vmem:[#allocation6 + $0xd8] sm:$0xff] %vm4257_vm6, %v4701_v32  ;;  %6702 = vmatpush3.msra.mxu0 %v4772_v33 }
 0x674   :  { %v4725_v34 = vpop.permute.xlu0 %4724  ;;  %6703 = vmatprep.subr.mxu0 %v7110_v5  ;;  %v4767_v4 = vld [vmem:[#allocation6 + $0x38] sm:$0xff] }
 0x675   :  { %4733 = vst.msk [vmem:[#allocation6 + $0xe8] sm:$0xff] %vm4257_vm6, %v4725_v34  ;;  %6704 = vmatpush3.msra.mxu0 %v4771_v27 }
 0x676   :  { %6705 = vmatprep.subr.mxu0 %v7110_v5  ;;  %v4677_v49 = vpop.permute.xlu1 %4676  ;;  %v4985_v52 = vld [vmem:[#allocation6 + $0xb0] sm:$0xff] }
 0x677   :  { %4685 = vst.msk [vmem:[#allocation6 + $0xc8] sm:$0xff] %vm4257_vm6, %v4677_v49  ;;  %6706 = vmatpush3.msra.mxu0 %v4770_v18 }
 0x678   :  { %v4625_v38 = vpop.permute.xlu0 %4624  ;;  %6707 = vmatprep.subr.mxu0 %v7110_v5  ;;  %v4994_v41 = vld [vmem:[#allocation6 + $0xf8] sm:$0xff] }
 0x679   :  { %4635 = vst.msk [vmem:[#allocation6 + $0x28] sm:$0xff] %vm4257_vm6, %v4625_v38  ;;  %6708 = vmatpush3.msra.mxu0 %v4769_v35  ;;  %6738 = vmatpush3.msra.mxu1 %v4994_v41 }
 0x67a   :  { %6709 = vmatprep.subr.mxu0 %v7110_v5  ;;  %6739 = vmatprep.subr.mxu1 %v7110_v5  ;;  %v4653_v37 = vpop.permute.xlu1 %4652  ;;  %v4990_v0 = vld [vmem:[#allocation6 + $0xd8] sm:$0xff] }
 0x67b   :  { %4661 = vst.msk [vmem:[#allocation6 + $0xb8] sm:$0xff] %vm4257_vm6, %v4653_v37  ;;  %6710 = vmatpush3.msra.mxu0 %v4768_v44  ;;  %6740 = vmatpush3.msra.mxu1 %v4993_v56 }
 0x67c   :  { %v4623_v57 = vpop.permute.xlu0 %4622  ;;  %6711 = vmatprep.subr.mxu0 %v7110_v5  ;;  %6741 = vmatprep.subr.mxu1 %v7110_v5  ;;  %v4992_v6 = vld [vmem:[#allocation6 + $0xe8] sm:$0xff] }
 0x67d   :  { %4634 = vst.msk [vmem:[#allocation6 + $0x20] sm:$0xff] %vm4257_vm6, %v4623_v57  ;;  %6712 = vmatpush3.msra.mxu0 %v4767_v4  ;;  %6742 = vmatpush3.msra.mxu1 %v4992_v6 }
 0x67e   :  { %6713 = vmatprep.subr.mxu0 %v7110_v5  ;;  %6743 = vmatprep.subr.mxu1 %v7110_v5  ;;  %v4629_v58 = vpop.permute.xlu1 %4628  ;;  %v4988_v47 = vld [vmem:[#allocation6 + $0xc8] sm:$0xff] }
 0x67f   :  { %4637 = vst.msk [vmem:[#allocation6 + $0xa8] sm:$0xff] %vm4257_vm6, %v4629_v58  ;;  %6714 = vmatpush3.msra.mxu0 %v4766_v53  ;;  %6744 = vmatpush3.msra.mxu1 %v4991_v19 }
 0x680   :  { %v4601_v43 = vpop.permute.xlu0 %4600  ;;  %6715 = vmatprep.subr.mxu0 %v7110_v5  ;;  %6745 = vmatprep.subr.mxu1 %v7110_v5  ;;  %v4765_v63 = vld [vmem:[#allocation6 + $0x28] sm:$0xff] }
 0x681   :  { %4611 = vst.msk [vmem:[#allocation6 + $0x18] sm:$0xff] %vm4257_vm6, %v4601_v43  ;;  %6716 = vmatpush3.msra.mxu0 %v4765_v63  ;;  %6746 = vmatpush3.msra.mxu1 %v4990_v0 }
 0x682   :  { %6747 = vmatprep.subr.mxu1 %v7110_v5  ;;  %v4605_v22 = vpop.permute.xlu1 %4604  ;;  %6717 = vmatprep.subr.mxu0 %v7110_v5  ;;  %v4986_v20 = vld [vmem:[#allocation6 + $0xb8] sm:$0xff] }
 0x683   :  { %4613 = vst.msk [vmem:[#allocation6 + $0x98] sm:$0xff] %vm4257_vm6, %v4605_v22  ;;  %6748 = vmatpush3.msra.mxu1 %v4989_v45  ;;  %v5200_v45 = vld [vmem:[%s8939_s11] sm:$0xff] }
 0x684   :  { %v4599_v24 = vpop.permute.xlu0 %4598  ;;  %6749 = vmatprep.subr.mxu1 %v7110_v5  ;;  %v4764_v46 = vld [vmem:[#allocation6 + $0x20] sm:$0xff] }
 0x685   :  { %4610 = vst.msk [vmem:[#allocation6 + $0x10] sm:$0xff] %vm4257_vm6, %v4599_v24  ;;  %6718 = vmatpush3.msra.mxu0 %v4764_v46  ;;  %6750 = vmatpush3.msra.mxu1 %v4988_v47 }
 0x686   :  { %6751 = vmatprep.subr.mxu1 %v7110_v5  ;;  %6719 = vmatprep.subr.mxu0 %v7110_v5  ;;  %v4984_v54 = vld [vmem:[#allocation6 + $0xa8] sm:$0xff]  ;;  %v5111_v11 = vpop.permute.xlu1 %5110 }
 0x687   :  { %6752 = vmatpush3.msra.mxu1 %v4987_v48 }
 0x688   :  { %v4627_v17 = vpop.permute.xlu0 %4626  ;;  %6753 = vmatprep.subr.mxu1 %v7110_v5  ;;  %v4763_v51 = vld [vmem:[#allocation6 + $0x18] sm:$0xff] }
 0x689   :  { %4636 = vst.msk [vmem:[#allocation6 + $0xa0] sm:$0xff] %vm4257_vm6, %v4627_v17  ;;  %6720 = vmatpush3.msra.mxu0 %v4763_v51  ;;  %6754 = vmatpush3.msra.mxu1 %v4986_v20  ;;  %v5202_v17 = vld [vmem:[%s8939_s11 + $0x10] sm:$0xff] }
 0x68a   :  { %6755 = vmatprep.subr.mxu1 %v7110_v5  ;;  %6721 = vmatprep.subr.mxu0 %v7110_v5  ;;  %v4982_v1 = vld [vmem:[#allocation6 + $0x98] sm:$0xff] }
 0x68b   :  { %6756 = vmatpush3.msra.mxu1 %v4985_v52  ;;  %v5201_v52 = vld [vmem:[%s8939_s11 + $0x8] sm:$0xff] }
 0x68c   :  { %v4603_v2 = vpop.permute.xlu0 %4602  ;;  %6757 = vmatprep.subr.mxu1 %v7110_v5  ;;  %v4762_v26 = vld [vmem:[#allocation6 + $0x10] sm:$0xff] }
 0x68d   :  { %4612 = vst.msk [vmem:[#allocation6 + $0x90] sm:$0xff] %vm4257_vm6, %v4603_v2  ;;  %6722 = vmatpush3.msra.mxu0 %v4762_v26  ;;  %6758 = vmatpush3.msra.mxu1 %v4984_v54 }
 0x68e   :  { %6723 = vmatprep.subr.mxu0 %v7110_v5  ;;  %6759 = vmatprep.subr.mxu1 %v7110_v5 }
 0x68f   :  { %6724 = vmatpush3.msra.mxu0 %v4761_v59 }
 0x690   :  { %6725 = vmatprep.subr.mxu0 %v7110_v5  ;;  %v4983_v8 = vld [vmem:[#allocation6 + $0xa0] sm:$0xff] }
 0x691   :  { %6726 = vmatpush3.msra.mxu0 %v4760_v7  ;;  %6760 = vmatpush3.msra.mxu1 %v4983_v8 }
 0x692   :  { %6728 = vmatmul.mubr.bf16.vlgmr.msra.gmra.mxu0 %v7082_v61  ;;  %6761 = vmatprep.subr.mxu1 %v7110_v5  ;;  %v5203_v61 = vld [vmem:[%s8939_s11 + $0x18] sm:$0xff] }
 0x693   :  { %6773 = vmatprep.subr.mxu0 %v7110_v5  ;;  %6762 = vmatpush3.msra.mxu1 %v4982_v1  ;;  %v4786_v13 = vpop.permute.xlu1 %4785 }
 0x694   :  { %6774 = vmatpush3.msra.mxu0 %v5111_v11  ;;  %6763 = vmatprep.subr.mxu1 %v7110_v5  ;;  %v4981_v3 = vld [vmem:[#allocation6 + $0x90] sm:$0xff] }
 0x695   :  { %6764 = vmatpush3.msra.mxu1 %v4981_v3  ;;  %6775 = vmatprep.mubr.msk.bf16.mxu0 %vm7118_vm7, %v7110_v5 }
 0x696   :  { %6765 = vmatprep.subr.mxu1 %v7110_v5 }
 0x697   :  { %6766 = vmatpush3.msra.mxu1 %v4980_v55  ;;  %v5005_v14 = vpop.permute.xlu1 %5004 }
 0x698   :  { %6767 = vmatprep.subr.mxu1 %v7110_v5 }
 0x699   :  { %6768 = vmatpush3.msra.mxu1 %v4979_v9  ;;  %v4781_v12 = vpop.permute.xlu0 %4780 }
 0x69a   :  { %6770 = vmatmul.mubr.bf16.vlgmr.msra.gmra.mxu1 %v7083_v36  ;;  %6776 = vmatmul.mubr.msk.bf16.vlgmr.msra.gmra.mxu0 %vm4893_vm10, %v7084_v28 }
 0x69b   :  { %v4882_v32 = vpop.permute.xlu1 %4881 }
 0x69d   :  { %v5000_v50 = vpop.permute.xlu0 %4999 }
 0x69f   :  { %v5102_v19 = vpop.permute.xlu1 %5101 }
 0x6a1   :  { %v4877_v42 = vpop.permute.xlu0 %4876 }
 0x6a5   :  { %v5097_v35 = vpop.permute.xlu0 %5096 }
 0x6a7   :  { %v4963_v10 = vpop.f32.mrf.mxu1 }
 0x6a8   :  { %v4964_v29 = vadd.f32 %v4963_v10, %v4877_v42 }
 0x6a9   :  { %v6735_v25 = vpop.f32.mrf.mxu1 }
 0x6ab   :  { %v4966_v39 = vpop.f32.mrf.mxu1 }
 0x6ac   :  { %v4967_v34 = vadd.f32 %v4966_v39, %v4882_v32 }
 0x6ad   :  { %v6736_v40 = vpop.f32.mrf.mxu1 }
 0x752   :  { %v4860_v15 = vpop.f32.mrf.mxu0 }
 0x753   :  { %v4861_v16 = vadd.f32 %v4860_v15, %v4781_v12 }
 0x754   :  { %v6729_v23 = vpop.f32.mrf.mxu0 }
 0x755   :  { %v4867_v30 = vmax.f32 %v4861_v16, 0.0 }
 0x756   :  { %v4863_v5 = vpop.f32.mrf.mxu0 }
 0x757   :  { %v4970_v31 = vadd.f32 %v4964_v29, %v4867_v30  ;;  %v4864_v60 = vadd.f32 %v4863_v5, %v4786_v13 }
 0x758   :  { %v6730_v33 = vpop.f32.mrf.mxu0 }
 0x759   :  { %v4972_v27 = vmax.f32 %v4970_v31, 0.0  ;;  %v4868_v49 = vmax.f32 %v4864_v60, 0.0 }
 0x75a   :  { %v5079_v18 = vpop.f32.mrf.mxu1  ;;  %v5182_v38 = vpop.f32.mrf.mxu0 }
 0x75b   :  { %4974 = vst.msk [vmem:[#allocation7] sm:$0xff] %vm4257_vm6, %v4972_v27  ;;  %v4971_v41 = vadd.f32 %v4967_v34, %v4868_v49  ;;  %v5080_v37 = vadd.f32 %v5079_v18, %v5000_v50  ;;  %v5183_v6 = vadd.f32 %v5182_v38, %v5097_v35  ;;  %v5245_v50 = vand.u32 127, %v1396_v21 }
 0x75c   :  { %v6771_v44 = vpop.f32.mrf.mxu1  ;;  %v6777_v56 = vpop.f32.mrf.mxu0 }
 0x75d   :  { %v4973_v57 = vmax.f32 %v4971_v41, 0.0  ;;  %v5086_v4 = vmax.f32 %v5080_v37, 0.0  ;;  %v5248_v29 = vsub.s32 %v5245_v50, %v8299_v62 }
 0x75e   :  { %v5082_v58 = vpop.f32.mrf.mxu1  ;;  %v5185_v53 = vpop.f32.mrf.mxu0 }
 0x75f   :  { %4975 = vst.msk [vmem:[#allocation7 + $0x8] sm:$0xff] %vm4257_vm6, %v4973_v57  ;;  %v5189_v43 = vadd.f32 %v5183_v6, %v5086_v4  ;;  %v5083_v63 = vadd.f32 %v5082_v58, %v5005_v14  ;;  %v5186_v47 = vadd.f32 %v5185_v53, %v5102_v19  ;;  %v5250_v14 = vadd.s32 4294967288, %v5245_v50  ;;  %v6138_v58 = vld [vmem:[%s8940_s12] ss:$0 sm:$0xff]  ;;  %s7085_s12 = scalar_lea.vmem %s5335_s3, 32 }
 0x760   :  { %v6772_v0 = vpop.f32.mrf.mxu1  ;;  %v6778_v22 = vpop.f32.mrf.mxu0  ;;  %p7086_p0 = scmp.ne.s32.totalorder %s5335_s3, %s7085_s12  ;;  %p7091_p2 = scmp.lt.s32.totalorder %s7085_s12, %s7085_s12 }
 0x761   :  { %v5191_v24 = vmax.f32 %v5189_v43, 0.0  ;;  %v5087_v46 = vmax.f32 %v5083_v63, 0.0  ;;  %v5253_v16 = vsub.s32 %v5250_v14, %v8299_v62 }
 0x762   :  { %v5196_v48 = vld [vmem:[#allocation7] sm:$0xff]  ;;  %p7092_p3 = por %p7091_p2, %p7090_p1 }
 0x763   :  { %5194 = vst.msk [vmem:[#allocation7 + $0x10] sm:$0xff] %vm4257_vm6, %v5191_v24  ;;  %v5190_v51 = vadd.f32 %v5186_v47, %v5087_v46  ;;  %v5204_v20 = vmul.f32 %v5200_v45, %v5196_v48  ;;  %v5206_v54 = vmul.f32 %v5202_v17, %v5196_v48 }
 0x764   :  { %p7093_p4 = pnand %p7092_p3, %p7086_p0 }
 0x765   :  { %v5192_v2 = vmax.f32 %v5190_v51, 0.0  ;;  %v5212_v26 = vsel %vm4257_vm6, %v5204_v20, 0.0  ;;  %v5218_v8 = vsel %vm4257_vm6, %v5206_v54, 0.0 }
 0x766   :  { %5213 = vadd.xlane.f32.xlu0 %v5212_v26  ;;  %v5197_v59 = vld [vmem:[#allocation7 + $0x8] sm:$0xff] }
 0x767   :  { %5195 = vst.msk [vmem:[#allocation7 + $0x18] sm:$0xff] %vm4257_vm6, %v5192_v2  ;;  %v5205_v7 = vmul.f32 %v5201_v52, %v5197_v59  ;;  %v5207_v11 = vmul.f32 %v5203_v61, %v5197_v59 }
 0x769   :  { %v5215_v1 = vsel %vm4257_vm6, %v5205_v7, 0.0  ;;  %v5221_v36 = vsel %vm4257_vm6, %v5207_v11, 0.0 }
 0x76a   :  { %5219 = vadd.xlane.f32.xlu0 %v5218_v8  ;;  %5216 = vadd.xlane.f32.xlu1 %v5215_v1  ;;  %v5198_v3 = vld [vmem:[#allocation7 + $0x10] sm:$0xff] }
 0x76b   :  { %v5208_v55 = vmul.f32 %v5200_v45, %v5198_v3  ;;  %v5210_v9 = vmul.f32 %v5202_v17, %v5198_v3 }
 0x76d   :  { %v5224_v28 = vsel %vm4257_vm6, %v5208_v55, 0.0  ;;  %v5230_v39 = vsel %vm4257_vm6, %v5210_v9, 0.0 }
 0x76e   :  { %5222 = vadd.xlane.f32.xlu0 %v5221_v36  ;;  %5225 = vadd.xlane.f32.xlu1 %v5224_v28  ;;  %v5199_v10 = vld [vmem:[#allocation7 + $0x18] sm:$0xff] }
 0x76f   :  { %v5209_v25 = vmul.f32 %v5201_v52, %v5199_v10  ;;  %v5211_v12 = vmul.f32 %v5203_v61, %v5199_v10 }
 0x771   :  { %v5227_v40 = vsel %vm4257_vm6, %v5209_v25, 0.0  ;;  %v5233_v13 = vsel %vm4257_vm6, %v5211_v12, 0.0 }
 0x772   :  { %5231 = vadd.xlane.f32.xlu1 %v5230_v39  ;;  %5228 = vadd.xlane.f32.xlu0 %v5227_v40 }
 0x776   :  { %5234 = vadd.xlane.f32.xlu0 %v5233_v13 }
 0x7ef   :  { %v5214_v15 = vpop.xlane.xlu0 %5213 }
 0x7f0   :  { %v5249_v60 = vrot.slane %v5214_v15, %v5248_v29 }
 0x7f3   :  { %v5220_v42 = vpop.xlane.xlu0 %5219  ;;  %v5217_v23 = vpop.xlane.xlu1 %5216 }
 0x7f4   :  { %v5254_v30 = vrot.slane %v5217_v23, %v5253_v16  ;;  %v5260_v32 = vrot.slane %v5220_v42, %v5248_v29 }
 0x7f6   :  { %v5256_v34 = vsel %vm5255_vm11, %v5254_v30, %v5249_v60 }
 0x7f7   :  { %v5223_v5 = vpop.xlane.xlu0 %5222  ;;  %v5226_v31 = vpop.xlane.xlu1 %5225 }
 0x7f8   :  { %v5264_v33 = vrot.slane %v5223_v5, %v5253_v16  ;;  %v5269_v41 = vrot.slane %v5226_v31, %v5248_v29 }
 0x7fa   :  { %v5265_v21 = vsel %vm5255_vm11, %v5264_v33, %v5260_v32 }
 0x7fb   :  { %v5229_v27 = vpop.xlane.xlu0 %5228  ;;  %v5285_v49 = vsel %vm5284_vm12, %v5265_v21, %v5256_v34  ;;  %v5232_v38 = vpop.xlane.xlu1 %5231 }
 0x7fc   :  { %v5290_v18 = vsel %vm5289_vm13, %v5285_v49, 0.0  ;;  %v5273_v62 = vrot.slane %v5229_v27, %v5253_v16  ;;  %v5278_v37 = vrot.slane %v5232_v38, %v5248_v29 }
 0x7fd   :  { %5291 = vadd.xlane.f32.xlu1 %v5290_v18 }
 0x7fe   :  { %v5274_v56 = vsel %vm5255_vm11, %v5273_v62, %v5269_v41 }
 0x7ff   :  { %v5235_v35 = vpop.xlane.xlu0 %5234 }
 0x800   :  { %v5282_v44 = vrot.slane %v5235_v35, %v5253_v16 }
 0x802   :  { %v5283_v57 = vsel %vm5255_vm11, %v5282_v44, %v5278_v37 }
 0x803   :  { %v5286_v4 = vsel %vm5284_vm12, %v5283_v57, %v5274_v56 }
 0x804   :  { %v5293_v6 = vsel %vm5289_vm13, %v5286_v4, 0.0 }
 0x805   :  { %5294 = vadd.xlane.f32.xlu0 %v5293_v6 }
 0x80e   :  { %5303 = vbcast.lane.b32.xlu1 %v6138_v58, 256 }
 0x886   :  { %v5292_v53 = vpop.xlane.xlu1 %5291 }
 0x88a   :  { %v5304_v19 = vpop.permute.xlu1 %5303 }
 0x88b   :  { %v5306_v43 = vadd.f32 %v5304_v19, %v5292_v53 }
 0x88d   :  { %5311 = vperm.xlu0 %6797, %v5306_v43  }
 0x88e   :  { %v5295_v63 = vpop.xlane.xlu0 %5294 }
 0x88f   :  { %v5307_v0 = vadd.f32 %v5304_v19, %v5295_v63 }
 0x891   :  { %5314 = vperm.xlu1 %6798, %v5307_v0  }
 0x908   :  { %v5312_v22 = vpop.permute.xlu0 %5311 }
 0x909   :  { %v5319_v24 = vrot.slane %v5312_v22, %v5248_v29 }
 0x90c   :  { %v5315_v45 = vpop.permute.xlu1 %5314 }
 0x90d   :  { %v5323_v46 = vrot.slane %v5315_v45, %v5248_v29 }
 0x90f   :  { %v5324_v47 = vsel %vm5284_vm12, %v5323_v46, %v5319_v24 }
 0x910   :  { %5327 = vst.msk [vmem:[#allocation8] sm:$0x3] %vm5326_vm14, %v5324_v47 }
 0x911   :  { %7096 = shalt.err (!%p7093_p4)
}
 0x912   :  { %5337 = dma.vmem_to_hbm [thread:$0]  %s5335_s3, 32, %s8941_s13, [#allocation9]  }
 0x913   :  { %7105 = dma.done.wait [#allocation9], 32  }
 0x914   :  { %7106 = vsyncadd [#allocation9], 4294967264 }
 0x915   :  { %5341 = vsyncpa [#allocation9], 1 }

</bundles_post_ra>
